<compile_context>
chip_gen: v7x
topology: tpu7x:2x2x1
jax: 0.10.0
libtpu: 0.0.40
codegen_flags: <defaults>
</compile_context>

<pallas_src>
import jax
import jax.numpy as jnp
from jax.experimental import pallas as pl
from jax.experimental.pallas import tpu as pltpu

LANE = 128
LP = 8   # left pad of the conv2 scratch along W (keeps the interior store sublane-aligned)


def _round_up(n, m):
    return (n + m - 1) // m * m


# ----------------------------------------------------------------------------
# Kernel
# ----------------------------------------------------------------------------
def _bottleneck_kernel(x_ref, xh_ref, w1_ref, s1_ref, b1_ref,
                       w2_ref, s2_ref, b2_ref, w3_ref, s3_ref, b3_ref,
                       out_ref, pad_ref):
    _, Th, W, Cin_p = x_ref.shape
    Wid_p = w1_ref.shape[1]
    Cout_p = w3_ref.shape[1]
    Wq = pad_ref.shape[1]
    M = Th * W
    pdt = pad_ref.dtype
    f32 = jnp.float32

    t = pl.program_id(1)

    # --- zero everything outside the interior W window [LP, LP+W) of the
    #     scratch (tiny; redone per step so it is safe under megacore
    #     sharding of both "parallel" grid axes). ----------------------------
    pad_ref[:, 0:LP, :] = jnp.zeros((Th + 2, LP, Wid_p), pdt)
    pad_ref[:, LP + W:Wq, :] = jnp.zeros((Th + 2, Wq - LP - W, Wid_p), pdt)

    s1 = s1_ref[...]
    b1 = b1_ref[...]

    # --- conv1 (1x1) + BN1 + ReLU on the two halo rows (row above / below
    #     this H tile).  Image-edge halos must be exactly zero (PyTorch pads
    #     the conv2 *input* with zeros), so zero first and overwrite only when
    #     a real neighbour row exists. --------------------------------------
    zrow = jnp.zeros((1, W, Wid_p), pdt)
    pad_ref[0:1, LP:LP + W, :] = zrow
    pad_ref[Th + 1:Th + 2, LP:LP + W, :] = zrow

    xh = xh_ref[0].reshape(2 * W, Cin_p)                     # bf16 halo x rows
    hh = jnp.dot(xh, w1_ref[...], preferred_element_type=f32)
    hh = jnp.maximum(hh * s1 + b1, 0.0).reshape(2, W, Wid_p)

    @pl.when(t > 0)
    def _():
        pad_ref[0:1, LP:LP + W, :] = hh[0:1].astype(pdt)

    @pl.when(t < pl.num_programs(1) - 1)
    def _():
        pad_ref[Th + 1:Th + 2, LP:LP + W, :] = hh[1:2].astype(pdt)

    # --- conv1 (1x1) + BN1 + ReLU on the Th interior rows: one full matmul.
    #     The store below starts at sublane offset LP=8 -> aligned. ----------
    h1 = jnp.dot(x_ref[...].reshape(M, Cin_p), w1_ref[...],
                 preferred_element_type=f32)
    h1 = jnp.maximum(h1 * s1 + b1, 0.0)
    pad_ref[1:Th + 1, LP:LP + W, :] = h1.reshape(Th, W, Wid_p).astype(pdt)

    # --- conv2 (3x3, stride 1, pad 1): 3 im2col matmuls, K = 3*Wid_p.
    #     One aligned slab load per dy; dx shifts are in-register slices.
    #     (pltpu.roll on the sublane axis would move those shifts to the XLU.)
    acc = None
    for dy in range(3):                                      # static 3-way unroll
        slab = pad_ref[dy:dy + Th]                           # (Th, Wq, Wid_p) bf16
        im = jnp.concatenate(
            [slab[:, LP - 1:LP - 1 + W, :],
             slab[:, LP:LP + W, :],
             slab[:, LP + 1:LP + 1 + W, :]],
            axis=-1).reshape(M, 3 * Wid_p)
        d = jnp.dot(im, w2_ref[dy], preferred_element_type=f32)
        acc = d if acc is None else acc + d
    h2 = jnp.maximum(acc * s2_ref[...] + b2_ref[...], 0.0)

    # --- conv3 (1x1) + BN3 + residual add + ReLU; bf16 output store. --------
    h3 = jnp.dot(h2.astype(jnp.bfloat16), w3_ref[...],
                 preferred_element_type=f32)
    h3 = h3 * s3_ref[...] + b3_ref[...]
    xres = x_ref[...].reshape(M, Cin_p).astype(f32)          # re-read: short live range
    out = jnp.maximum(h3 + xres, 0.0)
    out_ref[...] = out.astype(out_ref.dtype).reshape(1, Th, W, Cout_p)


# ----------------------------------------------------------------------------
# Wrapper
# ----------------------------------------------------------------------------
def _device_vmem_params():
    """(vmem_limit_bytes, per-step working-set budget) per chip generation."""
    try:
        kind = jax.devices()[0].device_kind.lower()
    except Exception:
        kind = ""
    if "v7" in kind:
        # v7x: 64 MiB physical VMEM per TensorCore -> leave headroom.
        return 40 * 1024 * 1024, 20 * 1024 * 1024
    # v5e / v6e: 128 MiB physical VMEM -> big blocks amortize per-step cost.
    return 64 * 1024 * 1024, 40 * 1024 * 1024


def _pick_tile_h(H, W, Cin_p, Wid_p, Cout_p, budget_bytes):
    """Largest divisor of H whose per-step VMEM working set fits the budget."""
    Wq = _round_up(LP + W + 1, 8)
    wbytes = (Cin_p * Wid_p + 9 * Wid_p * Wid_p + Wid_p * Cout_p) * 2
    best = 1
    for Th in range(1, H + 1):
        if H % Th:
            continue
        io = 2 * Th * W * (Cin_p + Cout_p) * 2 + 2 * 2 * W * Cin_p * 2   # dbl-buffered blocks
        scratch = (Th + 2) * Wq * Wid_p * 2
        tmp = Th * W * (3 * Wid_p * 2 + 2 * Wid_p * 4 + Cout_p * 4 + Cin_p * 4)
        if io + scratch + tmp + wbytes <= budget_bytes:
            best = Th
    return best


def prepare_bottleneck_params(w1, s1, b1, w2, s2, b2, w3, s3, b3):
    """Pad / cast weights and folded-BN params ONCE (call at model init)."""
    bf16, f32 = jnp.bfloat16, jnp.float32
    Cin, width = w1.shape
    Cout = w3.shape[1]
    Cin_p = _round_up(Cin, LANE)
    Wid_p = _round_up(width, LANE)
    Cout_p = _round_up(Cout, LANE)

    w1p = jnp.pad(w1, ((0, Cin_p - Cin), (0, Wid_p - width))).astype(bf16)
    w2p = jnp.pad(w2, ((0, 0), (0, 0),
                       (0, Wid_p - width), (0, Wid_p - width)))
    w2p = w2p.reshape(3, 3 * Wid_p, Wid_p).astype(bf16)       # K ordered (dx, cin)
    w3p = jnp.pad(w3, ((0, Wid_p - width), (0, Cout_p - Cout))).astype(bf16)

    def pv(v, cp):
        v = v.reshape(1, -1).astype(f32)
        return jnp.pad(v, ((0, 0), (0, cp - v.shape[1])))

    return dict(
        w1=w1p, s1=pv(s1, Wid_p), b1=pv(b1, Wid_p),
        w2=w2p, s2=pv(s2, Wid_p), b2=pv(b2, Wid_p),
        w3=w3p, s3=pv(s3, Cout_p), b3=pv(b3, Cout_p),
        dims=(Cin, width, Cout, Cin_p, Wid_p, Cout_p),
    )


def bottleneck_forward(x_nhwc, params, tile_h=None):
    """Fused Bottleneck forward.  Returns bf16 NHWC activations."""
    Cin, width, Cout, Cin_p, Wid_p, Cout_p = params["dims"]
    N, H, W, Cx = x_nhwc.shape
    assert Cx == Cin
    assert Cout == Cin, "downsample is None => inplanes must equal planes*4"

    bf16 = jnp.bfloat16

    # bf16 activation input; skip the channel-pad HBM pass when already aligned.
    if Cin_p != Cin:
        xp = jnp.pad(x_nhwc, ((0, 0), (0, 0), (0, 0), (0, Cin_p - Cin))).astype(bf16)
    elif x_nhwc.dtype != bf16:
        xp = x_nhwc.astype(bf16)       # ideally the producer already emits bf16
    else:
        xp = x_nhwc

    vmem_limit, budget = _device_vmem_params()
    Th = tile_h if tile_h is not None else _pick_tile_h(H, W, Cin_p, Wid_p, Cout_p, budget)
    assert H % Th == 0, "tile_h must divide H"
    n_ht = H // Th
    Wq = _round_up(LP + W + 1, 8)

    # Halo x rows (row above / below each H tile; zeros at the image border —
    # the kernel masks those to exact zeros anyway).  Tiny side input.
    zrow = jnp.zeros((N, 1, W, Cin_p), bf16)
    above = jnp.concatenate([zrow, xp[:, Th - 1:H - 1:Th]], axis=1)   # (N, n_ht, W, C)
    below = jnp.concatenate([xp[:, Th:H:Th], zrow], axis=1)           # (N, n_ht, W, C)
    x_halo = jnp.stack([above, below], axis=2).reshape(N * n_ht, 2, W, Cin_p)

    def full_spec(a):
        return pl.BlockSpec(a.shape, lambda n, t, _nd=a.ndim: (0,) * _nd)

    out_p = pl.pallas_call(
        _bottleneck_kernel,
        out_shape=jax.ShapeDtypeStruct((N, H, W, Cout_p), bf16),
        grid_spec=pltpu.PrefetchScalarGridSpec(
            num_scalar_prefetch=0,
            grid=(N, n_ht),
            in_specs=[
                pl.BlockSpec((1, Th, W, Cin_p), lambda n, t: (n, t, 0, 0)),
                pl.BlockSpec((1, 2, W, Cin_p),
                             lambda n, t, _nt=n_ht: (n * _nt + t, 0, 0, 0)),
                full_spec(params["w1"]), full_spec(params["s1"]), full_spec(params["b1"]),
                full_spec(params["w2"]), full_spec(params["s2"]), full_spec(params["b2"]),
                full_spec(params["w3"]), full_spec(params["s3"]), full_spec(params["b3"]),
            ],
            out_specs=pl.BlockSpec((1, Th, W, Cout_p), lambda n, t: (n, t, 0, 0)),
            scratch_shapes=[pltpu.VMEM((Th + 2, Wq, Wid_p), bf16)],
        ),
        compiler_params=pltpu.CompilerParams(
            dimension_semantics=("parallel", "parallel"),
            vmem_limit_bytes=vmem_limit,
        ),
    )(xp, x_halo,
      params["w1"], params["s1"], params["b1"],
      params["w2"], params["s2"], params["b2"],
      params["w3"], params["s3"], params["b3"])

    # Skip the output-slice HBM pass when channels are already lane-aligned.
    return out_p if Cout_p == Cout else out_p[..., :Cout]


# ----------------------------------------------------------------------------
# Reference + test
# ----------------------------------------------------------------------------
def fold_bn(gamma, beta, mean, var, eps=1e-5):
    scale = gamma / jnp.sqrt(var + eps)
    bias = beta - mean * scale
    return scale.reshape(1, -1), bias.reshape(1, -1)


def reference_forward(x, w1, s1, b1, w2, s2, b2, w3, s3, b3):
    """Pure-JAX reference mirroring the kernel math (bf16 matmuls, f32 acc)."""
    bf16, f32 = jnp.bfloat16, jnp.float32
    N, H, W, Cin = x.shape
    xb = x.astype(bf16)
    h1 = jnp.einsum('nhwc,cf->nhwf', xb, w1.astype(bf16), preferred_element_type=f32)
    h1 = jnp.maximum(h1 * s1.reshape(1, 1, 1, -1) + b1.reshape(1, 1, 1, -1), 0.0)
    h1p = jnp.pad(h1.astype(bf16), ((0, 0), (1, 1), (1, 1), (0, 0)))
    h2 = jnp.zeros((N, H, W, w2.shape[-1]), f32)
    for dy in range(3):
        for dx in range(3):
            h2 = h2 + jnp.einsum('nhwc,cf->nhwf',
                                 h1p[:, dy:dy + H, dx:dx + W, :],
                                 w2[dy, dx].astype(bf16),
                                 preferred_element_type=f32)
    h2 = jnp.maximum(h2 * s2.reshape(1, 1, 1, -1) + b2.reshape(1, 1, 1, -1), 0.0)
    h3 = jnp.einsum('nhwc,cf->nhwf', h2.astype(bf16), w3.astype(bf16),
                    preferred_element_type=f32)
    h3 = h3 * s3.reshape(1, 1, 1, -1) + b3.reshape(1, 1, 1, -1)
    return jnp.maximum(h3 + xb.astype(f32), 0.0)


if __name__ == "__main__":
    # Bottleneck(inplanes=16, planes=4), stride=1, downsample=None
    #   => width = 4, out channels = planes*4 = 16 = inplanes.
    N, H, W = 2, 8, 8
    inplanes, planes = 16, 4
    width = planes            # base_width=64, groups=1
    cout = planes * 4         # expansion = 4

    key = jax.random.PRNGKey(0)
    ks = jax.random.split(key, 16)

    # Input (PyTorch NCHW) moved to NHWC.
    x_nchw = jax.random.normal(ks[0], (N, inplanes, H, W), jnp.float32)
    x_nhwc = jnp.transpose(x_nchw, (0, 2, 3, 1))

    # Conv weights (PyTorch OIHW transposed to (Cin, Cout) / (3,3,Cin,Cout)).
    w1 = jax.random.normal(ks[1], (inplanes, width), jnp.float32) * 0.1
    w2 = jax.random.normal(ks[2], (3, 3, width, width), jnp.float32) * 0.1
    w3 = jax.random.normal(ks[3], (width, cout), jnp.float32) * 0.1

    # Eval-mode BatchNorm params folded into scale/bias.
    def bn_params(kg, kb, km, kv, c):
        gamma = 0.5 + jax.random.uniform(kg, (c,), jnp.float32)
        beta = 0.1 * jax.random.normal(kb, (c,), jnp.float32)
        mean = 0.1 * jax.random.normal(km, (c,), jnp.float32)
        var = 0.5 + jax.random.uniform(kv, (c,), jnp.float32)
        return fold_bn(gamma, beta, mean, var)

    s1, b1 = bn_params(ks[4], ks[5], ks[6], ks[7], width)
    s2, b2 = bn_params(ks[8], ks[9], ks[10], ks[11], width)
    s3, b3 = bn_params(ks[12], ks[13], ks[14], ks[15], cout)

    params = prepare_bottleneck_params(w1, s1, b1, w2, s2, b2, w3, s3, b3)
    ref = reference_forward(x_nhwc, w1, s1, b1, w2, s2, b2, w3, s3, b3)

    # Run the whole-plane path (default tile) and the H-tiled path (tile_h=4,
    # which exercises the halo handling with two tiles per image).
    for th in (None, 4):
        out = bottleneck_forward(x_nhwc, params, tile_h=th)
        out = jax.block_until_ready(out).astype(jnp.float32)
        assert out.shape == (N, H, W, cout)
        assert jnp.allclose(out, ref, atol=2e-2, rtol=2e-2), f"mismatch (tile_h={th})"

    print("KERNEL_OK")
</pallas_src>

<mosaic_0001>
module attributes {stable_mosaic.version = 11 : i64} {
  func.func @_bottleneck_kernel(%arg0: i32, %arg1: i32, %arg2: memref<1x8x8x128xbf16, #tpu.memory_space<vmem>>, %arg3: memref<1x2x8x128xbf16, #tpu.memory_space<vmem>>, %arg4: memref<128x128xbf16, #tpu.memory_space<vmem>>, %arg5: memref<1x128xf32, #tpu.memory_space<vmem>>, %arg6: memref<1x128xf32, #tpu.memory_space<vmem>>, %arg7: memref<3x384x128xbf16, #tpu.memory_space<vmem>>, %arg8: memref<1x128xf32, #tpu.memory_space<vmem>>, %arg9: memref<1x128xf32, #tpu.memory_space<vmem>>, %arg10: memref<128x128xbf16, #tpu.memory_space<vmem>>, %arg11: memref<1x128xf32, #tpu.memory_space<vmem>>, %arg12: memref<1x128xf32, #tpu.memory_space<vmem>>, %arg13: memref<1x8x8x128xbf16, #tpu.memory_space<vmem>>, %arg14: memref<10x24x128xbf16, #tpu.memory_space<vmem>>) attributes {dimension_semantics = [#tpu.dimension_semantics<parallel>, #tpu.dimension_semantics<parallel>], iteration_bounds = array<i64: 2, 1>, scalar_prefetch = 0 : i64, scratch_operands = 1 : i64, tpu.core_type = #tpu.core_type<tc>, window_params = [{transform_indices = @transform_0, window_bounds = array<i64: 1, 8, 8, 128>}, {transform_indices = @transform_1, window_bounds = array<i64: 1, 2, 8, 128>}, {pipeline_mode = #tpu.pipeline_mode<synchronous>, transform_indices = @transform_2, window_bounds = array<i64: 128, 128>}, {pipeline_mode = #tpu.pipeline_mode<synchronous>, transform_indices = @transform_3, window_bounds = array<i64: 1, 128>}, {pipeline_mode = #tpu.pipeline_mode<synchronous>, transform_indices = @transform_4, window_bounds = array<i64: 1, 128>}, {pipeline_mode = #tpu.pipeline_mode<synchronous>, transform_indices = @transform_5, window_bounds = array<i64: 3, 384, 128>}, {pipeline_mode = #tpu.pipeline_mode<synchronous>, transform_indices = @transform_6, window_bounds = array<i64: 1, 128>}, {pipeline_mode = #tpu.pipeline_mode<synchronous>, transform_indices = @transform_7, window_bounds = array<i64: 1, 128>}, {pipeline_mode = #tpu.pipeline_mode<synchronous>, transform_indices = @transform_8, window_bounds = array<i64: 128, 128>}, {pipeline_mode = #tpu.pipeline_mode<synchronous>, transform_indices = @transform_9, window_bounds = array<i64: 1, 128>}, {pipeline_mode = #tpu.pipeline_mode<synchronous>, transform_indices = @transform_10, window_bounds = array<i64: 1, 128>}, {transform_indices = @transform_11, window_bounds = array<i64: 1, 8, 8, 128>}]} {
    %cst = arith.constant 0.000000e+00 : bf16
    %0 = vector.broadcast %cst : bf16 to vector<10x8x128xbf16>
    %c0 = arith.constant 0 : index
    %c0_0 = arith.constant 0 : index
    %c0_1 = arith.constant 0 : index
    %1 = vector.load %arg14[%c0, %c0_0, %c0_1] : memref<10x24x128xbf16, #tpu.memory_space<vmem>>, vector<10x8x128xbf16>
    tpu.vector_store %arg14[%c0, %c0_0, %c0_1], %0 {strides = array<i32>} : memref<10x24x128xbf16, #tpu.memory_space<vmem>>, vector<10x8x128xbf16>,
    %cst_2 = arith.constant 0.000000e+00 : bf16
    %2 = vector.broadcast %cst_2 : bf16 to vector<10x8x128xbf16>
    %c0_3 = arith.constant 0 : index
    %c16 = arith.constant 16 : index
    %c0_4 = arith.constant 0 : index
    %3 = vector.load %arg14[%c0_3, %c16, %c0_4] : memref<10x24x128xbf16, #tpu.memory_space<vmem>>, vector<10x8x128xbf16>
    tpu.vector_store %arg14[%c0_3, %c16, %c0_4], %2 {strides = array<i32>} : memref<10x24x128xbf16, #tpu.memory_space<vmem>>, vector<10x8x128xbf16>,
    %c0_5 = arith.constant 0 : index
    %c0_6 = arith.constant 0 : index
    %4 = vector.load %arg5[%c0_5, %c0_6] : memref<1x128xf32, #tpu.memory_space<vmem>>, vector<1x128xf32>
    %c0_7 = arith.constant 0 : index
    %c0_8 = arith.constant 0 : index
    %5 = vector.load %arg6[%c0_7, %c0_8] : memref<1x128xf32, #tpu.memory_space<vmem>>, vector<1x128xf32>
    %cst_9 = arith.constant 0.000000e+00 : bf16
    %6 = vector.broadcast %cst_9 : bf16 to vector<1x8x128xbf16>
    %c0_10 = arith.constant 0 : index
    %c8 = arith.constant 8 : index
    %c0_11 = arith.constant 0 : index
    %7 = vector.load %arg14[%c0_10, %c8, %c0_11] : memref<10x24x128xbf16, #tpu.memory_space<vmem>>, vector<1x8x128xbf16>
    tpu.vector_store %arg14[%c0_10, %c8, %c0_11], %6 {strides = array<i32>} : memref<10x24x128xbf16, #tpu.memory_space<vmem>>, vector<1x8x128xbf16>,
    %c9 = arith.constant 9 : index
    %c8_12 = arith.constant 8 : index
    %c0_13 = arith.constant 0 : index
    %8 = vector.load %arg14[%c9, %c8_12, %c0_13] : memref<10x24x128xbf16, #tpu.memory_space<vmem>>, vector<1x8x128xbf16>
    tpu.vector_store %arg14[%c9, %c8_12, %c0_13], %6 {strides = array<i32>} : memref<10x24x128xbf16, #tpu.memory_space<vmem>>, vector<1x8x128xbf16>,
    %c0_14 = arith.constant 0 : index
    %c0_15 = arith.constant 0 : index
    %c0_16 = arith.constant 0 : index
    %c0_17 = arith.constant 0 : index
    %9 = vector.load %arg3[%c0_14, %c0_15, %c0_16, %c0_17] : memref<1x2x8x128xbf16, #tpu.memory_space<vmem>>, vector<1x2x8x128xbf16>
    %10 = vector.shape_cast %9 : vector<1x2x8x128xbf16> to vector<2x8x128xbf16>
    %11 = vector.shape_cast %10 : vector<2x8x128xbf16> to vector<16x128xbf16>
    %c0_18 = arith.constant 0 : index
    %c0_19 = arith.constant 0 : index
    %12 = vector.load %arg4[%c0_18, %c0_19] : memref<128x128xbf16, #tpu.memory_space<vmem>>, vector<128x128xbf16>
    %cst_20 = arith.constant dense<0.000000e+00> : vector<16x128xf32>
    %13 = tpu.matmul %11, %12, %cst_20 {dimension_numbers = #tpu.dot_dimension_numbers<[1], [0], [0], [1], [0, 0, 1, 1], [], []>} : vector<16x128xbf16>, vector<128x128xbf16>, vector<16x128xf32> -> vector<16x128xf32>
    %14 = vector.broadcast %4 : vector<1x128xf32> to vector<16x128xf32>
    %15 = arith.mulf %13, %14 : vector<16x128xf32>
    %16 = vector.broadcast %5 : vector<1x128xf32> to vector<16x128xf32>
    %17 = arith.addf %15, %16 : vector<16x128xf32>
    %cst_21 = arith.constant 0.000000e+00 : f32
    %18 = vector.broadcast %cst_21 : f32 to vector<16x128xf32>
    %19 = arith.maximumf %17, %18 : vector<16x128xf32>
    %20 = vector.shape_cast %19 : vector<16x128xf32> to vector<2x8x128xf32>
    %c0_i32 = arith.constant 0 : i32
    %21 = arith.cmpi sgt, %arg1, %c0_i32 : i32
    %22 = arith.extui %21 : i1 to i32
    %c0_i32_22 = arith.constant 0 : i32
    %23 = arith.cmpi ne, %22, %c0_i32_22 : i32
    scf.if %23 {
      %95 = vector.extract_strided_slice %20 {offsets = [0, 0, 0], sizes = [1, 8, 128], strides = [1, 1, 1]} : vector<2x8x128xf32> to vector<1x8x128xf32>
      %96 = arith.truncf %95 : vector<1x8x128xf32> to vector<1x8x128xbf16>
      %c0_76 = arith.constant 0 : index
      %c8_77 = arith.constant 8 : index
      %c0_78 = arith.constant 0 : index
      %97 = vector.load %arg14[%c0_76, %c8_77, %c0_78] : memref<10x24x128xbf16, #tpu.memory_space<vmem>>, vector<1x8x128xbf16>
      tpu.vector_store %arg14[%c0_76, %c8_77, %c0_78], %96 {strides = array<i32>} : memref<10x24x128xbf16, #tpu.memory_space<vmem>>, vector<1x8x128xbf16>,
    } else {
    }
    %c0_i32_23 = arith.constant 0 : i32
    %24 = arith.cmpi slt, %arg1, %c0_i32_23 : i32
    %25 = arith.extui %24 : i1 to i32
    %c0_i32_24 = arith.constant 0 : i32
    %26 = arith.cmpi ne, %25, %c0_i32_24 : i32
    scf.if %26 {
      %95 = vector.extract_strided_slice %20 {offsets = [1, 0, 0], sizes = [1, 8, 128], strides = [1, 1, 1]} : vector<2x8x128xf32> to vector<1x8x128xf32>
      %96 = arith.truncf %95 : vector<1x8x128xf32> to vector<1x8x128xbf16>
      %c9_76 = arith.constant 9 : index
      %c8_77 = arith.constant 8 : index
      %c0_78 = arith.constant 0 : index
      %97 = vector.load %arg14[%c9_76, %c8_77, %c0_78] : memref<10x24x128xbf16, #tpu.memory_space<vmem>>, vector<1x8x128xbf16>
      tpu.vector_store %arg14[%c9_76, %c8_77, %c0_78], %96 {strides = array<i32>} : memref<10x24x128xbf16, #tpu.memory_space<vmem>>, vector<1x8x128xbf16>,
    } else {
    }
    %c0_25 = arith.constant 0 : index
    %c0_26 = arith.constant 0 : index
    %c0_27 = arith.constant 0 : index
    %c0_28 = arith.constant 0 : index
    %27 = vector.load %arg2[%c0_25, %c0_26, %c0_27, %c0_28] : memref<1x8x8x128xbf16, #tpu.memory_space<vmem>>, vector<1x8x8x128xbf16>
    %28 = vector.shape_cast %27 : vector<1x8x8x128xbf16> to vector<64x128xbf16>
    %c0_29 = arith.constant 0 : index
    %c0_30 = arith.constant 0 : index
    %29 = vector.load %arg4[%c0_29, %c0_30] : memref<128x128xbf16, #tpu.memory_space<vmem>>, vector<128x128xbf16>
    %cst_31 = arith.constant dense<0.000000e+00> : vector<64x128xf32>
    %30 = tpu.matmul %28, %29, %cst_31 {dimension_numbers = #tpu.dot_dimension_numbers<[1], [0], [0], [1], [0, 0, 1, 1], [], []>} : vector<64x128xbf16>, vector<128x128xbf16>, vector<64x128xf32> -> vector<64x128xf32>
    %31 = vector.broadcast %4 : vector<1x128xf32> to vector<64x128xf32>
    %32 = arith.mulf %30, %31 : vector<64x128xf32>
    %33 = vector.broadcast %5 : vector<1x128xf32> to vector<64x128xf32>
    %34 = arith.addf %32, %33 : vector<64x128xf32>
    %cst_32 = arith.constant 0.000000e+00 : f32
    %35 = vector.broadcast %cst_32 : f32 to vector<64x128xf32>
    %36 = arith.maximumf %34, %35 : vector<64x128xf32>
    %37 = vector.shape_cast %36 : vector<64x128xf32> to vector<8x8x128xf32>
    %38 = arith.truncf %37 : vector<8x8x128xf32> to vector<8x8x128xbf16>
    %c1 = arith.constant 1 : index
    %c8_33 = arith.constant 8 : index
    %c0_34 = arith.constant 0 : index
    %39 = vector.load %arg14[%c1, %c8_33, %c0_34] : memref<10x24x128xbf16, #tpu.memory_space<vmem>>, vector<8x8x128xbf16>
    tpu.vector_store %arg14[%c1, %c8_33, %c0_34], %38 {strides = array<i32>} : memref<10x24x128xbf16, #tpu.memory_space<vmem>>, vector<8x8x128xbf16>,
    %c0_35 = arith.constant 0 : index
    %c0_36 = arith.constant 0 : index
    %c0_37 = arith.constant 0 : index
    %40 = vector.load %arg14[%c0_35, %c0_36, %c0_37] : memref<10x24x128xbf16, #tpu.memory_space<vmem>>, vector<8x24x128xbf16>
    %41 = vector.extract_strided_slice %40 {offsets = [0, 7, 0], sizes = [8, 8, 128], strides = [1, 1, 1]} : vector<8x24x128xbf16> to vector<8x8x128xbf16>
    %42 = vector.extract_strided_slice %40 {offsets = [0, 8, 0], sizes = [8, 8, 128], strides = [1, 1, 1]} : vector<8x24x128xbf16> to vector<8x8x128xbf16>
    %43 = vector.extract_strided_slice %40 {offsets = [0, 9, 0], sizes = [8, 8, 128], strides = [1, 1, 1]} : vector<8x24x128xbf16> to vector<8x8x128xbf16>
    %44 = tpu.concatenate %41, %42, %43 in 2 : vector<8x8x128xbf16>, vector<8x8x128xbf16>, vector<8x8x128xbf16> -> vector<8x8x384xbf16>
    %45 = vector.shape_cast %44 : vector<8x8x384xbf16> to vector<64x384xbf16>
    %c0_38 = arith.constant 0 : index
    %c0_39 = arith.constant 0 : index
    %c0_40 = arith.constant 0 : index
    %46 = vector.load %arg7[%c0_38, %c0_39, %c0_40] : memref<3x384x128xbf16, #tpu.memory_space<vmem>>, vector<1x384x128xbf16>
    %47 = vector.shape_cast %46 : vector<1x384x128xbf16> to vector<384x128xbf16>
    %cst_41 = arith.constant dense<0.000000e+00> : vector<64x128xf32>
    %48 = tpu.matmul %45, %47, %cst_41 {dimension_numbers = #tpu.dot_dimension_numbers<[1], [0], [0], [1], [0, 0, 1, 1], [], []>} : vector<64x384xbf16>, vector<384x128xbf16>, vector<64x128xf32> -> vector<64x128xf32>
    %c1_42 = arith.constant 1 : index
    %c0_43 = arith.constant 0 : index
    %c0_44 = arith.constant 0 : index
    %49 = vector.load %arg14[%c1_42, %c0_43, %c0_44] : memref<10x24x128xbf16, #tpu.memory_space<vmem>>, vector<8x24x128xbf16>
    %50 = vector.extract_strided_slice %49 {offsets = [0, 7, 0], sizes = [8, 8, 128], strides = [1, 1, 1]} : vector<8x24x128xbf16> to vector<8x8x128xbf16>
    %51 = vector.extract_strided_slice %49 {offsets = [0, 8, 0], sizes = [8, 8, 128], strides = [1, 1, 1]} : vector<8x24x128xbf16> to vector<8x8x128xbf16>
    %52 = vector.extract_strided_slice %49 {offsets = [0, 9, 0], sizes = [8, 8, 128], strides = [1, 1, 1]} : vector<8x24x128xbf16> to vector<8x8x128xbf16>
    %53 = tpu.concatenate %50, %51, %52 in 2 : vector<8x8x128xbf16>, vector<8x8x128xbf16>, vector<8x8x128xbf16> -> vector<8x8x384xbf16>
    %54 = vector.shape_cast %53 : vector<8x8x384xbf16> to vector<64x384xbf16>
    %c1_45 = arith.constant 1 : index
    %c0_46 = arith.constant 0 : index
    %c0_47 = arith.constant 0 : index
    %55 = vector.load %arg7[%c1_45, %c0_46, %c0_47] : memref<3x384x128xbf16, #tpu.memory_space<vmem>>, vector<1x384x128xbf16>
    %56 = vector.shape_cast %55 : vector<1x384x128xbf16> to vector<384x128xbf16>
    %cst_48 = arith.constant dense<0.000000e+00> : vector<64x128xf32>
    %57 = tpu.matmul %54, %56, %cst_48 {dimension_numbers = #tpu.dot_dimension_numbers<[1], [0], [0], [1], [0, 0, 1, 1], [], []>} : vector<64x384xbf16>, vector<384x128xbf16>, vector<64x128xf32> -> vector<64x128xf32>
    %58 = arith.addf %48, %57 : vector<64x128xf32>
    %c2 = arith.constant 2 : index
    %c0_49 = arith.constant 0 : index
    %c0_50 = arith.constant 0 : index
    %59 = vector.load %arg14[%c2, %c0_49, %c0_50] : memref<10x24x128xbf16, #tpu.memory_space<vmem>>, vector<8x24x128xbf16>
    %60 = vector.extract_strided_slice %59 {offsets = [0, 7, 0], sizes = [8, 8, 128], strides = [1, 1, 1]} : vector<8x24x128xbf16> to vector<8x8x128xbf16>
    %61 = vector.extract_strided_slice %59 {offsets = [0, 8, 0], sizes = [8, 8, 128], strides = [1, 1, 1]} : vector<8x24x128xbf16> to vector<8x8x128xbf16>
    %62 = vector.extract_strided_slice %59 {offsets = [0, 9, 0], sizes = [8, 8, 128], strides = [1, 1, 1]} : vector<8x24x128xbf16> to vector<8x8x128xbf16>
    %63 = tpu.concatenate %60, %61, %62 in 2 : vector<8x8x128xbf16>, vector<8x8x128xbf16>, vector<8x8x128xbf16> -> vector<8x8x384xbf16>
    %64 = vector.shape_cast %63 : vector<8x8x384xbf16> to vector<64x384xbf16>
    %c2_51 = arith.constant 2 : index
    %c0_52 = arith.constant 0 : index
    %c0_53 = arith.constant 0 : index
    %65 = vector.load %arg7[%c2_51, %c0_52, %c0_53] : memref<3x384x128xbf16, #tpu.memory_space<vmem>>, vector<1x384x128xbf16>
    %66 = vector.shape_cast %65 : vector<1x384x128xbf16> to vector<384x128xbf16>
    %cst_54 = arith.constant dense<0.000000e+00> : vector<64x128xf32>
    %67 = tpu.matmul %64, %66, %cst_54 {dimension_numbers = #tpu.dot_dimension_numbers<[1], [0], [0], [1], [0, 0, 1, 1], [], []>} : vector<64x384xbf16>, vector<384x128xbf16>, vector<64x128xf32> -> vector<64x128xf32>
    %68 = arith.addf %58, %67 : vector<64x128xf32>
    %c0_55 = arith.constant 0 : index
    %c0_56 = arith.constant 0 : index
    %69 = vector.load %arg8[%c0_55, %c0_56] : memref<1x128xf32, #tpu.memory_space<vmem>>, vector<1x128xf32>
    %70 = vector.broadcast %69 : vector<1x128xf32> to vector<64x128xf32>
    %71 = arith.mulf %68, %70 : vector<64x128xf32>
    %c0_57 = arith.constant 0 : index
    %c0_58 = arith.constant 0 : index
    %72 = vector.load %arg9[%c0_57, %c0_58] : memref<1x128xf32, #tpu.memory_space<vmem>>, vector<1x128xf32>
    %73 = vector.broadcast %72 : vector<1x128xf32> to vector<64x128xf32>
    %74 = arith.addf %71, %73 : vector<64x128xf32>
    %cst_59 = arith.constant 0.000000e+00 : f32
    %75 = vector.broadcast %cst_59 : f32 to vector<64x128xf32>
    %76 = arith.maximumf %74, %75 : vector<64x128xf32>
    %77 = arith.truncf %76 : vector<64x128xf32> to vector<64x128xbf16>
    %c0_60 = arith.constant 0 : index
    %c0_61 = arith.constant 0 : index
    %78 = vector.load %arg10[%c0_60, %c0_61] : memref<128x128xbf16, #tpu.memory_space<vmem>>, vector<128x128xbf16>
    %cst_62 = arith.constant dense<0.000000e+00> : vector<64x128xf32>
    %79 = tpu.matmul %77, %78, %cst_62 {dimension_numbers = #tpu.dot_dimension_numbers<[1], [0], [0], [1], [0, 0, 1, 1], [], []>} : vector<64x128xbf16>, vector<128x128xbf16>, vector<64x128xf32> -> vector<64x128xf32>
    %c0_63 = arith.constant 0 : index
    %c0_64 = arith.constant 0 : index
    %80 = vector.load %arg11[%c0_63, %c0_64] : memref<1x128xf32, #tpu.memory_space<vmem>>, vector<1x128xf32>
    %81 = vector.broadcast %80 : vector<1x128xf32> to vector<64x128xf32>
    %82 = arith.mulf %79, %81 : vector<64x128xf32>
    %c0_65 = arith.constant 0 : index
    %c0_66 = arith.constant 0 : index
    %83 = vector.load %arg12[%c0_65, %c0_66] : memref<1x128xf32, #tpu.memory_space<vmem>>, vector<1x128xf32>
    %84 = vector.broadcast %83 : vector<1x128xf32> to vector<64x128xf32>
    %85 = arith.addf %82, %84 : vector<64x128xf32>
    %c0_67 = arith.constant 0 : index
    %c0_68 = arith.constant 0 : index
    %c0_69 = arith.constant 0 : index
    %c0_70 = arith.constant 0 : index
    %86 = vector.load %arg2[%c0_67, %c0_68, %c0_69, %c0_70] : memref<1x8x8x128xbf16, #tpu.memory_space<vmem>>, vector<1x8x8x128xbf16>
    %87 = vector.shape_cast %86 : vector<1x8x8x128xbf16> to vector<64x128xbf16>
    %88 = arith.extf %87 : vector<64x128xbf16> to vector<64x128xf32>
    %89 = arith.addf %85, %88 : vector<64x128xf32>
    %cst_71 = arith.constant 0.000000e+00 : f32
    %90 = vector.broadcast %cst_71 : f32 to vector<64x128xf32>
    %91 = arith.maximumf %89, %90 : vector<64x128xf32>
    %92 = arith.truncf %91 : vector<64x128xf32> to vector<64x128xbf16>
    %93 = vector.shape_cast %92 : vector<64x128xbf16> to vector<1x8x8x128xbf16>
    %c0_72 = arith.constant 0 : index
    %c0_73 = arith.constant 0 : index
    %c0_74 = arith.constant 0 : index
    %c0_75 = arith.constant 0 : index
    %94 = vector.load %arg13[%c0_72, %c0_73, %c0_74, %c0_75] : memref<1x8x8x128xbf16, #tpu.memory_space<vmem>>, vector<1x8x8x128xbf16>
    tpu.vector_store %arg13[%c0_72, %c0_73, %c0_74, %c0_75], %93 {strides = array<i32>} : memref<1x8x8x128xbf16, #tpu.memory_space<vmem>>, vector<1x8x8x128xbf16>,
    return
  }
  func.func @transform_0(%arg0: i32, %arg1: i32) -> (i32, i32, i32, i32) {
    %c0_i32 = arith.constant 0 : i32
    %c0_i32_0 = arith.constant 0 : i32
    %c0_i32_1 = arith.constant 0 : i32
    return %arg0, %arg1, %c0_i32, %c0_i32_0 : i32, i32, i32, i32
  }
  func.func @transform_1(%arg0: i32, %arg1: i32) -> (i32, i32, i32, i32) {
    %c1_i32 = arith.constant 1 : i32
    %0 = arith.muli %arg0, %c1_i32 : i32
    %1 = arith.addi %0, %arg1 : i32
    %c0_i32 = arith.constant 0 : i32
    %c0_i32_0 = arith.constant 0 : i32
    %c0_i32_1 = arith.constant 0 : i32
    %c0_i32_2 = arith.constant 0 : i32
    return %1, %c0_i32, %c0_i32_0, %c0_i32_1 : i32, i32, i32, i32
  }
  func.func @transform_2(%arg0: i32, %arg1: i32) -> (i32, i32) {
    %c0_i32 = arith.constant 0 : i32
    %c0_i32_0 = arith.constant 0 : i32
    %c0_i32_1 = arith.constant 0 : i32
    return %c0_i32, %c0_i32_0 : i32, i32
  }
  func.func @transform_3(%arg0: i32, %arg1: i32) -> (i32, i32) {
    %c0_i32 = arith.constant 0 : i32
    %c0_i32_0 = arith.constant 0 : i32
    %c0_i32_1 = arith.constant 0 : i32
    return %c0_i32, %c0_i32_0 : i32, i32
  }
  func.func @transform_4(%arg0: i32, %arg1: i32) -> (i32, i32) {
    %c0_i32 = arith.constant 0 : i32
    %c0_i32_0 = arith.constant 0 : i32
    %c0_i32_1 = arith.constant 0 : i32
    return %c0_i32, %c0_i32_0 : i32, i32
  }
  func.func @transform_5(%arg0: i32, %arg1: i32) -> (i32, i32, i32) {
    %c0_i32 = arith.constant 0 : i32
    %c0_i32_0 = arith.constant 0 : i32
    %c0_i32_1 = arith.constant 0 : i32
    %c0_i32_2 = arith.constant 0 : i32
    return %c0_i32, %c0_i32_0, %c0_i32_1 : i32, i32, i32
  }
  func.func @transform_6(%arg0: i32, %arg1: i32) -> (i32, i32) {
    %c0_i32 = arith.constant 0 : i32
    %c0_i32_0 = arith.constant 0 : i32
    %c0_i32_1 = arith.constant 0 : i32
    return %c0_i32, %c0_i32_0 : i32, i32
  }
  func.func @transform_7(%arg0: i32, %arg1: i32) -> (i32, i32) {
    %c0_i32 = arith.constant 0 : i32
    %c0_i32_0 = arith.constant 0 : i32
    %c0_i32_1 = arith.constant 0 : i32
    return %c0_i32, %c0_i32_0 : i32, i32
  }
  func.func @transform_8(%arg0: i32, %arg1: i32) -> (i32, i32) {
    %c0_i32 = arith.constant 0 : i32
    %c0_i32_0 = arith.constant 0 : i32
    %c0_i32_1 = arith.constant 0 : i32
    return %c0_i32, %c0_i32_0 : i32, i32
  }
  func.func @transform_9(%arg0: i32, %arg1: i32) -> (i32, i32) {
    %c0_i32 = arith.constant 0 : i32
    %c0_i32_0 = arith.constant 0 : i32
    %c0_i32_1 = arith.constant 0 : i32
    return %c0_i32, %c0_i32_0 : i32, i32
  }
  func.func @transform_10(%arg0: i32, %arg1: i32) -> (i32, i32) {
    %c0_i32 = arith.constant 0 : i32
    %c0_i32_0 = arith.constant 0 : i32
    %c0_i32_1 = arith.constant 0 : i32
    return %c0_i32, %c0_i32_0 : i32, i32
  }
  func.func @transform_11(%arg0: i32, %arg1: i32) -> (i32, i32, i32, i32) {
    %c0_i32 = arith.constant 0 : i32
    %c0_i32_0 = arith.constant 0 : i32
    %c0_i32_1 = arith.constant 0 : i32
    return %arg0, %arg1, %c0_i32, %c0_i32_0 : i32, i32, i32, i32
  }
}

</mosaic_0001>

<bundles_post_ra>
// kernel: tpu_custom_call.1
= control target key start
LH: loop header
LB: loop body
LE: loop exit
PB: predicated region body
PF: predicated region fallthrough
CT: control target
= control target key end

     0   :  { %s6359_s0 = inlined_call_operand.hbm [shape: bf16[2,8,8,128], index: 0, kind: input, shape index: {}]   ;;  %s6360_s1 = inlined_call_operand.hbm [shape: bf16[2,2,8,128], index: 1, kind: input, shape index: {}]   ;;  %s6361_s2 = inlined_call_operand.hbm [shape: bf16[128,128], index: 2, kind: input, shape index: {}]   ;;  %s6362_s3 = inlined_call_operand.hbm [shape: f32[1,128], index: 3, kind: input, shape index: {}]   ;;  %s6363_s4 = inlined_call_operand.hbm [shape: f32[1,128], index: 4, kind: input, shape index: {}]   ;;  %s6364_s5 = inlined_call_operand.hbm [shape: bf16[3,384,128], index: 5, kind: input, shape index: {}]   ;;  %s6365_s6 = inlined_call_operand.hbm [shape: f32[1,128], index: 6, kind: input, shape index: {}]   ;;  %s6366_s7 = inlined_call_operand.hbm [shape: f32[1,128], index: 7, kind: input, shape index: {}]   ;;  %s6367_s8 = inlined_call_operand.hbm [shape: bf16[128,128], index: 8, kind: input, shape index: {}]   ;;  %s6368_s9 = inlined_call_operand.hbm [shape: f32[1,128], index: 9, kind: input, shape index: {}]   ;;  %s6369_s10 = inlined_call_operand.hbm [shape: f32[1,128], index: 10, kind: input, shape index: {}]   ;;  %s6370_s11 = inlined_call_operand.hbm [shape: bf16[2,8,8,128], index: 11, kind: output, shape index: {}]  }
   0x1   :  { %6382 = sst [smem:[#allocation32_spill]] %s6359_s0 }
   0x2   :  { %6383 = sst [smem:[#allocation33_spill]] %s6360_s1 }
   0x3   :  { %6384 = sst [smem:[#allocation34_spill]] %s6361_s2 }
   0x4   :  { %6385 = sst [smem:[#allocation35_spill]] %s6362_s3 }
   0x5   :  { %6386 = sst [smem:[#allocation36_spill]] %s6363_s4 }
   0x6   :  { %6387 = sst [smem:[#allocation37_spill]] %s6364_s5 }
   0x7   :  { %6388 = sst [smem:[#allocation38_spill]] %s6365_s6 }
   0x8   :  { %6389 = sst [smem:[#allocation39_spill]] %s6366_s7 }
   0x9   :  { %6390 = sst [smem:[#allocation40_spill]] %s6367_s8 }
   0xa   :  { %6391 = sst [smem:[#allocation41_spill]] %s6368_s9 }
   0xb   :  { %6392 = sst [smem:[#allocation42_spill]] %s6370_s11 }
   0xc   :  { %16 = vsyncpa [#allocation4], 0 }
   0xd   :  { %18 = vsyncpa [#allocation4 + $0x1], 0 }
   0xe   :  { %19 = vsyncpa [#allocation7], 0 }
   0xf   :  { %21 = vsyncpa [#allocation7 + $0x1], 0 }
  0x10   :  { %22 = vsyncpa [#allocation10], 0 }
  0x11   :  { %23 = vsyncpa [#allocation13], 0 }
  0x12   :  { %24 = vsyncpa [#allocation16], 0 }
  0x13   :  { %25 = vsyncpa [#allocation19], 0 }
  0x14   :  { %26 = vsyncpa [#allocation5], 0 }
  0x15   :  { %28 = vsyncpa [#allocation5 + $0x1], 0  ;;  %s5517_s17 = smov 0   ;;  %s5519_s18 = smov 0  }
  0x16   :  { %s5521_s19 = smov 0   ;;  %s5523_s20 = smov 0  }
  0x17   :  { %s5525_s21 = smov 0   ;;  %s5527_s22 = smov 0  }
  0x18 LB: > { %6393 = sst [smem:[#allocation30_spill]] %s5428_s20  ;;  %s5548_s23 = sadd.s32 4294967295, %s5436_s22   ;;  %s5436_s22 = sphi %s5527_s22, %s34_s22   ;;  %s5432_s21 = sphi %s5525_s21, %s6440_s21   ;;  %s5428_s20 = sphi %s5523_s20, %s6439_s20   ;;  %s5424_s19 = sphi %s5521_s19, %s6438_s19   ;;  %s5420_s18 = sphi %s5519_s18, %s6437_s18   ;;  %s5416_s17 = sphi %s5517_s17, %s6436_s17  }
  0x19   : > { %p3865_p0 = scmp.ge.s32.totalorder %s5436_s22, 1  ;;  %p6375_p1 = scmp.eq.s32.totalorder %s5548_s23, 0 }
  0x1a   : > { %p324_p2 = scmp.lt.s32.totalorder %s5436_s22, 3  ;;  %s5438_s25 = smov [#allocation8]  }
  0x1b   : > { %s336_s26 = sshll.u32 %s5438_s25, 4  ;;  %s5439_s28 = smov [#allocation9]   ;;  %s5557_s26 = int_to_ptr.vmem [resolvable:$true] %s336_s26 }
  0x1c   : > { %p5553_p3 = pnand %p3865_p0, %p324_p2  ;;  %s350_s29 = sshll.u32 %s5439_s28, 4  ;;  %s5568_s29 = int_to_ptr.vmem [resolvable:$true] %s350_s29 }
  0x1d   : > { %s5440_s30 = smov [#allocation12]   ;;  %s6397_s2 = sld [smem:[#allocation34_spill]] }
  0x1e   : > { %s6394_s24 = scalar_select %p5553_p3, 1, 0 }
  0x1f   : > { %p4747_p4 = pneg %p5553_p3  ;;  %s5570_s12 = sshll.u32 %s5440_s30, 4  ;;  %s372_s12 = int_to_ptr.vmem [resolvable:$true] %s5570_s12 }
  0x20   : > { %6395 = sst [smem:[#allocation31_spill]] %s6394_s24 }
  0x21   : > { %p5564_p6 = pnand %p4747_p4, %p6375_p1 }
  0x23   : > { %s5018_s15 = scalar_lea.hbm %s6397_s2, 1024  ;;  %p5580_p8 = pneg %p5564_p6 }
  0x24   : > { %p5019_p7 = scmp.ne.s32.totalorder %s6397_s2, %s5018_s15  ;;  %p5025_p11 = scmp.lt.u32.totalorder %s5018_s15, %s6397_s2 }
  0x26   : > { %p5021_p9 = pnand %p5580_p8, %p5019_p7 }
  0x28   : > { %p5022_p10 = pneg %p5021_p9 }
  0x2a   : > { %p5027_p12 = pnand %p5025_p11, %p5022_p10 }
  0x2c   : > { %5030 = shalt.err (!%p5027_p12)
}
  0x2d   : > { %s5031_s13 = scalar_lea.vmem %s5557_s26, 1024  ;;  %p5039_p4 = scmp.lt.s32.totalorder %s5557_s26, %s5557_s26 }
  0x2e   : > { %p5032_p13 = scmp.ne.s32.totalorder %s5557_s26, %s5031_s13  ;;  %p5040_p5 = scmp.lt.s32.totalorder %s5031_s13, %s5031_s13 }
  0x30   : > { %p5034_p0 = pnand %p5032_p13, %p5580_p8  ;;  %p5041_p7 = por %p5040_p5, %p5039_p4 }
  0x32   : > { %p5035_p2 = pneg %p5034_p0 }
  0x34   : > { %p5042_p9 = pnand %p5041_p7, %p5035_p2 }
  0x36   : > { %5045 = shalt.err (!%p5042_p9)
}
  0x37   : > { %s6377_s14 = smov 64   ;;  %s6379_s15 = smov 4  }
  0x38   : > { %4750 = dma.hbm_to_vmem [thread:$0]  (!%p5564_p6), %s6397_s2, 1024, %s5557_s26, [#allocation7], %s6377_s14, %s6377_s14, %s6379_s15  }
  0x39   : > { %s6399_s3 = sld [smem:[#allocation35_spill]] }
  0x3f   : > { %s5046_s13 = scalar_lea.hbm %s6399_s3, 16 }
  0x40   : > { %p5047_p5 = scmp.ne.s32.totalorder %s6399_s3, %s5046_s13  ;;  %p5053_p12 = scmp.lt.u32.totalorder %s5046_s13, %s6399_s3 }
  0x42   : > { %p5049_p10 = pnand %p5047_p5, %p5580_p8 }
  0x44   : > { %p5050_p11 = pneg %p5049_p10 }
  0x46   : > { %p5055_p13 = pnand %p5053_p12, %p5050_p11 }
  0x48   : > { %5058 = shalt.err (!%p5055_p13)
}
  0x49   : > { %s5059_s26 = scalar_lea.vmem %s5568_s29, 16  ;;  %s5066_s20 = scalar_lea.vmem %s5568_s29, 32 }
  0x4a   : > { %p5060_p0 = scmp.ne.s32.totalorder %s5568_s29, %s5059_s26  ;;  %p5067_p7 = scmp.lt.s32.totalorder %s5568_s29, %s5568_s29 }
  0x4b   : > { %p5068_p9 = scmp.lt.s32.totalorder %s5066_s20, %s5059_s26 }
  0x4c   : > { %p5062_p2 = pnand %p5060_p0, %p5580_p8 }
  0x4d   : > { %p5069_p5 = por %p5068_p9, %p5067_p7 }
  0x4e   : > { %p5063_p4 = pneg %p5062_p2 }
  0x50   : > { %p5070_p10 = pnand %p5069_p5, %p5063_p4 }
  0x52   : > { %5073 = shalt.err (!%p5070_p10)
}
  0x53   : > { %4753 = dma.hbm_to_vmem [thread:$0]  (!%p5564_p6), %s6399_s3, 16, %s5568_s29, [#allocation10]  }
  0x54   : > { %s6400_s5 = sld [smem:[#allocation37_spill]] }
  0x5a   : > { %s5074_s25 = scalar_lea.hbm %s6400_s5, 9216 }
  0x5b   : > { %p5075_p11 = scmp.ne.s32.totalorder %s6400_s5, %s5074_s25  ;;  %p5081_p0 = scmp.lt.u32.totalorder %s5074_s25, %s6400_s5 }
  0x5d   : > { %p5077_p12 = pnand %p5075_p11, %p5580_p8 }
  0x5f   : > { %p5078_p13 = pneg %p5077_p12 }
  0x61   : > { %p5083_p2 = pnand %p5081_p0, %p5078_p13 }
  0x63   : > { %5086 = shalt.err (!%p5083_p2)
}
  0x64   : > { %s5087_s20 = scalar_lea.vmem %s372_s12, 9216  ;;  %p5095_p5 = scmp.lt.s32.totalorder %s372_s12, %s372_s12 }
  0x65   : > { %p5088_p4 = scmp.ne.s32.totalorder %s372_s12, %s5087_s20  ;;  %p5096_p10 = scmp.lt.s32.totalorder %s5087_s20, %s5087_s20 }
  0x67   : > { %p5090_p7 = pnand %p5088_p4, %p5580_p8  ;;  %p5097_p1 = por %p5096_p10, %p5095_p5 }
  0x69   : > { %p5091_p9 = pneg %p5090_p7 }
  0x6b   : > { %p5098_p3 = pnand %p5097_p1, %p5091_p9 }
  0x6d   : > { %5101 = shalt.err (!%p5098_p3)
}
  0x6e   : > { %4759 = dma.hbm_to_vmem [thread:$0]  (!%p5564_p6), %s6400_s5, 9216, %s372_s12, [#allocation13], %s6377_s14, %s6377_s14, %s6379_s15  }
  0x6f   : > { %s5443_s1 = smov [#allocation15]   ;;  %s5444_s16 = smov [#allocation18]  }
  0x70   : > { %s396_s24 = sshll.u32 %s5443_s1, 4  ;;  %s420_s25 = sshll.u32 %s5444_s16, 4  ;;  %s397_s24 = int_to_ptr.vmem [resolvable:$true] %s396_s24  ;;  %s421_s25 = int_to_ptr.vmem [resolvable:$true] %s420_s25 }
  0x71   : > { %s6401_s7 = sld [smem:[#allocation39_spill]] }
  0x77   : > { %s5102_s13 = scalar_lea.hbm %s6401_s7, 16 }
  0x78   : > { %p5103_p1 = scmp.ne.s32.totalorder %s6401_s7, %s5102_s13  ;;  %p5109_p12 = scmp.lt.u32.totalorder %s5102_s13, %s6401_s7 }
  0x7a   : > { %p5105_p3 = pnand %p5103_p1, %p5580_p8 }
  0x7c   : > { %p5106_p11 = pneg %p5105_p3 }
  0x7e   : > { %p5111_p13 = pnand %p5109_p12, %p5106_p11 }
  0x80   : > { %5114 = shalt.err (!%p5111_p13)
}
  0x81   : > { %s5115_s12 = scalar_lea.vmem %s397_s24, 16  ;;  %s5122_s0 = scalar_lea.vmem %s397_s24, 32 }
  0x82   : > { %p5116_p0 = scmp.ne.s32.totalorder %s397_s24, %s5115_s12  ;;  %p5123_p7 = scmp.lt.s32.totalorder %s397_s24, %s397_s24 }
  0x83   : > { %p5124_p9 = scmp.lt.s32.totalorder %s5122_s0, %s5115_s12 }
  0x84   : > { %p5118_p2 = pnand %p5116_p0, %p5580_p8 }
  0x85   : > { %p5125_p5 = por %p5124_p9, %p5123_p7 }
  0x86   : > { %p5119_p4 = pneg %p5118_p2 }
  0x88   : > { %p5126_p10 = pnand %p5125_p5, %p5119_p4 }
  0x8a   : > { %5129 = shalt.err (!%p5126_p10)
}
  0x8b   : > { %4765 = dma.hbm_to_vmem [thread:$0]  (!%p5564_p6), %s6401_s7, 16, %s397_s24, [#allocation16]  }
  0x8c   : > { %s6402_s9 = sld [smem:[#allocation41_spill]] }
  0x92   : > { %s5130_s30 = scalar_lea.hbm %s6402_s9, 16 }
  0x93   : > { %p5131_p1 = scmp.ne.s32.totalorder %s6402_s9, %s5130_s30  ;;  %p5137_p12 = scmp.lt.u32.totalorder %s5130_s30, %s6402_s9 }
  0x95   : > { %p5133_p3 = pnand %p5131_p1, %p5580_p8 }
  0x97   : > { %p5134_p11 = pneg %p5133_p3 }
  0x99   : > { %p5139_p13 = pnand %p5137_p12, %p5134_p11 }
  0x9b   : > { %5142 = shalt.err (!%p5139_p13)
}
  0x9c   : > { %s5143_s12 = scalar_lea.vmem %s421_s25, 16  ;;  %s5150_s24 = scalar_lea.vmem %s421_s25, 32 }
  0x9d   : > { %p5144_p0 = scmp.ne.s32.totalorder %s421_s25, %s5143_s12  ;;  %p5151_p7 = scmp.lt.s32.totalorder %s421_s25, %s421_s25 }
  0x9e   : > { %p5152_p9 = scmp.lt.s32.totalorder %s5150_s24, %s5143_s12 }
  0x9f   : > { %p5146_p2 = pnand %p5144_p0, %p5580_p8 }
  0xa0   : > { %p5153_p5 = por %p5152_p9, %p5151_p7 }
  0xa1   : > { %p5147_p4 = pneg %p5146_p2 }
  0xa3   : > { %p5154_p10 = pnand %p5153_p5, %p5147_p4 }
  0xa5   : > { %5157 = shalt.err (!%p5154_p10)
}
  0xa6   : > { %4771 = dma.hbm_to_vmem [thread:$0]  (!%p5564_p6), %s6402_s9, 16, %s421_s25, [#allocation19]  }
  0xa7   : > { %s5445_s16 = smov [#allocation11]   ;;  %s5446_s28 = smov [#allocation14]  }
  0xa8   : > { %s361_s2 = sshll.u32 %s5445_s16, 4  ;;  %s385_s30 = sshll.u32 %s5446_s28, 4  ;;  %s362_s2 = int_to_ptr.vmem [resolvable:$true] %s361_s2  ;;  %s386_s30 = int_to_ptr.vmem [resolvable:$true] %s385_s30 }
  0xa9   : > { %s6403_s4 = sld [smem:[#allocation36_spill]] }
  0xaf   : > { %s5158_s20 = scalar_lea.hbm %s6403_s4, 16 }
  0xb0   : > { %p5159_p1 = scmp.ne.s32.totalorder %s6403_s4, %s5158_s20  ;;  %p5165_p12 = scmp.lt.u32.totalorder %s5158_s20, %s6403_s4 }
  0xb2   : > { %p5161_p3 = pnand %p5159_p1, %p5580_p8 }
  0xb4   : > { %p5162_p11 = pneg %p5161_p3 }
  0xb6   : > { %p5167_p13 = pnand %p5165_p12, %p5162_p11 }
  0xb8   : > { %5170 = shalt.err (!%p5167_p13)
}
  0xb9   : > { %s5171_s25 = scalar_lea.vmem %s362_s2, 16  ;;  %s5178_s1 = scalar_lea.vmem %s362_s2, 32 }
  0xba   : > { %p5172_p0 = scmp.ne.s32.totalorder %s362_s2, %s5171_s25  ;;  %p5179_p7 = scmp.lt.s32.totalorder %s362_s2, %s362_s2 }
  0xbb   : > { %p5180_p9 = scmp.lt.s32.totalorder %s5178_s1, %s5171_s25 }
  0xbc   : > { %p5174_p2 = pnand %p5172_p0, %p5580_p8 }
  0xbd   : > { %p5181_p5 = por %p5180_p9, %p5179_p7 }
  0xbe   : > { %p5175_p4 = pneg %p5174_p2 }
  0xc0   : > { %p5182_p10 = pnand %p5181_p5, %p5175_p4 }
  0xc2   : > { %5185 = shalt.err (!%p5182_p10)
}
  0xc3   : > { %4756 = dma.hbm_to_vmem [thread:$0]  (!%p5564_p6), %s6403_s4, 16, %s362_s2, [#allocation10]  }
  0xc4   : > { %s6404_s6 = sld [smem:[#allocation38_spill]] }
  0xca   : > { %s5186_s20 = scalar_lea.hbm %s6404_s6, 16 }
  0xcb   : > { %p5187_p1 = scmp.ne.s32.totalorder %s6404_s6, %s5186_s20  ;;  %p5193_p12 = scmp.lt.u32.totalorder %s5186_s20, %s6404_s6 }
  0xcd   : > { %p5189_p3 = pnand %p5187_p1, %p5580_p8 }
  0xcf   : > { %p5190_p11 = pneg %p5189_p3 }
  0xd1   : > { %p5195_p13 = pnand %p5193_p12, %p5190_p11 }
  0xd3   : > { %5198 = shalt.err (!%p5195_p13)
}
  0xd4   : > { %s5199_s25 = scalar_lea.vmem %s386_s30, 16  ;;  %s5206_s2 = scalar_lea.vmem %s386_s30, 32 }
  0xd5   : > { %p5200_p0 = scmp.ne.s32.totalorder %s386_s30, %s5199_s25  ;;  %p5207_p7 = scmp.lt.s32.totalorder %s386_s30, %s386_s30 }
  0xd6   : > { %p5208_p9 = scmp.lt.s32.totalorder %s5206_s2, %s5199_s25 }
  0xd7   : > { %p5202_p2 = pnand %p5200_p0, %p5580_p8 }
  0xd8   : > { %p5209_p5 = por %p5208_p9, %p5207_p7 }
  0xd9   : > { %p5203_p4 = pneg %p5202_p2 }
  0xdb   : > { %p5210_p10 = pnand %p5209_p5, %p5203_p4 }
  0xdd   : > { %5213 = shalt.err (!%p5210_p10)
}
  0xde   : > { %4762 = dma.hbm_to_vmem [thread:$0]  (!%p5564_p6), %s6404_s6, 16, %s386_s30, [#allocation13]  }
  0xdf   : > { %s5447_s28 = smov [#allocation17]   ;;  %s5448_s26 = smov [#allocation20]  }
  0xe0   : > { %s406_s13 = sshll.u32 %s5447_s28, 4  ;;  %s431_s20 = sshll.u32 %s5448_s26, 4  ;;  %s407_s13 = int_to_ptr.vmem [resolvable:$true] %s406_s13  ;;  %s432_s20 = int_to_ptr.vmem [resolvable:$true] %s431_s20 }
  0xe1   : > { %s6405_s8 = sld [smem:[#allocation40_spill]] }
  0xe7   : > { %s5214_s24 = scalar_lea.hbm %s6405_s8, 1024 }
  0xe8   : > { %p5215_p1 = scmp.ne.s32.totalorder %s6405_s8, %s5214_s24  ;;  %p5221_p12 = scmp.lt.u32.totalorder %s5214_s24, %s6405_s8 }
  0xea   : > { %p5217_p3 = pnand %p5215_p1, %p5580_p8 }
  0xec   : > { %p5218_p11 = pneg %p5217_p3 }
  0xee   : > { %p5223_p13 = pnand %p5221_p12, %p5218_p11 }
  0xf0   : > { %5226 = shalt.err (!%p5223_p13)
}
  0xf1   : > { %s5227_s30 = scalar_lea.vmem %s407_s13, 1024  ;;  %p5235_p7 = scmp.lt.s32.totalorder %s407_s13, %s407_s13 }
  0xf2   : > { %p5228_p0 = scmp.ne.s32.totalorder %s407_s13, %s5227_s30  ;;  %p5236_p9 = scmp.lt.s32.totalorder %s5227_s30, %s5227_s30 }
  0xf4   : > { %p5230_p2 = pnand %p5228_p0, %p5580_p8  ;;  %p5237_p5 = por %p5236_p9, %p5235_p7 }
  0xf6   : > { %p5231_p4 = pneg %p5230_p2 }
  0xf8   : > { %p5238_p10 = pnand %p5237_p5, %p5231_p4 }
  0xfa   : > { %5241 = shalt.err (!%p5238_p10)
}
  0xfb   : > { %4768 = dma.hbm_to_vmem [thread:$0]  (!%p5564_p6), %s6405_s8, 1024, %s407_s13, [#allocation16], %s6377_s14, %s6377_s14, %s6379_s15  }
  0xfc   : > { %s5242_s12 = scalar_lea.hbm %s6369_s10, 16 }
  0xfd   : > { %p5243_p1 = scmp.ne.s32.totalorder %s6369_s10, %s5242_s12  ;;  %p5249_p12 = scmp.lt.u32.totalorder %s5242_s12, %s6369_s10 }
  0xff   : > { %p5245_p3 = pnand %p5243_p1, %p5580_p8 }
 0x101   : > { %p5246_p11 = pneg %p5245_p3 }
 0x103   : > { %p5251_p13 = pnand %p5249_p12, %p5246_p11 }
 0x105   : > { %5254 = shalt.err (!%p5251_p13)
}
 0x106   : > { %s5255_s1 = scalar_lea.vmem %s432_s20, 16  ;;  %s5262_s13 = scalar_lea.vmem %s432_s20, 32 }
 0x107   : > { %p5256_p0 = scmp.ne.s32.totalorder %s432_s20, %s5255_s1  ;;  %p5263_p7 = scmp.lt.s32.totalorder %s432_s20, %s432_s20 }
 0x108   : > { %p5264_p9 = scmp.lt.s32.totalorder %s5262_s13, %s5255_s1 }
 0x109   : > { %p5258_p2 = pnand %p5256_p0, %p5580_p8 }
 0x10a   : > { %p5265_p5 = por %p5264_p9, %p5263_p7 }
 0x10b   : > { %p5259_p4 = pneg %p5258_p2 }
 0x10d   : > { %p5266_p10 = pnand %p5265_p5, %p5259_p4 }
 0x10f   : > { %5269 = shalt.err (!%p5266_p10)
}
 0x110   : > { %4774 = dma.hbm_to_vmem [thread:$0]  (!%p5564_p6), %s6369_s10, 16, %s432_s20, [#allocation19]  }
 0x111   : > { %s3864_s11 = sadd.s32 4294967294, %s5436_s22   ;;  %s46_s28 = sadd.s32 1, %s5432_s21 }
 0x112   : > { %s55_s27 = sadd.s32 1, %s5424_s19  ;;  %p48_p8 = scmp.ge.s32.totalorder %s46_s28, 2 }
 0x113   : > { %p62_p1 = scmp.ne.s32.totalorder %s5424_s19, %s5420_s18  ;;  %p63_p3 = scmp.eq.s32.totalorder %s5436_s22, 0 }
 0x114   : > { %p68_p11 = scmp.ne.s32.totalorder %s5420_s18, %s5416_s17  ;;  %s6442_s28 = smov (%p48_p8, %s46_s28), 0 }
 0x115   : > { %p5771_p12 = por %p63_p3, %p62_p1  ;;  %p6407_p13 = scmp.eq.s32.totalorder %s5548_s23, 0 }
 0x116   : > { %s50_s29 = ssub.s32 %s5432_s21, %s6442_s28  ;;  %p311_p0 = scmp.eq.s32.totalorder %s5548_s23, 1 }
 0x117   : > { %p5777_p6 = por %p6407_p13, %p68_p11  ;;  %p53_p2 = scmp.eq.s32.totalorder %s50_s29, 0 }
 0x118   : > { %p317_p4 = scmp.eq.s32.totalorder %s3864_s11, 1  ;;  %p5784_p7 = por %p311_p0, %p62_p1 }
 0x119   : > { %p4795_p9 = scmp.lt.s32.totalorder %s5436_s22, 2  ;;  %s5797_s25 = sand.u32 1, %s5424_s19  }
 0x11a   : > { %s6409_s12 = scalar_select %p5784_p7, 1, 0 }
 0x11b   : > { %s5790_s24 = scalar_select %p53_p2, %s5424_s19, %s55_s27  }
 0x11c   : > { %p5792_p5 = por %p317_p4, %p68_p11  ;;  %s3876_s2 = sshll.u32 %s5797_s25, 5 }
 0x11d   : > { %s4267_s1 = sshll.u32 %s5432_s21, 9  ;;  %s6411_s16 = sld [smem:[#allocation32_spill]] }
 0x11e   : > { %s6410_s0 = scalar_select %p5792_p5, 1, 0 }
 0x11f   : > { %s446_s27 = scalar_lea.vmem [#allocation3], %s3876_s2  ;;  %p5810_p10 = pnand %p4795_p9, %p5771_p12 }
 0x120   : > { %s455_s29 = sshll.u32 %s446_s27, 4  ;;  %s3879_s3 = sshll.u32 %s5797_s25, 3  ;;  %s5806_s29 = int_to_ptr.vmem [resolvable:$true] %s455_s29 }
 0x121   : > { %s443_s13 = scalar_lea.sflag [#allocation4], %s5797_s25  ;;  %p5272_p1 = pneg %p5810_p10 }
 0x123   : > { %s5804_s11 = scalar_lea.hbm %s6411_s16, %s4267_s1  ;;  %s5275_s26 = scalar_lea.hbm %s6411_s16, 1024 }
 0x124   : > { %s5270_s1 = scalar_lea.hbm %s5804_s11, 512  ;;  %p5276_p12 = scmp.lt.u32.totalorder %s5804_s11, %s6411_s16 }
 0x125   : > { %p5271_p8 = scmp.ne.s32.totalorder %s5804_s11, %s5270_s1  ;;  %p5277_p13 = scmp.lt.u32.totalorder %s5275_s26, %s5270_s1 }
 0x126   : > { %p5279_p2 = scmp.lt.u32.totalorder %s5270_s1, %s5804_s11 }
 0x127   : > { %p5273_p3 = pnand %p5272_p1, %p5271_p8  ;;  %p5278_p0 = por %p5277_p13, %p5276_p12 }
 0x129   : > { %p5274_p11 = pneg %p5273_p3  ;;  %p5280_p4 = por %p5279_p2, %p5278_p0 }
 0x12b   : > { %p5281_p9 = pnand %p5280_p4, %p5274_p11 }
 0x12d   : > { %5284 = shalt.err (!%p5281_p9)
}
 0x12e   : > { %s5285_s15 = scalar_lea.vmem %s5806_s29, 512  ;;  %s5449_s2 = smov [#allocation3]  }
 0x12f   : > { %p5286_p8 = scmp.ne.s32.totalorder %s5806_s29, %s5285_s15  ;;  %s5290_s30 = sshll.u32 %s5449_s2, 4  ;;  %s5291_s30 = int_to_ptr.vmem [resolvable:$false] %s5290_s30 }
 0x130   : > { %s5292_s4 = scalar_lea.vmem %s5291_s30, 1024  ;;  %p5293_p7 = scmp.lt.s32.totalorder %s5806_s29, %s5291_s30 }
 0x131   : > { %p5288_p3 = pnand %p5286_p8, %p5272_p1  ;;  %p5294_p12 = scmp.lt.s32.totalorder %s5292_s4, %s5285_s15 }
 0x133   : > { %p5289_p5 = pneg %p5288_p3  ;;  %p5295_p13 = por %p5294_p12, %p5293_p7 }
 0x135   : > { %p5296_p0 = pnand %p5295_p13, %p5289_p5 }
 0x137   : > { %5299 = shalt.err (!%p5296_p0)
}
 0x138   : > { %s6413_s1 = smov 4   ;;  %s6414_s26 = smov 64  }
 0x139   : > { %4778 = dma.hbm_to_vmem [thread:$0]  (!%p5810_p10), %s5804_s11, 512, %s5806_s29, %s443_s13, %s6414_s26, %s6414_s26, %s6413_s1  }
 0x13a   : > { %s4268_s27 = sshll.u32 %s5432_s21, 7  ;;  %s6415_s30 = sld [smem:[#allocation33_spill]] }
 0x13b   : > { %s469_s5 = scalar_lea.vmem [#allocation6], %s3879_s3  ;;  %s6416_s7 = sand.u32 1, %s5436_s22  }
 0x13c   : > { %s477_s6 = sshll.u32 %s469_s5, 4  ;;  %s5859_s8 = scalar_lea.sflag [#allocation7], %s6416_s7  ;;  %s5855_s6 = int_to_ptr.vmem [resolvable:$true] %s477_s6 }
 0x140   : > { %s5851_s4 = scalar_lea.hbm %s6415_s30, %s4268_s27  ;;  %s5305_s25 = scalar_lea.hbm %s6415_s30, 256 }
 0x141   : > { %s5300_s9 = scalar_lea.hbm %s5851_s4, 128  ;;  %p5306_p2 = scmp.lt.u32.totalorder %s5851_s4, %s6415_s30 }
 0x142   : > { %p5301_p7 = scmp.ne.s32.totalorder %s5851_s4, %s5300_s9  ;;  %p5307_p4 = scmp.lt.u32.totalorder %s5305_s25, %s5300_s9 }
 0x143   : > { %p5309_p8 = scmp.lt.u32.totalorder %s5300_s9, %s5851_s4 }
 0x144   : > { %p5303_p5 = pnand %p5301_p7, %p5272_p1  ;;  %p5308_p9 = por %p5307_p4, %p5306_p2 }
 0x146   : > { %p5304_p11 = pneg %p5303_p5  ;;  %p5310_p3 = por %p5309_p8, %p5308_p9 }
 0x148   : > { %p5311_p12 = pnand %p5310_p3, %p5304_p11 }
 0x14a   : > { %5314 = shalt.err (!%p5311_p12)
}
 0x14b   : > { %s5315_s3 = scalar_lea.vmem %s5855_s6, 128  ;;  %s5450_s5 = smov [#allocation6]  }
 0x14c   : > { %p5316_p13 = scmp.ne.s32.totalorder %s5855_s6, %s5315_s3  ;;  %s5320_s7 = sshll.u32 %s5450_s5, 4  ;;  %s5321_s7 = int_to_ptr.vmem [resolvable:$false] %s5320_s7 }
 0x14d   : > { %s5322_s2 = scalar_lea.vmem %s5321_s7, 256  ;;  %p5323_p5 = scmp.lt.s32.totalorder %s5855_s6, %s5321_s7 }
 0x14e   : > { %p5318_p0 = pnand %p5316_p13, %p5272_p1  ;;  %p5324_p2 = scmp.lt.s32.totalorder %s5322_s2, %s5315_s3 }
 0x150   : > { %p5319_p7 = pneg %p5318_p0  ;;  %p5325_p4 = por %p5324_p2, %p5323_p5 }
 0x152   : > { %p5326_p9 = pnand %p5325_p4, %p5319_p7 }
 0x154   : > { %5329 = shalt.err (!%p5326_p9)
}
 0x155   : > { %4781 = dma.hbm_to_vmem [thread:$0]  (!%p5810_p10), %s5851_s4, 128, %s5855_s6, %s5859_s8, %s6414_s26, %s6414_s26, %s6413_s1  }
 0x156   : > { %s6417_s9 = sld [smem:[#allocation31_spill]] }
 0x15c   : > { %p6418_p1 = scmp.ne.s32.totalorder %s6417_s9, 0 }
 0x15d   : > { %s5891_s15 = sand.u32 (!%p6418_p1), 1, %s5420_s18  }
 0x15e   : > { %489 = sbr.rel (%p6418_p1) target bundleno = 1276 (0x4fc), region = 64  ;;  %s3883_s11 = sshll.u32 (!%p6418_p1), %s5891_s15, 5 }
 0x15f   : > { %s492_s29 = scalar_lea.sflag (!%p6418_p1), [#allocation4], %s5891_s15  ;;  %s5897_s14 = scalar_lea.vmem (!%p6418_p1), [#allocation3], %s3883_s11 }
 0x165   : > { %5383 = dma.done.wait (%p5777_p6), %s492_s29, 512  }
 0x166   : > { %5385 = vsyncadd (%p5777_p6), %s492_s29, 4294966784  ;;  %s500_s6 = sand.u32 1, %s5548_s23   ;;  %s3884_s8 = sshll.u32 %s5891_s15, 3 }
 0x167   : > { %s501_s1 = scalar_lea.sflag [#allocation7], %s500_s6  ;;  %s5905_s26 = scalar_lea.vmem [#allocation6], %s3884_s8 }
 0x168   : > { %5387 = dma.done.wait (%p5777_p6), %s501_s1, 128  }
 0x169   : > { %5389 = vsyncadd (%p5777_p6), %s501_s1, 4294967168  ;;  %p6419_p10 = scmp.eq.s32.totalorder %s5548_s23, 0 }
 0x16b   : > { %5391 = dma.done.wait (%p6419_p10), [#allocation7], 1024   ;;  %p6420_p11 = pmov %p6419_p10 }
 0x16c   : > { %p6421_p8 = pmov %p6419_p10 }
 0x16d   : > { %5393 = vsyncadd (%p6420_p11), [#allocation7], 4294966272 }
 0x16e   : > { %5395 = dma.done.wait (%p6421_p8), [#allocation10], 32   ;;  %p6422_p3 = pmov %p6421_p8 }
 0x170   : > { %5397 = vsyncadd (%p6422_p3), [#allocation10], 4294967264  ;;  %p6423_p12 = pmov %p6422_p3 }
 0x171   : > { %p6424_p13 = pmov %p6422_p3 }
 0x172   : > { %5399 = dma.done.wait (%p6423_p12), [#allocation13], 9232  }
 0x173   : > { %5401 = vsyncadd (%p6424_p13), [#allocation13], 4294958064  ;;  %p6425_p6 = pmov %p6422_p3 }
 0x174   : > { %p6426_p0 = pmov %p6422_p3 }
 0x175   : > { %5403 = dma.done.wait (%p6425_p6), [#allocation16], 1040  }
 0x176   : > { %5405 = vsyncadd (%p6426_p0), [#allocation16], 4294966256  ;;  %p6427_p7 = pmov %p6426_p0 }
 0x177   : > { %p6428_p5 = pmov %p6426_p0 }
 0x178   : > { %5407 = dma.done.wait (%p6427_p7), [#allocation19], 32  }
 0x179   : > { %5409 = vsyncadd (%p6428_p5), [#allocation19], 4294967264  ;;  %v5451_v0 = vmov 0.0   ;;  %v4870_v1 = vld [vmem:[#allocation8] sm:$0xff]   ;;  %v4871_v2 = vld [vmem:[#allocation8 + $0x8] sm:$0xff]   ;;  %vm5452_vm0 = vmmov 0  }
 0x17a   : > { %4509 = vmatprep.subr.bf16.mxu0 %v5451_v0  ;;  %4529 = vmatprep.subr.bf16.mxu1 %v4870_v1  ;;  %v4872_v3 = vld [vmem:[#allocation8 + $0x10] sm:$0xff]   ;;  %v4873_v4 = vld [vmem:[#allocation8 + $0x18] sm:$0xff]   ;;  %v4874_v6 = vld [vmem:[#allocation8 + $0x20] sm:$0xff]   ;;  %v5453_v28 = vmov 0   ;;  %vm3936_vm1 = vcmask 1043456  ;;  %s6295_s23 = scalar_lea.vmem [#allocation21], %s3883_s11 }
 0x17b   : > { %4530 = vmatpush3.bf16.msra.mxu1 %v4870_v1  ;;  %v4878_v5 = vld [vmem:[%s5897_s14] sm:$0xff]   ;;  %v4882_v7 = vld [vmem:[#allocation8] sm:$0xff]   ;;  %v4883_v8 = vld [vmem:[#allocation8 + $0x8] sm:$0xff]   ;;  %4525 = vmatprep.mubr.msk.bf16.mxu0 %vm5452_vm0, %v5451_v0  ;;  %599 = vst [vmem:[#allocation2 + $0x14] sm:$0xf] %v5453_v28  ;;  %s6431_s20 = sld [smem:[#allocation30_spill]] }
 0x17c   : > { %4531 = vmatprep.subr.bf16.mxu1 %v4871_v2  ;;  %4545 = vmatprep.mubr.bf16.mxu1 %v4878_v5  ;;  %v4875_v9 = vld [vmem:[#allocation8 + $0x28] sm:$0xff]   ;;  %v4884_v10 = vld [vmem:[#allocation8 + $0x10] sm:$0xff]   ;;  %v4885_v12 = vld [vmem:[#allocation8 + $0x18] sm:$0xff]   ;;  %600 = vst [vmem:[#allocation2 + $0x20] sm:$0xf] %v5453_v28  ;;  %s3667_s4 = sshll.u32 %s6295_s23, 4  ;;  %s6303_s4 = int_to_ptr.vmem [resolvable:$true] %s3667_s4 }
 0x17d   : > { %4510 = vmatpush3.bf16.msra.mxu0 %v4882_v7  ;;  %v4876_v11 = vld [vmem:[#allocation8 + $0x30] sm:$0xff]   ;;  %v4877_v13 = vld [vmem:[#allocation8 + $0x38] sm:$0xff]   ;;  %v4886_v14 = vld [vmem:[#allocation8 + $0x20] sm:$0xff]   ;;  %588 = vst [vmem:[#allocation2] sm:$0xf] %v5453_v28  ;;  %s6432_s3 = sld [smem:[#allocation42_spill]] }
 0x17e   : > { %4511 = vmatprep.subr.bf16.mxu0 %v5451_v0  ;;  %v4879_v15 = vld [vmem:[%s5897_s14 + $0x8] sm:$0xff]   ;;  %v4887_v16 = vld [vmem:[#allocation8 + $0x28] sm:$0xff]   ;;  %v4880_v17 = vld [vmem:[%s5897_s14 + $0x10] sm:$0xff]   ;;  %589 = vst [vmem:[#allocation2 + $0xc] sm:$0xf] %v5453_v28  ;;  %s3652_s7 = scalar_lea.sflag [#allocation5], %s5891_s15 }
 0x17f   : > { %4532 = vmatpush3.bf16.msra.mxu1 %v4871_v2  ;;  %v4888_v18 = vld [vmem:[#allocation8 + $0x30] sm:$0xff]   ;;  %v4881_v19 = vld [vmem:[%s5897_s14 + $0x18] sm:$0xff]   ;;  %v4889_v20 = vld [vmem:[#allocation8 + $0x38] sm:$0xff]   ;;  %590 = vst [vmem:[#allocation2 + $0x18] sm:$0xf] %v5453_v28  ;;  %s5330_s2 = scalar_lea.vmem %s6303_s4, 512 }
 0x180   : > { %4533 = vmatprep.subr.bf16.mxu1 %v4872_v3  ;;  %v4890_v21 = vld [vmem:[#allocation12 + $0x140] sm:$0xff]   ;;  %v4891_v22 = vld [vmem:[%s5905_s26] sm:$0xff]   ;;  %591 = vst [vmem:[#allocation2 + $0x24] sm:$0xf] %v5453_v28  ;;  %592 = vst [vmem:[#allocation2 + $0x30] sm:$0xf] %v5453_v28  ;;  %p5331_p2 = scmp.ne.s32.totalorder %s6303_s4, %s5330_s2 }
 0x181   : > { %4512 = vmatpush3.bf16.msra.mxu0 %v4883_v8  ;;  %v4892_v23 = vld [vmem:[#allocation12 + $0x100] sm:$0xff]   ;;  %v4894_v24 = vld [vmem:[#allocation12 + $0x148] sm:$0xff]   ;;  %v4897_v27 = vld [vmem:[#allocation12 + $0x150] sm:$0xff]   ;;  %593 = vst [vmem:[#allocation2 + $0x3c] sm:$0xf] %v5453_v28  ;;  %s4277_s25 = sshll.u32 %s6431_s20, 9 }
 0x182   : > { %4513 = vmatprep.subr.bf16.mxu0 %v5451_v0  ;;  %v4893_v25 = vld [vmem:[#allocation12 + $0xc0] sm:$0xff]   ;;  %v4895_v26 = vld [vmem:[#allocation12 + $0x108] sm:$0xff]   ;;  %594 = vst [vmem:[#allocation2 + $0x48] sm:$0xf] %v5453_v28  ;;  %595 = vst [vmem:[#allocation2 + $0x54] sm:$0xf] %v5453_v28 }
 0x183   : > { %4534 = vmatpush3.bf16.msra.mxu1 %v4872_v3  ;;  %596 = vst [vmem:[#allocation2 + $0x60] sm:$0xf] %v5453_v28  ;;  %597 = vst [vmem:[#allocation2 + $0x6c] sm:$0xf] %v5453_v28  ;;  %v4896_v29 = vld [vmem:[#allocation12 + $0xc8] sm:$0xff]   ;;  %v4898_v30 = vld [vmem:[#allocation12 + $0x110] sm:$0xff]   ;;  %s6308_s5 = scalar_lea.hbm %s6432_s3, %s4277_s25 }
 0x184   : > { %4535 = vmatprep.subr.bf16.mxu1 %v4873_v4  ;;  %598 = vst [vmem:[#allocation2 + $0x8] sm:$0xf] %v5453_v28  ;;  %601 = vst [vmem:[#allocation2 + $0x2c] sm:$0xf] %v5453_v28  ;;  %v4900_v31 = vld [vmem:[#allocation12 + $0x158] sm:$0xff]   ;;  %v4899_v32 = vld [vmem:[#allocation12 + $0xd0] sm:$0xff]  }
 0x185   : > { %4514 = vmatpush3.bf16.msra.mxu0 %v4884_v10  ;;  %602 = vst [vmem:[#allocation2 + $0x38] sm:$0xf] %v5453_v28  ;;  %603 = vst [vmem:[#allocation2 + $0x44] sm:$0xf] %v5453_v28  ;;  %v4901_v33 = vld [vmem:[#allocation12 + $0x118] sm:$0xff]   ;;  %v4903_v34 = vld [vmem:[#allocation12 + $0x160] sm:$0xff]  }
 0x186   : > { %4515 = vmatprep.subr.bf16.mxu0 %v5451_v0  ;;  %604 = vst [vmem:[#allocation2 + $0x50] sm:$0xf] %v5453_v28  ;;  %605 = vst [vmem:[#allocation2 + $0x5c] sm:$0xf] %v5453_v28  ;;  %v4902_v35 = vld [vmem:[#allocation12 + $0xd8] sm:$0xff]   ;;  %v4904_v36 = vld [vmem:[#allocation12 + $0x120] sm:$0xff]  }
 0x187   : > { %4536 = vmatpush3.bf16.msra.mxu1 %v4873_v4  ;;  %606 = vst [vmem:[#allocation2 + $0x68] sm:$0xf] %v5453_v28  ;;  %607 = vst [vmem:[#allocation2 + $0x74] sm:$0xf] %v5453_v28  ;;  %v4905_v37 = vld [vmem:[#allocation12 + $0xe0] sm:$0xff]   ;;  %v4906_v38 = vld [vmem:[#allocation12 + $0x168] sm:$0xff]  }
 0x188   : > { %4537 = vmatprep.subr.bf16.mxu1 %v4874_v6  ;;  %610 = vst [vmem:[#allocation2 + $0x4] sm:$0xf] %v5453_v28  ;;  %612 = vst [vmem:[#allocation2 + $0x70] sm:$0xf] %v5453_v28  ;;  %v4907_v39 = vld [vmem:[#allocation12 + $0x128] sm:$0xff]   ;;  %v4909_v40 = vld [vmem:[#allocation12 + $0x170] sm:$0xff]  }
 0x189   : > { %4516 = vmatpush3.bf16.msra.mxu0 %v4885_v12  ;;  %v4908_v41 = vld [vmem:[#allocation12 + $0xe8] sm:$0xff]   ;;  %v4910_v42 = vld [vmem:[#allocation12 + $0x130] sm:$0xff]   ;;  %v4912_v43 = vld [vmem:[#allocation12 + $0x178] sm:$0xff]   ;;  %vm1182_vm2 = vsmask.f32 256  ;;  %p6433_p4 = scmp.ne.s32.totalorder %s6409_s12, 0 }
 0x18a   : > { %4517 = vmatprep.subr.bf16.mxu0 %v5451_v0  ;;  %v4911_v44 = vld [vmem:[#allocation12 + $0xf0] sm:$0xff]   ;;  %v4913_v45 = vld [vmem:[#allocation12 + $0x138] sm:$0xff]   ;;  %v5936_v47 = vld [vmem:[#allocation12 + $0x80] sm:$0xff]   ;;  %vm1183_vm3 = vsmask.f32 4368  ;;  %s5454_s9 = smov [#allocation21]  }
 0x18b   : > { %4538 = vmatpush3.bf16.msra.mxu1 %v4874_v6  ;;  %v4914_v46 = vld [vmem:[#allocation12 + $0xf8] sm:$0xff]   ;;  %v4921_v48 = vld [vmem:[#allocation12 + $0x40] sm:$0xff]   ;;  %v958_v63 = vld [vmem:[#allocation2] sm:$0xf]  ;;  %p5332_p9 = pnand %p5331_p2, %p6433_p4  ;;  %s5334_s11 = sshll.u32 %s5454_s9, 4  ;;  %s5335_s11 = int_to_ptr.vmem [resolvable:$false] %s5334_s11 }
 0x18c   : > { %4539 = vmatprep.subr.bf16.mxu1 %v4875_v9  ;;  %v960_v51 = vld [vmem:[#allocation2 + $0x8] sm:$0xf]  ;;  %vm5941_vm4 = vmor %vm1182_vm2, %vm1183_vm3  ;;  %s5336_s29 = scalar_lea.vmem %s5335_s11, 1024  ;;  %p5337_p10 = scmp.lt.s32.totalorder %s6303_s4, %s5335_s11 }
 0x18d   : > { %4518 = vmatpush3.bf16.msra.mxu0 %v4886_v14  ;;  %v3904_v59 = vld [vmem:[#allocation9] ss:$0 sm:$0xff]  ;;  %v3905_v61 = vld [vmem:[#allocation11] ss:$0 sm:$0xff]  ;;  %p5333_p1 = pneg %p5332_p9  ;;  %p5338_p11 = scmp.lt.s32.totalorder %s5336_s29, %s5330_s2 }
 0x18e   : > { %4519 = vmatprep.subr.bf16.mxu0 %v5451_v0 }
 0x18f   : > { %4540 = vmatpush3.bf16.msra.mxu1 %v4875_v9  ;;  %v959_v49 = vld [vmem:[#allocation2 + $0x4] sm:$0xf]  ;;  %p5339_p8 = por %p5338_p11, %p5337_p10 }
 0x190   : > { %4541 = vmatprep.subr.bf16.mxu1 %v4876_v11  ;;  %v3918_v50 = vcombine.low %v959_v49, %v959_v49  ;;  %v3926_v54 = vcombine.low %v959_v49, %v960_v51  ;;  %v1449_v51 = vld [vmem:[#allocation2 + $0x2c] sm:$0xf] }
 0x191   : > { %4520 = vmatpush3.bf16.msra.mxu0 %v4887_v16  ;;  %p5340_p3 = pnand %p5339_p8, %p5333_p1 }
 0x192   : > { %4521 = vmatprep.subr.bf16.mxu0 %v5451_v0  ;;  %v1023_v52 = vshrl.u32 %v3918_v50, 16  ;;  %v1026_v53 = vshll.u32 %v3918_v50, 16  ;;  %v1110_v57 = vrot.slane %v3926_v54, 5 }
 0x193   : > { %4542 = vmatpush3.bf16.msra.mxu1 %v4876_v11 }
 0x194   : > { %4543 = vmatprep.subr.bf16.mxu1 %v4877_v13  ;;  %v1025_v55 = vrot.slane %v1023_v52, 4  ;;  %v1028_v56 = vrot.slane %v1026_v53, 5  ;;  %v3938_v60 = vcombine.high %v1110_v57, %v1110_v57  ;;  %v3935_v5 = vcombine.low %v1110_v57, %v1110_v57  ;;  %v5945_v52 = vld [vmem:[#allocation2 + $0x2c] sm:$0xf] }
 0x195   : > { %4522 = vmatpush3.bf16.msra.mxu0 %v4888_v18 }
 0x196   : > { %4523 = vmatprep.subr.bf16.mxu0 %v5451_v0  ;;  %v1029_v58 = vor.u32 %v1028_v56, %v1025_v55  ;;  %v1204_v6 = vshrl.u32 %v3938_v60, 16  ;;  %v1199_v18 = vshrl.u32 %v3935_v5, 16  ;;  %v1452_v55 = vld [vmem:[#allocation2 + $0x38] sm:$0xf]  ;;  %v5947_v56 = vld [vmem:[#allocation2 + $0x14] sm:$0xf] }
 0x197   : > { %4544 = vmatpush3.bf16.msra.mxu1 %v4877_v13 }
 0x198   : > { %4553 = vmatprep.subr.bf16.mxu1 %v4890_v21  ;;  %v3937_v2 = vsel %vm3936_vm1, %v959_v49, %v1029_v58  ;;  %v3934_v10 = vcombine.low %v958_v63, %v1029_v58 }
 0x199   : > { %4524 = vmatpush3.bf16.msra.mxu0 %v4889_v20  ;;  %v1191_v13 = vshrl.u32 %v3937_v2, 16  ;;  %v1194_v28 = vshll.u32 %v3937_v2, 16 }
 0x19a   : > { %4546 = vmatmul.mubr.bf16.vlgmr.msra.gmra.mrb[0].mxu1 %v4879_v15  ;;  %4341 = vmatprep.subr.bf16.mxu0 %v4892_v23  ;;  %v1186_v23 = vshrl.u32 %v3934_v10, 16 }
 0x19b   : > { %4549 = vmatprep.mubr.bf16.mxu1 %v4880_v17  ;;  %4554 = vmatpush3.bf16.msra.mxu1 %v4890_v21 }
 0x19c   : > { %4526 = vmatmul.mubr.bf16.vlgmr.msra.gmra.mrb[0].mxu0 %v4891_v22  ;;  %4555 = vmatprep.subr.bf16.mxu1 %v4894_v24  ;;  %v1207_v22 = vshll.u32 %v3938_v60, 16 }
 0x19d   : > { %4342 = vmatpush3.bf16.msra.mxu0 %v4893_v25 }
 0x19e   : > { %4343 = vmatprep.subr.bf16.mxu0 %v4895_v26 }
 0x19f   : > { %4556 = vmatpush3.bf16.msra.mxu1 %v4894_v24 }
 0x1a0   : > { %4557 = vmatprep.subr.bf16.mxu1 %v4897_v27 }
 0x1a1   : > { %4344 = vmatpush3.bf16.msra.mxu0 %v4896_v29 }
 0x1a2   : > { %4550 = vmatmul.mubr.bf16.gmra.mrb[4].mxu1 %v4881_v19  ;;  %4345 = vmatprep.subr.bf16.mxu0 %v4898_v30  ;;  %v1206_v19 = vrot.slane %v1204_v6, 7 }
 0x1a3   : > { %4558 = vmatpush3.bf16.msra.mxu1 %v4897_v27  ;;  %v1193_v27 = vrot.slane %v1191_v13, 7 }
 0x1a4   : > { %4559 = vmatprep.subr.bf16.mxu1 %v4900_v31 }
 0x1a5   : > { %4346 = vmatpush3.bf16.msra.mxu0 %v4899_v32 }
 0x1a6   : > { %4347 = vmatprep.subr.bf16.mxu0 %v4901_v33 }
 0x1a7   : > { %4560 = vmatpush3.bf16.msra.mxu1 %v4900_v31 }
 0x1a8   : > { %4561 = vmatprep.subr.bf16.mxu1 %v4903_v34 }
 0x1a9   : > { %4348 = vmatpush3.bf16.msra.mxu0 %v4902_v35 }
 0x1aa   : > { %4349 = vmatprep.subr.bf16.mxu0 %v4904_v36 }
 0x1ab   : > { %4562 = vmatpush3.bf16.msra.mxu1 %v4903_v34 }
 0x1ac   : > { %4563 = vmatprep.subr.bf16.mxu1 %v4906_v38 }
 0x1ad   : > { %4350 = vmatpush3.bf16.msra.mxu0 %v4905_v37 }
 0x1ae   : > { %4351 = vmatprep.subr.bf16.mxu0 %v4907_v39  ;;  %v1209_v39 = vor.u32 %v1207_v22, %v1206_v19 }
 0x1af   : > { %4564 = vmatpush3.bf16.msra.mxu1 %v4906_v38  ;;  %v3975_v38 = vrot.slane %v1199_v18, 11 }
 0x1b0   : > { %4565 = vmatprep.subr.bf16.mxu1 %v4909_v40 }
 0x1b1   : > { %4352 = vmatpush3.bf16.msra.mxu0 %v4908_v41  ;;  %v5953_v60 = vsel %vm5941_vm4, %v3975_v38, %v1209_v39 }
 0x1b2   : > { %4353 = vmatprep.subr.bf16.mxu0 %v4910_v42  ;;  %v3974_v42 = vrot.slane %v1186_v23, 11 }
 0x1b3   : > { %4566 = vmatpush3.bf16.msra.mxu1 %v4909_v40 }
 0x1b4   : > { %4567 = vmatprep.subr.bf16.mxu1 %v4912_v43 }
 0x1b5   : > { %4354 = vmatpush3.bf16.msra.mxu0 %v4911_v44 }
 0x1b6   : > { %4355 = vmatprep.subr.bf16.mxu0 %v4913_v45 }
 0x1b7   : > { %4568 = vmatpush3.bf16.msra.mxu1 %v4912_v43  ;;  %v1196_v43 = vor.u32 %v1194_v28, %v1193_v27 }
 0x1b8   : > { %4577 = vmatprep.subr.bf16.mxu1 %v5936_v47 }
 0x1b9   : > { %4356 = vmatpush3.bf16.msra.mxu0 %v4914_v46  ;;  %v5013_v46 = vld [vmem:[#allocation17 + $0x18] sm:$0xff]  }
 0x1ba   : > { %4393 = vmatprep.subr.bf16.mxu0 %v4921_v48  ;;  %v1443_v48 = vld [vmem:[#allocation2 + $0x14] sm:$0xf] }
 0x26d   : > { %v4547_v62 = vpop.f32.mrb[0].mxu1 }
 0x26e   : > { %v919_v0 = vmul.f32 %v4547_v62, %v3904_v59  ;;  %v886_v1 = vpop.f32.mrb[1].mxu1  ;;  %v5957_v62 = vsel %vm5941_vm4, %v3974_v42, %v1196_v43 }
 0x26f   : > { %v917_v3 = vmul.f32 %v3904_v59, %v886_v1  ;;  %v4548_v4 = vpop.f32.mrb[2].mxu1  ;;  %v1446_v1 = vld [vmem:[#allocation2 + $0x20] sm:$0xf] }
 0x270   : > { %v927_v7 = vadd.f32 %v3905_v61, %v919_v0  ;;  %v920_v8 = vmul.f32 %v4548_v4, %v3904_v59  ;;  %v889_v9 = vpop.f32.mrb[3].mxu1 }
 0x271   : > { %v925_v11 = vadd.f32 %v3905_v61, %v917_v3  ;;  %v918_v12 = vmul.f32 %v3904_v59, %v889_v9 }
 0x272   : > { %v935_v14 = vmax.f32 %v927_v7, 0.0  ;;  %v928_v15 = vadd.f32 %v3905_v61, %v920_v8 }
 0x273   : > { %v933_v16 = vmax.f32 %v925_v11, 0.0  ;;  %v926_v17 = vadd.f32 %v3905_v61, %v918_v12 }
 0x274   : > { %v943_v20 = vpack.c.bf16 %v935_v14, %v935_v14  ;;  %v936_v21 = vmax.f32 %v928_v15, 0.0 }
 0x275   : > { %v941_v24 = vpack.c.bf16 %v933_v16, %v933_v16  ;;  %v934_v25 = vmax.f32 %v926_v17, 0.0  ;;  %v4551_v26 = vpop.f32.mrb[4].mxu1 }
 0x276   : > { %952 = vst [vmem:[#allocation2 + $0x28] sm:$0xf] %v943_v20  ;;  %v944_v29 = vpack.c.bf16 %v936_v21, %v936_v21  ;;  %v923_v30 = vmul.f32 %v4551_v26, %v3904_v59  ;;  %v902_v31 = vpop.f32.mrb[5].mxu1 }
 0x277   : > { %950 = vst [vmem:[#allocation2 + $0x10] sm:$0xf] %v941_v24  ;;  %v942_v32 = vpack.c.bf16 %v934_v25, %v934_v25  ;;  %v921_v33 = vmul.f32 %v3904_v59, %v902_v31  ;;  %v4552_v34 = vpop.f32.mrb[6].mxu1 }
 0x278   : > { %953 = vst [vmem:[#allocation2 + $0x34] sm:$0xf] %v944_v29  ;;  %v931_v35 = vadd.f32 %v3905_v61, %v923_v30  ;;  %v924_v36 = vmul.f32 %v4552_v34, %v3904_v59  ;;  %v905_v37 = vpop.f32.mrb[7].mxu1 }
 0x279   : > { %951 = vst [vmem:[#allocation2 + $0x1c] sm:$0xf] %v942_v32  ;;  %v929_v40 = vadd.f32 %v3905_v61, %v921_v33  ;;  %v922_v41 = vmul.f32 %v3904_v59, %v905_v37 }
 0x27a   : > { %v939_v44 = vmax.f32 %v931_v35, 0.0  ;;  %v932_v45 = vadd.f32 %v3905_v61, %v924_v36 }
 0x27b   : > { %v937_v49 = vmax.f32 %v929_v40, 0.0  ;;  %v930_v50 = vadd.f32 %v3905_v61, %v922_v41 }
 0x27c   : > { %v947_v53 = vpack.c.bf16 %v939_v44, %v939_v44  ;;  %v940_v54 = vmax.f32 %v932_v45, 0.0 }
 0x27d   : > { %v945_v57 = vpack.c.bf16 %v937_v49, %v937_v49  ;;  %v938_v58 = vmax.f32 %v930_v50, 0.0  ;;  %v5949_v59 = vld [vmem:[#allocation2 + $0x28] sm:$0xf] }
 0x27e   : > { %v5959_v61 = vld [vmem:[#allocation2 + $0x28] sm:$0xf]  ;;  %956 = vst [vmem:[#allocation2 + $0x58] sm:$0xf] %v947_v53  ;;  %v948_v63 = vpack.c.bf16 %v940_v54, %v940_v54  ;;  %v5961_v0 = vld [vmem:[#allocation2 + $0x10] sm:$0xf]  ;;  %v4000_v2 = vcombine.low %v5949_v59, %v1449_v51  ;;  %v5966_v3 = vcombine.low %v5949_v59, %v5949_v59 }
 0x27f   : > { %v5968_v4 = vld [vmem:[#allocation2 + $0x10] sm:$0xf]  ;;  %v3929_v5 = vcombine.low %v5959_v61, %v5945_v52  ;;  %954 = vst [vmem:[#allocation2 + $0x40] sm:$0xf] %v945_v57  ;;  %v946_v6 = vpack.c.bf16 %v938_v58, %v938_v58  ;;  %v3998_v7 = vcombine.low %v5961_v0, %v1443_v48  ;;  %v5973_v8 = vld [vmem:[#allocation2 + $0x34] sm:$0xf]  ;;  %v3990_v9 = vcombine.low %v5961_v0, %v5961_v0 }
 0x280   : > { %v3927_v10 = vcombine.low %v5968_v4, %v5947_v56  ;;  %957 = vst [vmem:[#allocation2 + $0x64] sm:$0xf] %v948_v63  ;;  %v5979_v11 = vld [vmem:[#allocation2 + $0x1c] sm:$0xf]  ;;  %v4001_v12 = vcombine.low %v5973_v8, %v1452_v55  ;;  %v1595_v13 = vrot.slane %v4000_v2, 5  ;;  %v5984_v14 = vcombine.low %v5973_v8, %v5973_v8 }
 0x281   : > { %v1522_v15 = vshrl.u32 %v5966_v3, 16  ;;  %955 = vst [vmem:[#allocation2 + $0x4c] sm:$0xf] %v946_v6  ;;  %v3999_v16 = vcombine.low %v5979_v11, %v1446_v1  ;;  %v1593_v17 = vrot.slane %v3998_v7, 5  ;;  %v3991_v18 = vcombine.low %v5979_v11, %v5979_v11  ;;  %v1441_v6 = vld [vmem:[#allocation2 + $0xc] sm:$0xf] }
 0x282   : > { %v1506_v19 = vshrl.u32 %v3990_v9, 16  ;;  %v1596_v20 = vrot.slane %v4001_v12, 5  ;;  %v4017_v21 = vcombine.low %v1595_v13, %v1595_v13  ;;  %v4020_v22 = vcombine.high %v1595_v13, %v1595_v13 }
 0x283   : > { %v1509_v23 = vshll.u32 %v3990_v9, 16  ;;  %v1594_v24 = vrot.slane %v3999_v16, 5  ;;  %v4007_v25 = vcombine.low %v1593_v17, %v1593_v17  ;;  %v4010_v26 = vcombine.high %v1593_v17, %v1593_v17 }
 0x284   : > { %v1508_v27 = vrot.slane %v1506_v19, 4  ;;  %v4022_v28 = vcombine.low %v1596_v20, %v1596_v20  ;;  %v4025_v29 = vcombine.high %v1596_v20, %v1596_v20  ;;  %v1731_v30 = vshrl.u32 %v4017_v21, 16 }
 0x285   : > { %v1736_v31 = vshrl.u32 %v4020_v22, 16  ;;  %v4012_v32 = vcombine.low %v1594_v24, %v1594_v24  ;;  %v4015_v33 = vcombine.high %v1594_v24, %v1594_v24  ;;  %v1679_v34 = vshrl.u32 %v4007_v25, 16  ;;  %v1444_v25 = vld [vmem:[#allocation2 + $0x18] sm:$0xf] }
 0x286   : > { %v1684_v35 = vshrl.u32 %v4010_v26, 16  ;;  %v1687_v36 = vshll.u32 %v4010_v26, 16  ;;  %v4051_v37 = vrot.slane %v1731_v30, 11  ;;  %v1739_v39 = vshll.u32 %v4020_v22, 16 }
 0x287   : > { %v1738_v38 = vrot.slane %v1736_v31, 7  ;;  %v4047_v40 = vrot.slane %v1679_v34, 11  ;;  %v1705_v42 = vshrl.u32 %v4012_v32, 16  ;;  %v1710_v43 = vshrl.u32 %v4015_v33, 16  ;;  %v4923_v31 = vld [vmem:[#allocation12 + $0x88] sm:$0xff]  }
 0x288   : > { %v1686_v41 = vrot.slane %v1684_v35, 7  ;;  %v1713_v44 = vshll.u32 %v4015_v33, 16  ;;  %v1757_v48 = vshrl.u32 %v4022_v28, 16  ;;  %v1762_v49 = vshrl.u32 %v4025_v29, 16  ;;  %v6002_v32 = vld [vmem:[#allocation2 + $0x40] sm:$0xf] }
 0x289   : > { %v1741_v45 = vor.u32 %v1739_v39, %v1738_v38  ;;  %v4049_v51 = vrot.slane %v1705_v42, 11  ;;  %v1712_v53 = vrot.slane %v1710_v43, 7  ;;  %v1765_v54 = vshll.u32 %v4025_v29, 16 }
 0x28a   : > { %v1689_v50 = vor.u32 %v1687_v36, %v1686_v41  ;;  %v4053_v57 = vrot.slane %v1757_v48, 11  ;;  %v1764_v58 = vrot.slane %v1762_v49, 7  ;;  %v1511_v63 = vrot.slane %v1509_v23, 5 }
 0x28b   : > { %v1742_v55 = vsel %vm5941_vm4, %v4051_v37, %v1741_v45  ;;  %v1715_v2 = vor.u32 %v1713_v44, %v1712_v53  ;;  %v1514_v7 = vshrl.u32 %v3991_v18, 16  ;;  %v1517_v9 = vshll.u32 %v3991_v18, 16  ;;  %v6005_v37 = vld [vmem:[#allocation2 + $0x4c] sm:$0xf] }
 0x28c   : > { %v1690_v1 = vsel %vm5941_vm4, %v4047_v40, %v1689_v50  ;;  %v1767_v12 = vor.u32 %v1765_v54, %v1764_v58  ;;  %v1512_v13 = vor.u32 %v1511_v63, %v1508_v27  ;;  %v1524_v16 = vrot.slane %v1522_v15, 4  ;;  %v1455_v27 = vld [vmem:[#allocation2 + $0x44] sm:$0xf]  ;;  %v1458_v15 = vld [vmem:[#allocation2 + $0x50] sm:$0xf] }
 0x28d   : > { %v1525_v17 = vshll.u32 %v5966_v3, 16  ;;  %v1716_v19 = vsel %vm5941_vm4, %v4049_v51, %v1715_v2  ;;  %v1516_v20 = vrot.slane %v1514_v7, 4  ;;  %v1519_v21 = vrot.slane %v1517_v9, 5  ;;  %v1447_v40 = vld [vmem:[#allocation2 + $0x24] sm:$0xf]  ;;  %v4930_v51 = vld [vmem:[#allocation12 + $0x90] sm:$0xff]  }
 0x28e   : > { %v1530_v22 = vshrl.u32 %v5984_v14, 16  ;;  %v4064_v23 = vcombine.low %v1690_v1, %v1716_v19  ;;  %v1768_v24 = vsel %vm5941_vm4, %v4053_v57, %v1767_v12  ;;  %v4006_v26 = vcombine.low %v1441_v6, %v1512_v13  ;;  %v1450_v54 = vld [vmem:[#allocation2 + $0x30] sm:$0xf] }
 0x28f   : > { %v4009_v18 = vsel %vm3936_vm1, %v5961_v0, %v1512_v13  ;;  %v4067_v28 = vcombine.low %v1742_v55, %v1768_v24  ;;  %v1520_v3 = vor.u32 %v1519_v21, %v1516_v20  ;;  %v1527_v34 = vrot.slane %v1525_v17, 5 }
 0x290   : > { %v1671_v29 = vshrl.u32 %v4009_v18, 16  ;;  %v1674_v30 = vshll.u32 %v4009_v18, 16  ;;  %4569 = vmatprep.mubr.bf16.mxu1 %v4064_v23  ;;  %v1666_v33 = vshrl.u32 %v4006_v26, 16  ;;  %v1532_v35 = vrot.slane %v1530_v22, 4  ;;  %v1461_v23 = vld [vmem:[#allocation2 + $0x5c] sm:$0xf] }
 0x291   : > { %v1533_v36 = vshll.u32 %v5984_v14, 16  ;;  %4570 = vmatmul.mubr.bf16.vlgmr.msra.gmra.mrb[8].mxu1 %v4067_v28  ;;  %v4011_v38 = vcombine.low %v1444_v25, %v1520_v3  ;;  %v4014_v0 = vsel %vm3936_vm1, %v5979_v11, %v1520_v3  ;;  %v4002_v41 = vcombine.low %v6002_v32, %v1455_v27  ;;  %v4922_v26 = vld [vmem:[#allocation12] sm:$0xff]   ;;  %v4926_v28 = vld [vmem:[#allocation12 + $0x48] sm:$0xff]  }
 0x292   : > { %v1673_v39 = vrot.slane %v1671_v29, 7  ;;  %4578 = vmatpush3.bf16.msra.mxu1 %v5936_v47  ;;  %v4046_v42 = vrot.slane %v1666_v33, 11  ;;  %v1697_v43 = vshrl.u32 %v4014_v0, 16  ;;  %v1700_v44 = vshll.u32 %v4014_v0, 16 }
 0x293   : > { %v1528_v45 = vor.u32 %v1527_v34, %v1524_v16  ;;  %v1692_v49 = vshrl.u32 %v4011_v38, 16  ;;  %4579 = vmatprep.subr.bf16.mxu1 %v4923_v31  ;;  %v1535_v14 = vrot.slane %v1533_v36, 5  ;;  %v4003_v50 = vcombine.low %v6005_v37, %v1458_v15  ;;  %v4942_v38 = vld [vmem:[#allocation12 + $0xa0] sm:$0xff]  }
 0x294   : > { %v1676_v48 = vor.u32 %v1674_v30, %v1673_v39  ;;  %v1699_v53 = vrot.slane %v1697_v43, 7  ;;  %v1597_v57 = vrot.slane %v4002_v41, 5  ;;  %v6020_v30 = vld [vmem:[#allocation2 + $0x58] sm:$0xf] }
 0x295   : > { %v4016_v11 = vcombine.low %v1447_v40, %v1528_v45  ;;  %v4019_v55 = vsel %vm3936_vm1, %v5949_v59, %v1528_v45  ;;  %v4048_v58 = vrot.slane %v1692_v49, 11  ;;  %v1536_v63 = vor.u32 %v1535_v14, %v1532_v35  ;;  %v4937_v59 = vld [vmem:[#allocation12 + $0x98] sm:$0xff]  }
 0x296   : > { %v1677_v47 = vsel %vm5941_vm4, %v4046_v42, %v1676_v48  ;;  %v1723_v1 = vshrl.u32 %v4019_v55, 16  ;;  %v1702_v2 = vor.u32 %v1700_v44, %v1699_v53  ;;  %v1726_v7 = vshll.u32 %v4019_v55, 16  ;;  %4580 = vmatpush3.bf16.msra.mxu1 %v4923_v31  ;;  %v1464_v31 = vld [vmem:[#allocation2 + $0x68] sm:$0xf]  ;;  %v6025_v42 = vld [vmem:[#allocation2 + $0x64] sm:$0xf] }
 0x297   : > { %v1718_v6 = vshrl.u32 %v4016_v11, 16  ;;  %v1598_v9 = vrot.slane %v4003_v50, 5  ;;  %v4021_v12 = vcombine.low %v1450_v54, %v1536_v63  ;;  %v4024_v13 = vsel %vm3936_vm1, %v5973_v8, %v1536_v63  ;;  %4581 = vmatprep.subr.bf16.mxu1 %v4930_v51  ;;  %v4929_v48 = vld [vmem:[#allocation12 + $0x8] sm:$0xff]   ;;  %v4935_v54 = vld [vmem:[#allocation12 + $0x50] sm:$0xff]  }
 0x298   : > { %v1725_v16 = vrot.slane %v1723_v1, 7  ;;  %v4027_v17 = vcombine.low %v1597_v57, %v1597_v57  ;;  %v1703_v19 = vsel %vm5941_vm4, %v4048_v58, %v1702_v2  ;;  %v1749_v21 = vshrl.u32 %v4024_v13, 16  ;;  %v4945_v58 = vld [vmem:[#allocation12 + $0xa8] sm:$0xff]  }
 0x299   : > { %v4050_v20 = vrot.slane %v1718_v6, 11  ;;  %v1752_v22 = vshll.u32 %v4024_v13, 16  ;;  %v4062_v24 = vcombine.low %v1677_v47, %v1703_v19  ;;  %v4063_v25 = vcombine.high %v1677_v47, %v1703_v19  ;;  %v4936_v13 = vld [vmem:[#allocation12 + $0x10] sm:$0xff]   ;;  %v4940_v19 = vld [vmem:[#allocation12 + $0x58] sm:$0xff]  }
 0x29a   : > { %v1728_v18 = vor.u32 %v1726_v7, %v1725_v16  ;;  %v1744_v27 = vshrl.u32 %v4021_v12, 16  ;;  %v1751_v15 = vrot.slane %v1749_v21, 7  ;;  %v4030_v3 = vcombine.high %v1597_v57, %v1597_v57  ;;  %4582 = vmatpush3.bf16.msra.mxu1 %v4930_v51 }
 0x29b   : > { %v4032_v8 = vcombine.low %v1598_v9, %v1598_v9  ;;  %v4035_v29 = vcombine.high %v1598_v9, %v1598_v9  ;;  %2146 = vmatprep.mubr.bf16.mxu0 %v4063_v25  ;;  %v1783_v35 = vshrl.u32 %v4027_v17, 16  ;;  %v4004_v36 = vcombine.low %v6020_v30, %v1461_v23  ;;  %4583 = vmatprep.subr.bf16.mxu1 %v4937_v59 }
 0x29c   : > { %v1729_v33 = vsel %vm5941_vm4, %v4050_v20, %v1728_v18  ;;  %v4052_v34 = vrot.slane %v1744_v27, 11  ;;  %2147 = vmatmul.mubr.bf16.vlgmr.msra.gmra.mrb[4].mxu0 %v4062_v24  ;;  %v1754_v0 = vor.u32 %v1752_v22, %v1751_v15  ;;  %v1788_v39 = vshrl.u32 %v4030_v3, 16 }
 0x29d   : > { %v1791_v40 = vshll.u32 %v4030_v3, 16  ;;  %v1809_v41 = vshrl.u32 %v4032_v8, 16  ;;  %4394 = vmatpush3.bf16.msra.mxu0 %v4922_v26  ;;  %v4055_v43 = vrot.slane %v1783_v35, 11  ;;  %v1814_v44 = vshrl.u32 %v4035_v29, 16  ;;  %v4950_v26 = vld [vmem:[#allocation12 + $0xb0] sm:$0xff]   ;;  %v4941_v3 = vld [vmem:[#allocation12 + $0x18] sm:$0xff]  }
 0x29e   : > { %v1817_v45 = vshll.u32 %v4035_v29, 16  ;;  %v4005_v49 = vcombine.low %v6025_v42, %v1464_v31  ;;  %v1755_v14 = vsel %vm5941_vm4, %v4052_v34, %v1754_v0  ;;  %4395 = vmatprep.subr.bf16.mxu0 %v4926_v28  ;;  %v1790_v50 = vrot.slane %v1788_v39, 7  ;;  %4584 = vmatpush3.bf16.msra.mxu1 %v4937_v59 }
 0x29f   : > { %v4057_v51 = vrot.slane %v1809_v41, 11  ;;  %v1599_v53 = vrot.slane %v4004_v36, 5  ;;  %v4066_v11 = vcombine.high %v1729_v33, %v1755_v14  ;;  %v1816_v55 = vrot.slane %v1814_v44, 7  ;;  %4585 = vmatprep.subr.bf16.mxu1 %v4942_v38  ;;  %v4953_v44 = vld [vmem:[#allocation12 + $0xb8] sm:$0xff]  }
 0x2a0   : > { %v1600_v57 = vrot.slane %v4005_v49, 5  ;;  %v1111_v47 = vrot.slane %v3927_v10, 5  ;;  %v1793_v63 = vor.u32 %v1791_v40, %v1790_v50  ;;  %v4065_v6 = vcombine.low %v1729_v33, %v1755_v14  ;;  %v4943_v33 = vld [vmem:[#allocation12 + $0x60] sm:$0xff]  }
 0x2a1   : > { %v4037_v1 = vcombine.low %v1599_v53, %v1599_v53  ;;  %v4040_v2 = vcombine.high %v1599_v53, %v1599_v53  ;;  %2154 = vmatprep.mubr.bf16.mxu0 %v4066_v11  ;;  %v1819_v7 = vor.u32 %v1817_v45, %v1816_v55  ;;  %4396 = vmatpush3.bf16.msra.mxu0 %v4929_v48  ;;  %v6036_v16 = vrot.slane %v3929_v5, 5  ;;  %v4944_v50 = vld [vmem:[#allocation12 + $0x20] sm:$0xff]   ;;  %v4948_v55 = vld [vmem:[#allocation12 + $0x68] sm:$0xff]  }
 0x2a2   : > { %v4042_v9 = vcombine.low %v1600_v57, %v1600_v57  ;;  %v4045_v12 = vcombine.high %v1600_v57, %v1600_v57  ;;  %v1794_v56 = vsel %vm5941_vm4, %v4055_v43, %v1793_v63  ;;  %4397 = vmatprep.subr.bf16.mxu0 %v4935_v54  ;;  %4586 = vmatpush3.bf16.msra.mxu1 %v4942_v38 }
 0x2a3   : > { %v1835_v10 = vshrl.u32 %v4037_v1, 16  ;;  %v1840_v17 = vshrl.u32 %v4040_v2, 16  ;;  %v1843_v59 = vshll.u32 %v4040_v2, 16  ;;  %v1820_v20 = vsel %vm5941_vm4, %v4057_v51, %v1819_v7  ;;  %4587 = vmatprep.subr.bf16.mxu1 %v4945_v58  ;;  %v1456_v2 = vld [vmem:[#allocation2 + $0x48] sm:$0xf] }
 0x2a4   : > { %v1861_v21 = vshrl.u32 %v4042_v9, 16  ;;  %v1866_v22 = vshrl.u32 %v4045_v12, 16  ;;  %v1869_v23 = vshll.u32 %v4045_v12, 16  ;;  %v4070_v24 = vcombine.low %v1794_v56, %v1820_v20  ;;  %2155 = vmatmul.mubr.bf16.gmra.mrb[8].mxu0 %v4065_v6 }
 0x2a5   : > { %v4059_v52 = vrot.slane %v1835_v10, 11  ;;  %v1842_v5 = vrot.slane %v1840_v17, 7  ;;  %v3940_v25 = vcombine.low %v1111_v47, %v1111_v47  ;;  %v3943_v15 = vcombine.high %v1111_v47, %v1111_v47  ;;  %4398 = vmatpush3.bf16.msra.mxu0 %v4936_v13  ;;  %v1453_v47 = vld [vmem:[#allocation2 + $0x3c] sm:$0xf]  ;;  %v6058_v13 = vld [vmem:[#allocation12 + $0x200] sm:$0xff]  }
 0x2a6   : > { %v4061_v18 = vrot.slane %v1861_v21, 11  ;;  %v1868_v27 = vrot.slane %v1866_v22, 7  ;;  %v3994_v28 = vcombine.low %v6002_v32, %v6002_v32  ;;  %4573 = vmatprep.mubr.bf16.mxu1 %v4070_v24  ;;  %v3995_v31 = vcombine.low %v6005_v37, %v6005_v37  ;;  %4399 = vmatprep.subr.bf16.mxu0 %v4940_v19  ;;  %v4949_v19 = vld [vmem:[#allocation12 + $0x28] sm:$0xff]   ;;  %v4951_v24 = vld [vmem:[#allocation12 + $0x70] sm:$0xff]  }
 0x2a7   : > { %v1845_v8 = vor.u32 %v1843_v59, %v1842_v5  ;;  %v1225_v29 = vshrl.u32 %v3940_v25, 16  ;;  %v3996_v34 = vcombine.low %v6020_v30, %v6020_v30  ;;  %v1230_v36 = vshrl.u32 %v3943_v15, 16  ;;  %4588 = vmatpush3.bf16.msra.mxu1 %v4945_v58 }
 0x2a8   : > { %v1871_v35 = vor.u32 %v1869_v23, %v1868_v27  ;;  %v1233_v38 = vshll.u32 %v3943_v15, 16  ;;  %v1538_v0 = vshrl.u32 %v3994_v28, 16  ;;  %v1541_v41 = vshll.u32 %v3994_v28, 16  ;;  %4589 = vmatprep.subr.bf16.mxu1 %v4950_v26 }
 0x2a9   : > { %v1846_v39 = vsel %vm5941_vm4, %v4059_v52, %v1845_v8  ;;  %v3977_v40 = vrot.slane %v1225_v29, 11  ;;  %v1546_v43 = vshrl.u32 %v3995_v31, 16  ;;  %v1232_v48 = vrot.slane %v1230_v36, 7  ;;  %4400 = vmatpush3.bf16.msra.mxu0 %v4941_v3  ;;  %v4952_v29 = vld [vmem:[#allocation12 + $0x30] sm:$0xff]  }
 0x2aa   : > { %v1872_v45 = vsel %vm5941_vm4, %v4061_v18, %v1871_v35  ;;  %v1540_v49 = vrot.slane %v1538_v0, 4  ;;  %v1549_v14 = vshll.u32 %v3995_v31, 16  ;;  %v1543_v53 = vrot.slane %v1541_v41, 5  ;;  %4401 = vmatprep.subr.bf16.mxu0 %v4943_v33  ;;  %v1459_v18 = vld [vmem:[#allocation2 + $0x54] sm:$0xf] }
 0x2ab   : > { %v4073_v51 = vcombine.low %v1846_v39, %v1872_v45  ;;  %v1548_v54 = vrot.slane %v1546_v43, 4  ;;  %v3997_v11 = vcombine.low %v6025_v42, %v6025_v42  ;;  %v1235_v57 = vor.u32 %v1233_v38, %v1232_v48  ;;  %4590 = vmatpush3.bf16.msra.mxu1 %v4950_v26  ;;  %v4956_v38 = vld [vmem:[#allocation12 + $0x78] sm:$0xff]  }
 0x2ac   : > { %v1551_v58 = vrot.slane %v1549_v14, 5  ;;  %v1554_v63 = vshrl.u32 %v3996_v34, 16  ;;  %v1557_v1 = vshll.u32 %v3996_v34, 16  ;;  %v1544_v6 = vor.u32 %v1543_v53, %v1540_v49  ;;  %4591 = vmatprep.subr.bf16.mxu1 %v4953_v44  ;;  %v1462_v34 = vld [vmem:[#allocation2 + $0x60] sm:$0xf] }
 0x2ad   : > { %4574 = vmatmul.mubr.bf16.gmra.mrb[12].mxu1 %v4073_v51  ;;  %v1562_v7 = vshrl.u32 %v3997_v11, 16  ;;  %v1565_v9 = vshll.u32 %v3997_v11, 16  ;;  %v6056_v12 = vcombine.low %v5968_v4, %v5968_v4  ;;  %v1236_v56 = vsel %vm5941_vm4, %v3977_v40, %v1235_v57  ;;  %4402 = vmatpush3.bf16.msra.mxu0 %v4944_v50  ;;  %v966_v49 = vld [vmem:[#allocation2 + $0x20] sm:$0xf]  ;;  %v972_v11 = vld [vmem:[#allocation2 + $0x38] sm:$0xf] }
 0x2ae   : > { %v1552_v10 = vor.u32 %v1551_v58, %v1548_v54  ;;  %v1556_v17 = vrot.slane %v1554_v63, 4  ;;  %v1559_v59 = vrot.slane %v1557_v1, 5  ;;  %v4100_v20 = vcombine.low %v5953_v60, %v1236_v56  ;;  %4403 = vmatprep.subr.bf16.mxu0 %v4948_v55  ;;  %v6075_v54 = vld [vmem:[#allocation2 + $0x1c] sm:$0xf]  ;;  %v6079_v63 = vld [vmem:[#allocation2 + $0x34] sm:$0xf] }
 0x2af   : > { %v4026_v21 = vcombine.low %v1453_v47, %v1544_v6  ;;  %v4029_v22 = vsel %vm3936_vm1, %v6002_v32, %v1544_v6  ;;  %v1564_v23 = vrot.slane %v1562_v7, 4  ;;  %4592 = vmatpush3.bf16.msra.mxu1 %v4953_v44  ;;  %v1567_v8 = vrot.slane %v1565_v9, 5  ;;  %v4963_v1 = vld [vmem:[#allocation12 + $0x1c0] sm:$0xff]  }
 0x2b0   : > { %v4031_v52 = vcombine.low %v1456_v2, %v1552_v10  ;;  %v4034_v5 = vsel %vm3936_vm1, %v6005_v37, %v1552_v10  ;;  %v1775_v25 = vshrl.u32 %v4029_v22, 16  ;;  %v1778_v26 = vshll.u32 %v4029_v22, 16  ;;  %4593 = vmatprep.mubr.bf16.mxu1 %v4100_v20  ;;  %4601 = vmatprep.subr.bf16.mxu1 %v6058_v13 }
 0x2b1   : > { %v1770_v27 = vshrl.u32 %v4026_v21, 16  ;;  %v1801_v15 = vshrl.u32 %v4034_v5, 16  ;;  %v1804_v28 = vshll.u32 %v4034_v5, 16  ;;  %v1560_v60 = vor.u32 %v1559_v59, %v1556_v17  ;;  %4404 = vmatpush3.bf16.msra.mxu0 %v4949_v19  ;;  %v6085_v59 = vld [vmem:[#allocation2 + $0x40] sm:$0xf] }
 0x2b2   : > { %v1777_v3 = vrot.slane %v1775_v25, 7  ;;  %v1796_v32 = vshrl.u32 %v4031_v52, 16  ;;  %v1031_v31 = vshrl.u32 %v6056_v12, 16  ;;  %4405 = vmatprep.subr.bf16.mxu0 %v4951_v24  ;;  %v1568_v40 = vor.u32 %v1567_v8, %v1564_v23  ;;  %v975_v19 = vld [vmem:[#allocation2 + $0x44] sm:$0xf] }
 0x2b3   : > { %v4054_v33 = vrot.slane %v1770_v27, 11  ;;  %v1803_v37 = vrot.slane %v1801_v15, 7  ;;  %v4036_v35 = vcombine.low %v1459_v18, %v1560_v60  ;;  %v4039_v36 = vsel %vm3936_vm1, %v6020_v30, %v1560_v60  ;;  %v4957_v30 = vld [vmem:[#allocation12 + $0x38] sm:$0xff]   ;;  %v961_v25 = vld [vmem:[#allocation2 + $0xc] sm:$0xf] }
 0x2b4   : > { %v1780_v0 = vor.u32 %v1778_v26, %v1777_v3  ;;  %v4056_v39 = vrot.slane %v1796_v32, 11  ;;  %v1827_v41 = vshrl.u32 %v4039_v36, 16  ;;  %v1830_v45 = vshll.u32 %v4039_v36, 16 }
 0x2b5   : > { %v1806_v43 = vor.u32 %v1804_v28, %v1803_v37  ;;  %v1822_v44 = vshrl.u32 %v4036_v35, 16  ;;  %v1033_v48 = vrot.slane %v1031_v31, 4  ;;  %v4041_v50 = vcombine.low %v1462_v34, %v1568_v40  ;;  %4406 = vmatpush3.bf16.msra.mxu0 %v4952_v29 }
 0x2b6   : > { %v1781_v14 = vsel %vm5941_vm4, %v4054_v33, %v1780_v0  ;;  %v4044_v51 = vsel %vm3936_vm1, %v6025_v42, %v1568_v40  ;;  %v1829_v53 = vrot.slane %v1827_v41, 7  ;;  %4407 = vmatprep.subr.bf16.mxu0 %v4956_v38  ;;  %v1034_v56 = vshll.u32 %v6056_v12, 16 }
 0x2b7   : > { %v1807_v55 = vsel %vm5941_vm4, %v4056_v39, %v1806_v43  ;;  %v4058_v57 = vrot.slane %v1822_v44, 11  ;;  %v1853_v47 = vshrl.u32 %v4044_v51, 16  ;;  %v1856_v58 = vshll.u32 %v4044_v51, 16 }
 0x2b8   : > { %v4069_v2 = vcombine.high %v1781_v14, %v1807_v55  ;;  %v4068_v6 = vcombine.low %v1781_v14, %v1807_v55  ;;  %v1832_v7 = vor.u32 %v1830_v45, %v1829_v53  ;;  %v1848_v42 = vshrl.u32 %v4041_v50, 16 }
 0x2b9   : > { %v1855_v9 = vrot.slane %v1853_v47, 7  ;;  %v3928_v10 = vcombine.low %v6075_v54, %v966_v49  ;;  %v3950_v17 = vcombine.low %v6036_v16, %v6036_v16  ;;  %4408 = vmatpush3.bf16.msra.mxu0 %v4957_v30  ;;  %v3953_v22 = vcombine.high %v6036_v16, %v6036_v16  ;;  %v978_v47 = vld [vmem:[#allocation2 + $0x50] sm:$0xf] }
 0x2ba   : > { %2162 = vmatprep.mubr.bf16.mxu0 %v4069_v2  ;;  %v1833_v20 = vsel %vm5941_vm4, %v4058_v57, %v1832_v7  ;;  %v4060_v21 = vrot.slane %v1848_v42, 11  ;;  %v3930_v23 = vcombine.low %v6079_v63, %v972_v11  ;;  %v1036_v24 = vrot.slane %v1034_v56, 5  ;;  %4445 = vmatprep.subr.bf16.mxu0 %v4963_v1  ;;  %v981_v42 = vld [vmem:[#allocation2 + $0x5c] sm:$0xf] }
 0x2bb   : > { %2163 = vmatmul.mubr.bf16.gmra.mrb[12].mxu0 %v4068_v6  ;;  %v1858_v12 = vor.u32 %v1856_v58, %v1855_v9  ;;  %v1112_v52 = vrot.slane %v3928_v10, 5  ;;  %v1277_v5 = vshrl.u32 %v3950_v17, 16  ;;  %v1282_v26 = vshrl.u32 %v3953_v22, 16  ;;  %v6099_v58 = vld [vmem:[#allocation2 + $0x20] sm:$0xf] }
 0x2bc   : > { %v1285_v18 = vshll.u32 %v3953_v22, 16  ;;  %v3931_v27 = vcombine.low %v6085_v59, %v975_v19  ;;  %v1114_v15 = vrot.slane %v3930_v23, 5  ;;  %v1037_v60 = vor.u32 %v1036_v24, %v1033_v48  ;;  %v4965_v19 = vld [vmem:[#allocation12 + $0x208] sm:$0xff]  }
 0x2bd   : > { %v1859_v28 = vsel %vm5941_vm4, %v4060_v21, %v1858_v12  ;;  %v3945_v3 = vcombine.low %v1112_v52, %v1112_v52  ;;  %v3948_v16 = vcombine.high %v1112_v52, %v1112_v52  ;;  %v3981_v29 = vrot.slane %v1277_v5, 11  ;;  %v719_v21 = vpop.f32.mrb[0].mxu0  ;;  %v6109_v52 = vld [vmem:[#allocation2 + $0x4c] sm:$0xf] }
 0x2be   : > { %v4072_v32 = vcombine.high %v1833_v20, %v1859_v28  ;;  %v4071_v8 = vcombine.low %v1833_v20, %v1859_v28  ;;  %v1284_v31 = vrot.slane %v1282_v26, 7  ;;  %v3939_v33 = vcombine.low %v961_v25, %v1037_v60  ;;  %v6105_v20 = vld [vmem:[#allocation2 + $0x1c] sm:$0xf]  ;;  %v4527_v5 = vpop.f32.mrb[1].mxu0  ;;  %v4964_v26 = vld [vmem:[#allocation12 + $0x180] sm:$0xff]  }
 0x2bf   : > { %v3942_v37 = vsel %vm3936_vm1, %v5968_v4, %v1037_v60  ;;  %v1251_v34 = vshrl.u32 %v3945_v3, 16  ;;  %v1256_v35 = vshrl.u32 %v3948_v16, 16  ;;  %v1259_v0 = vshll.u32 %v3948_v16, 16  ;;  %v722_v60 = vpop.f32.mrb[2].mxu0  ;;  %v4968_v3 = vld [vmem:[#allocation12 + $0x1c8] sm:$0xff]  }
 0x2c0   : > { %2170 = vmatprep.mubr.bf16.mxu0 %v4072_v32  ;;  %v1217_v36 = vshrl.u32 %v3942_v37, 16  ;;  %v1220_v38 = vshll.u32 %v3942_v37, 16  ;;  %v1287_v39 = vor.u32 %v1285_v18, %v1284_v31  ;;  %v1212_v40 = vshrl.u32 %v3939_v33, 16 }
 0x2c1   : > { %v3979_v41 = vrot.slane %v1251_v34, 11  ;;  %v1258_v43 = vrot.slane %v1256_v35, 7  ;;  %v1115_v44 = vrot.slane %v3931_v27, 5  ;;  %v3955_v49 = vcombine.low %v1114_v15, %v1114_v15  ;;  %v4972_v34 = vld [vmem:[#allocation12 + $0x210] sm:$0xff]   ;;  %v6124_v35 = vld [vmem:[#allocation2 + $0x2c] sm:$0xf] }
 0x2c2   : > { %v1219_v45 = vrot.slane %v1217_v36, 7  ;;  %v1288_v48 = vsel %vm5941_vm4, %v3981_v29, %v1287_v39  ;;  %v3958_v14 = vcombine.high %v1114_v15, %v1114_v15  ;;  %v3976_v50 = vrot.slane %v1212_v40, 11  ;;  %v6115_v15 = vld [vmem:[#allocation2 + $0x58] sm:$0xf]  ;;  %v6128_v39 = vld [vmem:[#allocation2 + $0x28] sm:$0xf] }
 0x2c3   : > { %2171 = vmatmul.mubr.bf16.gmra.mrb[16].mxu0 %v4071_v8  ;;  %v1261_v4 = vor.u32 %v1259_v0, %v1258_v43  ;;  %v3960_v51 = vcombine.low %v1115_v44, %v1115_v44  ;;  %v3963_v53 = vcombine.high %v1115_v44, %v1115_v44  ;;  %v1303_v11 = vshrl.u32 %v3955_v49, 16  ;;  %v4528_v8 = vpop.f32.mrb[3].mxu0 }
 0x2c4   : > { %v1222_v30 = vor.u32 %v1220_v38, %v1219_v45  ;;  %v1308_v55 = vshrl.u32 %v3958_v14, 16  ;;  %v1311_v57 = vshll.u32 %v3958_v14, 16  ;;  %v3920_v18 = vcombine.low %v6075_v54, %v6075_v54  ;;  %v4971_v45 = vld [vmem:[#allocation12 + $0x188] sm:$0xff]  }
 0x2c5   : > { %v1262_v1 = vsel %vm5941_vm4, %v3979_v41, %v1261_v4  ;;  %v1329_v2 = vshrl.u32 %v3960_v51, 16  ;;  %v1334_v6 = vshrl.u32 %v3963_v53, 16  ;;  %v1337_v7 = vshll.u32 %v3963_v53, 16  ;;  %v4975_v51 = vld [vmem:[#allocation12 + $0x1d0] sm:$0xff]   ;;  %v967_v53 = vld [vmem:[#allocation2 + $0x24] sm:$0xf] }
 0x2c6   : > { %v1223_v9 = vsel %vm5941_vm4, %v3976_v50, %v1222_v30  ;;  %v4103_v56 = vcombine.low %v1262_v1, %v1288_v48  ;;  %v3983_v10 = vrot.slane %v1303_v11, 11  ;;  %v1310_v17 = vrot.slane %v1308_v55, 7  ;;  %v964_v48 = vld [vmem:[#allocation2 + $0x18] sm:$0xf] }
 0x2c7   : > { %v4098_v22 = vcombine.low %v5957_v62, %v1223_v9  ;;  %v4099_v23 = vcombine.high %v5957_v62, %v1223_v9  ;;  %v3985_v12 = vrot.slane %v1329_v2, 11  ;;  %v1336_v24 = vrot.slane %v1334_v6, 7 }
 0x2c8   : > { %4594 = vmatmul.mubr.bf16.vlgmr.msra.gmra.mrb[8].mxu1 %v4103_v56  ;;  %v1313_v25 = vor.u32 %v1311_v57, %v1310_v17  ;;  %v3921_v27 = vcombine.low %v5959_v61, %v5959_v61  ;;  %v3932_v28 = vcombine.low %v6109_v52, %v978_v47  ;;  %v3933_v16 = vcombine.low %v6115_v15, %v981_v42  ;;  %v4977_v47 = vld [vmem:[#allocation12 + $0x218] sm:$0xff]  }
 0x2c9   : > { %2468 = vmatprep.mubr.bf16.mxu0 %v4099_v23  ;;  %v1339_v62 = vor.u32 %v1337_v7, %v1336_v24  ;;  %4602 = vmatpush3.bf16.msra.mxu1 %v6058_v13  ;;  %v4142_v32 = vcombine.low %v6105_v20, %v6099_v58  ;;  %v1039_v31 = vshrl.u32 %v3920_v18, 16  ;;  %v1042_v33 = vshll.u32 %v3920_v18, 16  ;;  %v4980_v23 = vld [vmem:[#allocation12 + $0x1d8] sm:$0xff]  }
 0x2ca   : > { %v1314_v29 = vsel %vm5941_vm4, %v3983_v10, %v1313_v25  ;;  %4603 = vmatprep.subr.bf16.mxu1 %v4965_v19  ;;  %v1047_v37 = vshrl.u32 %v3921_v27, 16  ;;  %v1050_v36 = vshll.u32 %v3921_v27, 16  ;;  %v1116_v38 = vrot.slane %v3932_v28, 5  ;;  %v4976_v10 = vld [vmem:[#allocation12 + $0x190] sm:$0xff]  }
 0x2cb   : > { %v1340_v13 = vsel %vm5941_vm4, %v3985_v12, %v1339_v62  ;;  %2469 = vmatmul.mubr.bf16.vlgmr.msra.gmra.mrb[20].mxu0 %v4098_v22  ;;  %v1117_v0 = vrot.slane %v3933_v16, 5  ;;  %v1041_v41 = vrot.slane %v1039_v31, 4  ;;  %v1044_v43 = vrot.slane %v1042_v33, 5  ;;  %v4983_v33 = vld [vmem:[#allocation12 + $0x1e0] sm:$0xff]  }
 0x2cc   : > { %v4106_v40 = vcombine.low %v1314_v29, %v1340_v13  ;;  %4446 = vmatpush3.bf16.msra.mxu0 %v4964_v26  ;;  %v1049_v44 = vrot.slane %v1047_v37, 4  ;;  %v1052_v49 = vrot.slane %v1050_v36, 5  ;;  %v3965_v14 = vcombine.low %v1116_v38, %v1116_v38  ;;  %v4982_v26 = vld [vmem:[#allocation12 + $0x220] sm:$0xff]   ;;  %v4985_v36 = vld [vmem:[#allocation12 + $0x228] sm:$0xff]  }
 0x2cd   : > { %4604 = vmatpush3.bf16.msra.mxu1 %v4965_v19  ;;  %4447 = vmatprep.subr.bf16.mxu0 %v4968_v3  ;;  %v3968_v50 = vcombine.high %v1116_v38, %v1116_v38  ;;  %v3970_v4 = vcombine.low %v1117_v0, %v1117_v0  ;;  %v1045_v30 = vor.u32 %v1044_v43, %v1041_v41  ;;  %v2719_v57 = vrot.slane %v4142_v32, 5 }
 0x2ce   : > { %4597 = vmatprep.mubr.bf16.mxu1 %v4106_v40  ;;  %v3973_v11 = vcombine.high %v1117_v0, %v1117_v0  ;;  %4605 = vmatprep.subr.bf16.mxu1 %v4972_v34  ;;  %v4143_v55 = vcombine.low %v6128_v39, %v6124_v35  ;;  %v1053_v58 = vor.u32 %v1052_v49, %v1049_v44  ;;  %v1355_v1 = vshrl.u32 %v3965_v14, 16  ;;  %v4984_v49 = vld [vmem:[#allocation12 + $0x1a0] sm:$0xff]  }
 0x2cf   : > { %v1360_v2 = vshrl.u32 %v3968_v50, 16  ;;  %v1363_v6 = vshll.u32 %v3968_v50, 16  ;;  %v3944_v7 = vcombine.low %v964_v48, %v1045_v30  ;;  %v3947_v42 = vsel %vm3936_vm1, %v6075_v54, %v1045_v30 }
 0x2d0   : > { %v1381_v9 = vshrl.u32 %v3970_v4, 16  ;;  %v1386_v56 = vshrl.u32 %v3973_v11, 16  ;;  %4448 = vmatpush3.bf16.msra.mxu0 %v4971_v45  ;;  %v3949_v17 = vcombine.low %v967_v53, %v1053_v58  ;;  %v3952_v19 = vsel %vm3936_vm1, %v5959_v61, %v1053_v58  ;;  %v4981_v61 = vld [vmem:[#allocation12 + $0x198] sm:$0xff]  }
 0x2d1   : > { %v1243_v21 = vshrl.u32 %v3947_v42, 16  ;;  %v1246_v22 = vshll.u32 %v3947_v42, 16  ;;  %4606 = vmatpush3.bf16.msra.mxu1 %v4972_v34  ;;  %4449 = vmatprep.subr.bf16.mxu0 %v4975_v51  ;;  %v1238_v12 = vshrl.u32 %v3944_v7, 16  ;;  %v1269_v24 = vshrl.u32 %v3952_v19, 16 }
 0x2d2   : > { %v1272_v5 = vshll.u32 %v3952_v19, 16  ;;  %v3987_v25 = vrot.slane %v1355_v1, 11  ;;  %4607 = vmatprep.subr.bf16.mxu1 %v4977_v47  ;;  %v1264_v18 = vshrl.u32 %v3949_v17, 16  ;;  %v1362_v27 = vrot.slane %v1360_v2, 7 }
 0x2d3   : > { %v1245_v54 = vrot.slane %v1243_v21, 7  ;;  %v3989_v28 = vrot.slane %v1381_v9, 11  ;;  %v3978_v60 = vrot.slane %v1238_v12, 11  ;;  %v1271_v62 = vrot.slane %v1269_v24, 7 }
 0x2d4   : > { %v1388_v3 = vrot.slane %v1386_v56, 7  ;;  %v1389_v16 = vshll.u32 %v3973_v11, 16  ;;  %4450 = vmatpush3.bf16.msra.mxu0 %v4976_v10  ;;  %v3980_v8 = vrot.slane %v1264_v18, 11  ;;  %v1365_v29 = vor.u32 %v1363_v6, %v1362_v27  ;;  %v4989_v10 = vld [vmem:[#allocation12 + $0x1a8] sm:$0xff]  }
 0x2d5   : > { %v1248_v32 = vor.u32 %v1246_v22, %v1245_v54  ;;  %v2720_v31 = vrot.slane %v4143_v55, 5  ;;  %4608 = vmatpush3.bf16.msra.mxu1 %v4977_v47  ;;  %4451 = vmatprep.subr.bf16.mxu0 %v4980_v23  ;;  %v1274_v37 = vor.u32 %v1272_v5, %v1271_v62  ;;  %v4151_v35 = vcombine.low %v2719_v57, %v2719_v57  ;;  %v4990_v47 = vld [vmem:[#allocation12 + $0x230] sm:$0xff]   ;;  %v970_v54 = vld [vmem:[#allocation2 + $0x30] sm:$0xf] }
 0x2d6   : > { %v1391_v34 = vor.u32 %v1389_v16, %v1388_v3  ;;  %v4154_v13 = vcombine.high %v2719_v57, %v2719_v57  ;;  %4609 = vmatprep.subr.bf16.mxu1 %v4982_v26  ;;  %v1366_v0 = vsel %vm5941_vm4, %v3987_v25, %v1365_v29  ;;  %v4988_v57 = vld [vmem:[#allocation12 + $0x1e8] sm:$0xff]   ;;  %v3922_v2 = vcombine.low %v6079_v63, %v6079_v63  ;;  %v4991_v23 = vld [vmem:[#allocation12 + $0x1f0] sm:$0xff]  }
 0x2d7   : > { %v1249_v38 = vsel %vm5941_vm4, %v3978_v60, %v1248_v32  ;;  %v4156_v40 = vcombine.low %v2720_v31, %v2720_v31  ;;  %v4159_v41 = vcombine.high %v2720_v31, %v2720_v31  ;;  %v1275_v43 = vsel %vm5941_vm4, %v3980_v8, %v1274_v37  ;;  %v973_v3 = vld [vmem:[#allocation2 + $0x3c] sm:$0xf] }
 0x2d8   : > { %v1392_v44 = vsel %vm5941_vm4, %v3989_v28, %v1391_v34  ;;  %v2805_v45 = vshrl.u32 %v4151_v35, 16  ;;  %v2810_v48 = vshrl.u32 %v4154_v13, 16  ;;  %4452 = vmatpush3.bf16.msra.mxu0 %v4981_v61  ;;  %v4102_v14 = vcombine.high %v1249_v38, %v1275_v43  ;;  %v4992_v8 = vld [vmem:[#allocation12 + $0x1b0] sm:$0xff]   ;;  %v4996_v34 = vld [vmem:[#allocation12 + $0x1f8] sm:$0xff]  }
 0x2d9   : > { %v4109_v50 = vcombine.low %v1366_v0, %v1392_v44  ;;  %v2813_v4 = vshll.u32 %v4154_v13, 16  ;;  %v2831_v51 = vshrl.u32 %v4156_v40, 16  ;;  %4610 = vmatpush3.bf16.msra.mxu1 %v4982_v26  ;;  %4453 = vmatprep.subr.bf16.mxu0 %v4983_v33  ;;  %v2836_v11 = vshrl.u32 %v4159_v41, 16  ;;  %v4993_v26 = vld [vmem:[#allocation12 + $0x238] sm:$0xff]  }
 0x2da   : > { %v4191_v53 = vrot.slane %v2805_v45, 11  ;;  %v2812_v30 = vrot.slane %v2810_v48, 7  ;;  %v2839_v55 = vshll.u32 %v4159_v41, 16  ;;  %4611 = vmatprep.subr.bf16.mxu1 %v4985_v36  ;;  %2476 = vmatprep.mubr.bf16.mxu0 %v4102_v14  ;;  %v4101_v1 = vcombine.low %v1249_v38, %v1275_v43  ;;  %v976_v35 = vld [vmem:[#allocation2 + $0x48] sm:$0xf] }
 0x2db   : > { %4598 = vmatmul.mubr.bf16.gmra.mrb[12].mxu1 %v4109_v50  ;;  %v4193_v58 = vrot.slane %v2831_v51, 11  ;;  %v3923_v6 = vcombine.low %v6085_v59, %v6085_v59  ;;  %v2838_v42 = vrot.slane %v2836_v11, 7  ;;  %v3924_v9 = vcombine.low %v6109_v52, %v6109_v52  ;;  %v4997_v50 = vld [vmem:[#allocation12 + $0x1b8] sm:$0xff]  }
 0x2dc   : > { %v2815_v7 = vor.u32 %v2813_v4, %v2812_v30  ;;  %4454 = vmatpush3.bf16.msra.mxu0 %v4984_v49  ;;  %v3925_v56 = vcombine.low %v6115_v15, %v6115_v15  ;;  %v1055_v17 = vshrl.u32 %v3922_v2, 16  ;;  %v1058_v19 = vshll.u32 %v3922_v2, 16 }
 0x2dd   : > { %2477 = vmatmul.mubr.bf16.gmra.mrb[24].mxu0 %v4101_v1  ;;  %v1063_v21 = vshrl.u32 %v3923_v6, 16  ;;  %v1066_v22 = vshll.u32 %v3923_v6, 16  ;;  %4612 = vmatpush3.bf16.msra.mxu1 %v4985_v36  ;;  %v2841_v24 = vor.u32 %v2839_v55, %v2838_v42  ;;  %v1071_v5 = vshrl.u32 %v3924_v9, 16 }
 0x2de   : > { %v2816_v12 = vsel %vm5941_vm4, %v4191_v53, %v2815_v7  ;;  %v1074_v25 = vshll.u32 %v3924_v9, 16  ;;  %4455 = vmatprep.subr.bf16.mxu0 %v4988_v57  ;;  %4613 = vmatprep.subr.bf16.mxu1 %v4990_v47  ;;  %v1057_v18 = vrot.slane %v1055_v17, 4  ;;  %v1060_v27 = vrot.slane %v1058_v19, 5  ;;  %v979_v57 = vld [vmem:[#allocation2 + $0x54] sm:$0xf] }
 0x2df   : > { %v1065_v28 = vrot.slane %v1063_v21, 4  ;;  %v1068_v60 = vrot.slane %v1066_v22, 5  ;;  %v2842_v62 = vsel %vm5941_vm4, %v4193_v58, %v2841_v24  ;;  %v1073_v16 = vrot.slane %v1071_v5, 4  ;;  %v2575_v21 = vld [vmem:[#allocation2 + $0x38] sm:$0xf] }
 0x2e0   : > { %v1076_v61 = vrot.slane %v1074_v25, 5  ;;  %v1079_v32 = vshrl.u32 %v3925_v56, 16  ;;  %4456 = vmatpush3.bf16.msra.mxu0 %v4989_v10  ;;  %v4208_v29 = vcombine.low %v2816_v12, %v2842_v62  ;;  %v1061_v31 = vor.u32 %v1060_v27, %v1057_v18  ;;  %v2578_v22 = vld [vmem:[#allocation2 + $0x44] sm:$0xf]  ;;  %v6177_v5 = vld [vmem:[#allocation2 + $0x34] sm:$0xf] }
 0x2e1   : > { %v1069_v33 = vor.u32 %v1068_v60, %v1065_v28  ;;  %v1082_v37 = vshll.u32 %v3925_v56, 16  ;;  %4614 = vmatpush3.bf16.msra.mxu1 %v4990_v47  ;;  %4457 = vmatprep.subr.bf16.mxu0 %v4991_v23  ;;  %v6158_v38 = vcombine.low %v6105_v20, %v6105_v20  ;;  %v6162_v0 = vcombine.low %v6128_v39, %v6128_v39  ;;  %v6179_v25 = vld [vmem:[#allocation2 + $0x40] sm:$0xf] }
 0x2e2   : > { %v1077_v13 = vor.u32 %v1076_v61, %v1073_v16  ;;  %v1081_v36 = vrot.slane %v1079_v32, 4  ;;  %4615 = vmatprep.subr.bf16.mxu1 %v4993_v26  ;;  %4617 = vmatprep.mubr.bf16.mxu1 %v4208_v29  ;;  %v3954_v40 = vcombine.low %v970_v54, %v1061_v31  ;;  %v3957_v41 = vsel %vm3936_vm1, %v6079_v63, %v1061_v31  ;;  %v2584_v29 = vld [vmem:[#allocation2 + $0x5c] sm:$0xf] }
 0x2e3   : > { %v3959_v43 = vcombine.low %v973_v3, %v1069_v33  ;;  %v3962_v44 = vsel %vm3936_vm1, %v6085_v59, %v1069_v33  ;;  %v1295_v45 = vshrl.u32 %v3957_v41, 16  ;;  %v1298_v48 = vshll.u32 %v3957_v41, 16  ;;  %v2581_v3 = vld [vmem:[#allocation2 + $0x50] sm:$0xf]  ;;  %v6190_v41 = vld [vmem:[#allocation2 + $0x58] sm:$0xf] }
 0x2e4   : > { %v1321_v49 = vshrl.u32 %v3962_v44, 16  ;;  %v1324_v14 = vshll.u32 %v3962_v44, 16  ;;  %4458 = vmatpush3.bf16.msra.mxu0 %v4992_v8  ;;  %v1290_v4 = vshrl.u32 %v3954_v40, 16  ;;  %v1084_v53 = vrot.slane %v1082_v37, 5  ;;  %v2567_v37 = vld [vmem:[#allocation2 + $0x18] sm:$0xf] }
 0x2e5   : > { %v1316_v51 = vshrl.u32 %v3959_v43, 16  ;;  %v3964_v30 = vcombine.low %v976_v35, %v1077_v13  ;;  %4616 = vmatpush3.bf16.msra.mxu1 %v4993_v26  ;;  %4459 = vmatprep.subr.bf16.mxu0 %v4996_v34  ;;  %v1297_v11 = vrot.slane %v1295_v45, 7  ;;  %v3967_v63 = vsel %vm3936_vm1, %v6109_v52, %v1077_v13  ;;  %v6188_v13 = vld [vmem:[#allocation2 + $0x4c] sm:$0xf]  ;;  %v2570_v44 = vld [vmem:[#allocation2 + $0x24] sm:$0xf] }
 0x2e6   : > { %v1323_v55 = vrot.slane %v1321_v49, 7  ;;  %v2632_v59 = vshrl.u32 %v6158_v38, 16  ;;  %v3982_v47 = vrot.slane %v1290_v4, 11  ;;  %v1085_v1 = vor.u32 %v1084_v53, %v1081_v36 }
 0x2e7   : > { %v3984_v58 = vrot.slane %v1316_v51, 11  ;;  %v1342_v2 = vshrl.u32 %v3964_v30, 16  ;;  %v1300_v6 = vor.u32 %v1298_v48, %v1297_v11  ;;  %v1347_v42 = vshrl.u32 %v3967_v63, 16 }
 0x2e8   : > { %v1326_v7 = vor.u32 %v1324_v14, %v1323_v55  ;;  %v1350_v9 = vshll.u32 %v3967_v63, 16  ;;  %4460 = vmatpush3.bf16.msra.mxu0 %v4997_v50  ;;  %v3969_v56 = vcombine.low %v979_v57, %v1085_v1  ;;  %v3972_v10 = vsel %vm3936_vm1, %v6115_v15, %v1085_v1 }
 0x2e9   : > { %v3986_v17 = vrot.slane %v1342_v2, 11  ;;  %v2634_v19 = vrot.slane %v2632_v59, 4  ;;  %v1301_v52 = vsel %vm5941_vm4, %v3982_v47, %v1300_v6  ;;  %v1349_v12 = vrot.slane %v1347_v42, 7 }
 0x2ea   : > { %v1327_v23 = vsel %vm5941_vm4, %v3984_v58, %v1326_v7  ;;  %v1373_v24 = vshrl.u32 %v3972_v10, 16  ;;  %v1368_v18 = vshrl.u32 %v3969_v56, 16  ;;  %v1376_v15 = vshll.u32 %v3972_v10, 16 }
 0x2eb   : > { %v4105_v26 = vcombine.high %v1301_v52, %v1327_v23  ;;  %v4104_v54 = vcombine.low %v1301_v52, %v1327_v23  ;;  %v1352_v27 = vor.u32 %v1350_v9, %v1349_v12  ;;  %v2635_v60 = vshll.u32 %v6158_v38, 16 }
 0x2ec   : > { %v1375_v28 = vrot.slane %v1373_v24, 7  ;;  %v2640_v62 = vshrl.u32 %v6162_v0, 16  ;;  %v3988_v16 = vrot.slane %v1368_v18, 11  ;;  %v2643_v61 = vshll.u32 %v6162_v0, 16 }
 0x2ed   : > { %2484 = vmatprep.mubr.bf16.mxu0 %v4105_v26  ;;  %v4144_v32 = vcombine.low %v6177_v5, %v2575_v21  ;;  %v4145_v8 = vcombine.low %v6179_v25, %v2578_v22  ;;  %v1353_v31 = vsel %vm5941_vm4, %v3986_v17, %v1352_v27  ;;  %v2637_v34 = vrot.slane %v2635_v60, 5 }
 0x2ee   : > { %2485 = vmatmul.mubr.bf16.gmra.mrb[28].mxu0 %v4104_v54  ;;  %v1378_v33 = vor.u32 %v1376_v15, %v1375_v28  ;;  %v2642_v35 = vrot.slane %v2640_v62, 4  ;;  %v2645_v36 = vrot.slane %v2643_v61, 5  ;;  %v4146_v0 = vcombine.low %v6188_v13, %v2581_v3 }
 0x2ef   : > { %v2721_v38 = vrot.slane %v4144_v32, 5  ;;  %v2722_v40 = vrot.slane %v4145_v8, 5  ;;  %v2638_v45 = vor.u32 %v2637_v34, %v2634_v19  ;;  %v4147_v48 = vcombine.low %v6190_v41, %v2584_v29 }
 0x2f0   : > { %v1379_v43 = vsel %vm5941_vm4, %v3988_v16, %v1378_v33  ;;  %v6198_v49 = vcombine.low %v6177_v5, %v6177_v5  ;;  %v2646_v4 = vor.u32 %v2645_v36, %v2642_v35  ;;  %v2723_v15 = vrot.slane %v4146_v0, 5 }
 0x2f1   : > { %v4108_v14 = vcombine.high %v1353_v31, %v1379_v43  ;;  %v4107_v50 = vcombine.low %v1353_v31, %v1379_v43  ;;  %v4161_v51 = vcombine.low %v2721_v38, %v2721_v38  ;;  %v4150_v53 = vcombine.low %v2567_v37, %v2638_v45 }
 0x2f2   : > { %v4153_v30 = vsel %vm3936_vm1, %v6105_v20, %v2638_v45  ;;  %v4164_v11 = vcombine.high %v2721_v38, %v2721_v38  ;;  %v4166_v55 = vcombine.low %v2722_v40, %v2722_v40  ;;  %v4155_v57 = vcombine.low %v2570_v44, %v2646_v4 }
 0x2f3   : > { %2492 = vmatprep.mubr.bf16.mxu0 %v4108_v14  ;;  %v4158_v63 = vsel %vm3936_vm1, %v6128_v39, %v2646_v4  ;;  %v2797_v59 = vshrl.u32 %v4153_v30, 16  ;;  %v2800_v47 = vshll.u32 %v4153_v30, 16  ;;  %v2792_v58 = vshrl.u32 %v4150_v53, 16  ;;  %v6216_v53 = vld [vmem:[#allocation2 + $0x70] sm:$0xf] }
 0x2f4   : > { %v2823_v1 = vshrl.u32 %v4158_v63, 16  ;;  %v2826_v2 = vshll.u32 %v4158_v63, 16  ;;  %v4169_v6 = vcombine.high %v2722_v40, %v2722_v40  ;;  %v2818_v42 = vshrl.u32 %v4155_v57, 16  ;;  %v2587_v40 = vld [vmem:[#allocation2 + $0x68] sm:$0xf] }
 0x2f5   : > { %v2799_v7 = vrot.slane %v2797_v59, 7  ;;  %v2857_v9 = vshrl.u32 %v4161_v51, 16  ;;  %v2862_v56 = vshrl.u32 %v4164_v11, 16  ;;  %v4190_v10 = vrot.slane %v2792_v58, 11  ;;  %v6218_v57 = vld [vmem:[#allocation2 + $0x64] sm:$0xf] }
 0x2f6   : > { %2493 = vmatmul.mubr.bf16.gmra.mrb[32].mxu0 %v4107_v50  ;;  %v2825_v20 = vrot.slane %v2823_v1, 7  ;;  %v2865_v17 = vshll.u32 %v4164_v11, 16  ;;  %v2883_v19 = vshrl.u32 %v4166_v55, 16  ;;  %v4192_v22 = vrot.slane %v2818_v42, 11  ;;  %v2573_v59 = vld [vmem:[#allocation2 + $0x30] sm:$0xf] }
 0x2f7   : > { %v2802_v21 = vor.u32 %v2800_v47, %v2799_v7  ;;  %v4195_v52 = vrot.slane %v2857_v9, 11  ;;  %v2864_v23 = vrot.slane %v2862_v56, 7  ;;  %v2888_v24 = vshrl.u32 %v4169_v6, 16 }
 0x2f8   : > { %v2828_v39 = vor.u32 %v2826_v2, %v2825_v20  ;;  %v4197_v12 = vrot.slane %v2883_v19, 11  ;;  %v2891_v26 = vshll.u32 %v4169_v6, 16  ;;  %v2724_v27 = vrot.slane %v4147_v48, 5  ;;  %v2590_v48 = vld [vmem:[#allocation2 + $0x74] sm:$0xf] }
 0x2f9   : > { %v2803_v54 = vsel %vm5941_vm4, %v4190_v10, %v2802_v21  ;;  %v2867_v18 = vor.u32 %v2865_v17, %v2864_v23  ;;  %v2890_v60 = vrot.slane %v2888_v24, 7  ;;  %v4137_v62 = vcombine.low %v6179_v25, %v6179_v25  ;;  %v2576_v19 = vld [vmem:[#allocation2 + $0x3c] sm:$0xf] }
 0x2fa   : > { %v2829_v28 = vsel %vm5941_vm4, %v4192_v22, %v2828_v39  ;;  %v2648_v3 = vshrl.u32 %v6198_v49, 16  ;;  %v4171_v8 = vcombine.low %v2723_v15, %v2723_v15  ;;  %v4174_v31 = vcombine.high %v2723_v15, %v2723_v15 }
 0x2fb   : > { %v4206_v16 = vcombine.low %v2803_v54, %v2829_v28  ;;  %v4207_v61 = vcombine.high %v2803_v54, %v2829_v28  ;;  %v2868_v32 = vsel %vm5941_vm4, %v4195_v52, %v2867_v18  ;;  %v2893_v29 = vor.u32 %v2891_v26, %v2890_v60 }
 0x2fc   : > { %v4176_v33 = vcombine.low %v2724_v27, %v2724_v27  ;;  %v4179_v37 = vcombine.high %v2724_v27, %v2724_v27  ;;  %v2909_v34 = vshrl.u32 %v4171_v8, 16  ;;  %v2650_v35 = vrot.slane %v2648_v3, 4 }
 0x2fd   : > { %3272 = vmatprep.mubr.bf16.mxu0 %v4207_v61  ;;  %v2651_v36 = vshll.u32 %v6198_v49, 16  ;;  %v2656_v38 = vshrl.u32 %v4137_v62, 16  ;;  %v2894_v0 = vsel %vm5941_vm4, %v4197_v12, %v2893_v29  ;;  %v2914_v43 = vshrl.u32 %v4174_v31, 16 }
 0x2fe   : > { %v2917_v44 = vshll.u32 %v4174_v31, 16  ;;  %v2935_v45 = vshrl.u32 %v4176_v33, 16  ;;  %3273 = vmatmul.mubr.bf16.vlgmr.msra.gmra.mrb[36].mxu0 %v4206_v16  ;;  %v4211_v14 = vcombine.low %v2868_v32, %v2894_v0  ;;  %v4199_v50 = vrot.slane %v2909_v34, 11 }
 0x2ff   : > { %v2940_v4 = vshrl.u32 %v4179_v37, 16  ;;  %v2943_v51 = vshll.u32 %v4179_v37, 16  ;;  %v2916_v30 = vrot.slane %v2914_v43, 7  ;;  %v2653_v55 = vrot.slane %v2651_v36, 5 }
 0x300   : > { %v4201_v11 = vrot.slane %v2935_v45, 11  ;;  %v2658_v49 = vrot.slane %v2656_v38, 4  ;;  %4618 = vmatmul.mubr.bf16.vlgmr.msra.gmra.mrb[8].mxu1 %v4211_v14  ;;  %v2659_v47 = vshll.u32 %v4137_v62, 16  ;;  %v4148_v58 = vcombine.low %v6218_v57, %v2587_v40 }
 0x301   : > { %v2942_v63 = vrot.slane %v2940_v4, 7  ;;  %v4149_v1 = vcombine.low %v6216_v53, %v2590_v48  ;;  %v2919_v2 = vor.u32 %v2917_v44, %v2916_v30  ;;  %v2654_v6 = vor.u32 %v2653_v55, %v2650_v35 }
 0x302   : > { %v4138_v7 = vcombine.low %v6188_v13, %v6188_v13  ;;  %v4139_v42 = vcombine.low %v6190_v41, %v6190_v41  ;;  %v2661_v56 = vrot.slane %v2659_v47, 5  ;;  %v2725_v10 = vrot.slane %v4148_v58, 5 }
 0x303   : > { %v2945_v9 = vor.u32 %v2943_v51, %v2942_v63  ;;  %v2726_v20 = vrot.slane %v4149_v1, 5  ;;  %v2920_v17 = vsel %vm5941_vm4, %v4199_v50, %v2919_v2  ;;  %v4160_v21 = vcombine.low %v2573_v59, %v2654_v6  ;;  %v2579_v1 = vld [vmem:[#allocation2 + $0x48] sm:$0xf] }
 0x304   : > { %v4163_v22 = vsel %vm3936_vm1, %v6177_v5, %v2654_v6  ;;  %v2664_v52 = vshrl.u32 %v4138_v7, 16  ;;  %v2662_v39 = vor.u32 %v2661_v56, %v2658_v49  ;;  %v4181_v18 = vcombine.low %v2725_v10, %v2725_v10 }
 0x305   : > { %v2946_v23 = vsel %vm5941_vm4, %v4201_v11, %v2945_v9  ;;  %v2849_v12 = vshrl.u32 %v4163_v22, 16  ;;  %v2852_v24 = vshll.u32 %v4163_v22, 16  ;;  %v2844_v54 = vshrl.u32 %v4160_v21, 16  ;;  %v2582_v9 = vld [vmem:[#allocation2 + $0x54] sm:$0xf] }
 0x306   : > { %v4214_v26 = vcombine.low %v2920_v17, %v2946_v23  ;;  %v4184_v15 = vcombine.high %v2725_v10, %v2725_v10  ;;  %v4165_v27 = vcombine.low %v2576_v19, %v2662_v39  ;;  %v4168_v28 = vsel %vm3936_vm1, %v6179_v25, %v2662_v39 }
 0x307   : > { %v2851_v60 = vrot.slane %v2849_v12, 7  ;;  %v4186_v62 = vcombine.low %v2726_v20, %v2726_v20  ;;  %v4194_v3 = vrot.slane %v2844_v54, 11  ;;  %v2875_v5 = vshrl.u32 %v4168_v28, 16 }
 0x308   : > { %4621 = vmatprep.mubr.bf16.mxu1 %v4214_v26  ;;  %v2878_v16 = vshll.u32 %v4168_v28, 16  ;;  %v4189_v61 = vcombine.high %v2726_v20, %v2726_v20  ;;  %v2870_v8 = vshrl.u32 %v4165_v27, 16  ;;  %v2961_v29 = vshrl.u32 %v4181_v18, 16  ;;  %v2585_v18 = vld [vmem:[#allocation2 + $0x60] sm:$0xf] }
 0x309   : > { %v2854_v32 = vor.u32 %v2852_v24, %v2851_v60  ;;  %v2966_v31 = vshrl.u32 %v4184_v15, 16  ;;  %v2877_v33 = vrot.slane %v2875_v5, 7  ;;  %v2969_v37 = vshll.u32 %v4184_v15, 16 }
 0x30a   : > { %v2987_v34 = vshrl.u32 %v4186_v62, 16  ;;  %v2992_v35 = vshrl.u32 %v4189_v61, 16  ;;  %v4196_v38 = vrot.slane %v2870_v8, 11  ;;  %v4203_v25 = vrot.slane %v2961_v29, 11 }
 0x30b   : > { %v2855_v36 = vsel %vm5941_vm4, %v4194_v3, %v2854_v32  ;;  %v2968_v40 = vrot.slane %v2966_v31, 7  ;;  %v2880_v0 = vor.u32 %v2878_v16, %v2877_v33  ;;  %v2995_v45 = vshll.u32 %v4189_v61, 16 }
 0x30c   : > { %v4205_v43 = vrot.slane %v2987_v34, 11  ;;  %v2994_v44 = vrot.slane %v2992_v35, 7  ;;  %v2666_v14 = vrot.slane %v2664_v52, 4  ;;  %v2667_v50 = vshll.u32 %v4138_v7, 16 }
 0x30d   : > { %v2971_v48 = vor.u32 %v2969_v37, %v2968_v40  ;;  %v2672_v4 = vshrl.u32 %v4139_v42, 16  ;;  %v2881_v51 = vsel %vm5941_vm4, %v4196_v38, %v2880_v0  ;;  %v2675_v11 = vshll.u32 %v4139_v42, 16 }
 0x30e   : > { %v2997_v30 = vor.u32 %v2995_v45, %v2994_v44  ;;  %v4140_v55 = vcombine.low %v6218_v57, %v6218_v57  ;;  %v4210_v49 = vcombine.high %v2855_v36, %v2881_v51  ;;  %v4209_v59 = vcombine.low %v2855_v36, %v2881_v51 }
 0x30f   : > { %v2972_v63 = vsel %vm5941_vm4, %v4203_v25, %v2971_v48  ;;  %v2669_v47 = vrot.slane %v2667_v50, 5  ;;  %v2674_v2 = vrot.slane %v2672_v4, 4  ;;  %v2677_v6 = vrot.slane %v2675_v11, 5 }
 0x310   : > { %v2998_v58 = vsel %vm5941_vm4, %v4205_v43, %v2997_v30  ;;  %v4141_v7 = vcombine.low %v6216_v53, %v6216_v53  ;;  %3280 = vmatprep.mubr.bf16.mxu0 %v4210_v49  ;;  %v2680_v10 = vshrl.u32 %v4140_v55, 16  ;;  %v2683_v20 = vshll.u32 %v4140_v55, 16 }
 0x311   : > { %v4217_v42 = vcombine.low %v2972_v63, %v2998_v58  ;;  %v2670_v56 = vor.u32 %v2669_v47, %v2666_v14  ;;  %3281 = vmatmul.mubr.bf16.gmra.mrb[40].mxu0 %v4209_v59  ;;  %v2678_v17 = vor.u32 %v2677_v6, %v2674_v2  ;;  %v5010_v59 = vld [vmem:[#allocation17] sm:$0xff]   ;;  %v5011_v47 = vld [vmem:[#allocation17 + $0x8] sm:$0xff]   ;;  %v5012_v58 = vld [vmem:[#allocation17 + $0x10] sm:$0xff]  }
 0x312   : > { %v2688_v19 = vshrl.u32 %v4141_v7, 16  ;;  %v2691_v21 = vshll.u32 %v4141_v7, 16  ;;  %v2682_v23 = vrot.slane %v2680_v10, 4  ;;  %v2685_v39 = vrot.slane %v2683_v20, 5  ;;  %4625 = vmatprep.subr.bf16.mxu0 %v5010_v59  ;;  %4649 = vmatprep.subr.bf16.mxu1 %v5010_v59  ;;  %v5014_v6 = vld [vmem:[#allocation17 + $0x20] sm:$0xff]   ;;  %v5015_v10 = vld [vmem:[#allocation17 + $0x28] sm:$0xff]  }
 0x313   : > { %4622 = vmatmul.mubr.bf16.gmra.mrb[12].mxu1 %v4217_v42  ;;  %v4170_v22 = vcombine.low %v2579_v1, %v2670_v56  ;;  %v4173_v52 = vsel %vm3936_vm1, %v6188_v13, %v2670_v56  ;;  %v4175_v12 = vcombine.low %v2582_v9, %v2678_v17  ;;  %v4178_v24 = vsel %vm3936_vm1, %v6190_v41, %v2678_v17  ;;  %v2588_v13 = vld [vmem:[#allocation2 + $0x6c] sm:$0xf] }
 0x314   : > { %v2901_v26 = vshrl.u32 %v4173_v52, 16  ;;  %v2904_v54 = vshll.u32 %v4173_v52, 16  ;;  %v2927_v27 = vshrl.u32 %v4178_v24, 16  ;;  %v2930_v28 = vshll.u32 %v4178_v24, 16  ;;  %4626 = vmatpush3.bf16.msra.mxu0 %v5010_v59  ;;  %4657 = vmatpush3.bf16.msra.mxu1 %v5010_v59 }
 0x315   : > { %v2896_v15 = vshrl.u32 %v4170_v22, 16  ;;  %v2686_v60 = vor.u32 %v2685_v39, %v2682_v23  ;;  %v2922_v3 = vshrl.u32 %v4175_v12, 16  ;;  %v2690_v5 = vrot.slane %v2688_v19, 4  ;;  %4627 = vmatprep.subr.bf16.mxu0 %v5011_v47  ;;  %4650 = vmatprep.subr.bf16.mxu1 %v5011_v47  ;;  %v5016_v22 = vld [vmem:[#allocation17 + $0x30] sm:$0xff]   ;;  %v5017_v39 = vld [vmem:[#allocation17 + $0x38] sm:$0xff]  }
 0x316   : > { %v2903_v62 = vrot.slane %v2901_v26, 7  ;;  %v2693_v16 = vrot.slane %v2691_v21, 5  ;;  %v2929_v32 = vrot.slane %v2927_v27, 7 }
 0x317   : > { %v4198_v61 = vrot.slane %v2896_v15, 11  ;;  %v4180_v8 = vcombine.low %v2585_v18, %v2686_v60  ;;  %v4183_v29 = vsel %vm3936_vm1, %v6218_v57, %v2686_v60  ;;  %v4200_v41 = vrot.slane %v2922_v3, 11 }
 0x318   : > { %v2906_v31 = vor.u32 %v2904_v54, %v2903_v62  ;;  %v2694_v33 = vor.u32 %v2693_v16, %v2690_v5  ;;  %v2953_v37 = vshrl.u32 %v4183_v29, 16  ;;  %v2932_v34 = vor.u32 %v2930_v28, %v2929_v32  ;;  %4628 = vmatpush3.bf16.msra.mxu0 %v5011_v47  ;;  %4658 = vmatpush3.bf16.msra.mxu1 %v5011_v47 }
 0x319   : > { %v2948_v35 = vshrl.u32 %v4180_v8, 16  ;;  %v2956_v36 = vshll.u32 %v4183_v29, 16  ;;  %4629 = vmatprep.subr.bf16.mxu0 %v5012_v58  ;;  %4651 = vmatprep.subr.bf16.mxu1 %v5012_v58 }
 0x31a   : > { %v2907_v38 = vsel %vm5941_vm4, %v4198_v61, %v2906_v31  ;;  %v4185_v25 = vcombine.low %v2588_v13, %v2694_v33  ;;  %v4188_v40 = vsel %vm3936_vm1, %v6216_v53, %v2694_v33  ;;  %v2955_v0 = vrot.slane %v2953_v37, 7 }
 0x31b   : > { %v2933_v43 = vsel %vm5941_vm4, %v4200_v41, %v2932_v34  ;;  %v4202_v44 = vrot.slane %v2948_v35, 11  ;;  %v2979_v57 = vshrl.u32 %v4188_v40, 16  ;;  %v2982_v45 = vshll.u32 %v4188_v40, 16 }
 0x31c   : > { %v4213_v48 = vcombine.high %v2907_v38, %v2933_v43  ;;  %v2958_v14 = vor.u32 %v2956_v36, %v2955_v0  ;;  %v2974_v50 = vshrl.u32 %v4185_v25, 16  ;;  %v4212_v4 = vcombine.low %v2907_v38, %v2933_v43  ;;  %4630 = vmatpush3.bf16.msra.mxu0 %v5012_v58  ;;  %4659 = vmatpush3.bf16.msra.mxu1 %v5012_v58 }
 0x31d   : > { %v2981_v51 = vrot.slane %v2979_v57, 7  ;;  %4631 = vmatprep.subr.bf16.mxu0 %v5013_v46  ;;  %4652 = vmatprep.subr.bf16.mxu1 %v5013_v46 }
 0x31e   : > { %3288 = vmatprep.mubr.bf16.mxu0 %v4213_v48  ;;  %v4204_v30 = vrot.slane %v2974_v50, 11  ;;  %v2959_v11 = vsel %vm5941_vm4, %v4202_v44, %v2958_v14 }
 0x31f   : > { %3289 = vmatmul.mubr.bf16.gmra.mrb[44].mxu0 %v4212_v4  ;;  %v2984_v55 = vor.u32 %v2982_v45, %v2981_v51 }
 0x320   : > { %4632 = vmatpush3.bf16.msra.mxu0 %v5013_v46  ;;  %4660 = vmatpush3.bf16.msra.mxu1 %v5013_v46 }
 0x321   : > { %v2985_v53 = vsel %vm5941_vm4, %v4204_v30, %v2984_v55  ;;  %4633 = vmatprep.subr.bf16.mxu0 %v5014_v6  ;;  %4653 = vmatprep.subr.bf16.mxu1 %v5014_v6 }
 0x322   : > { %v4216_v49 = vcombine.high %v2959_v11, %v2985_v53  ;;  %v4215_v63 = vcombine.low %v2959_v11, %v2985_v53 }
 0x324   : > { %3296 = vmatprep.mubr.bf16.mxu0 %v4216_v49  ;;  %4634 = vmatpush3.bf16.msra.mxu0 %v5014_v6 }
 0x325   : > { %4661 = vmatpush3.bf16.msra.mxu1 %v5014_v6  ;;  %4635 = vmatprep.subr.bf16.mxu0 %v5015_v10 }
 0x326   : > { %4654 = vmatprep.subr.bf16.mxu1 %v5015_v10 }
 0x327   : > { %3297 = vmatmul.mubr.bf16.gmra.mrb[48].mxu0 %v4215_v63 }
 0x328   : > { %4636 = vmatpush3.bf16.msra.mxu0 %v5015_v10 }
 0x329   : > { %4662 = vmatpush3.bf16.msra.mxu1 %v5015_v10  ;;  %4637 = vmatprep.subr.bf16.mxu0 %v5016_v22 }
 0x32a   : > { %4655 = vmatprep.subr.bf16.mxu1 %v5016_v22 }
 0x32c   : > { %4638 = vmatpush3.bf16.msra.mxu0 %v5016_v22 }
 0x32d   : > { %4663 = vmatpush3.bf16.msra.mxu1 %v5016_v22  ;;  %4639 = vmatprep.subr.bf16.mxu0 %v5017_v39 }
 0x32e   : > { %4656 = vmatprep.subr.bf16.mxu1 %v5017_v39 }
 0x330   : > { %4640 = vmatpush3.bf16.msra.mxu0 %v5017_v39 }
 0x331   : > { %4664 = vmatpush3.bf16.msra.mxu1 %v5017_v39 }
 0x36f   : > { %v4357_v1 = vpop.f32.mrb[4].mxu0 }
 0x370   : > { %v4358_v2 = vpop.f32.mrb[5].mxu0 }
 0x371   : > { %v4359_v7 = vadd.f32 %v4358_v2, %v4357_v1  ;;  %v4360_v42 = vpop.f32.mrb[6].mxu0 }
 0x372   : > { %v4361_v9 = vpop.f32.mrb[7].mxu0 }
 0x373   : > { %v4362_v56 = vadd.f32 %v4361_v9, %v4360_v42 }
 0x377   : > { %v4363_v20 = vpop.f32.mrb[8].mxu0 }
 0x378   : > { %v4364_v17 = vpop.f32.mrb[9].mxu0 }
 0x379   : > { %v4365_v19 = vadd.f32 %v4364_v17, %v4363_v20  ;;  %v4366_v21 = vpop.f32.mrb[10].mxu0 }
 0x37a   : > { %v4367_v52 = vpop.f32.mrb[11].mxu0 }
 0x37b   : > { %v4368_v23 = vadd.f32 %v4367_v52, %v4366_v21 }
 0x38e   : > { %v4369_v12 = vpop.f32.mrb[12].mxu0 }
 0x38f   : > { %v4370_v24 = vpop.f32.mrb[13].mxu0 }
 0x390   : > { %v4371_v26 = vadd.f32 %v4370_v24, %v4369_v12  ;;  %v4372_v54 = vpop.f32.mrb[14].mxu0 }
 0x391   : > { %v4373_v18 = vpop.f32.mrb[15].mxu0 }
 0x392   : > { %v4374_v15 = vadd.f32 %v4373_v18, %v4372_v54 }
 0x396   : > { %v4375_v27 = vpop.f32.mrb[16].mxu0 }
 0x397   : > { %v4376_v28 = vpop.f32.mrb[17].mxu0 }
 0x398   : > { %v4377_v60 = vadd.f32 %v4376_v28, %v4375_v27  ;;  %v4378_v62 = vpop.f32.mrb[18].mxu0 }
 0x399   : > { %v4379_v3 = vpop.f32.mrb[19].mxu0 }
 0x39a   : > { %v4380_v5 = vadd.f32 %v4379_v3, %v4378_v62 }
 0x39e   : > { %v4409_v16 = vpop.f32.mrb[20].mxu0 }
 0x39f   : > { %v4410_v61 = vpop.f32.mrb[21].mxu0 }
 0x3a0   : > { %v4411_v32 = vadd.f32 %v4410_v61, %v4409_v16  ;;  %v4412_v13 = vpop.f32.mrb[22].mxu0 }
 0x3a1   : > { %v4413_v8 = vpop.f32.mrb[23].mxu0 }
 0x3a2   : > { %v4668_v29 = vadd.f32 %v4411_v32, %v4359_v7  ;;  %v4414_v31 = vadd.f32 %v4413_v8, %v4412_v13 }
 0x3a4   : > { %v4674_v41 = vadd.f32 %v4414_v31, %v4362_v56  ;;  %v6268_v56 = vld [vmem:[#allocation14] ss:$0 sm:$0xff] }
 0x3b0   : > { %v4415_v33 = vpop.f32.mrb[24].mxu0 }
 0x3b1   : > { %v4416_v37 = vpop.f32.mrb[25].mxu0 }
 0x3b2   : > { %v4417_v34 = vadd.f32 %v4416_v37, %v4415_v33  ;;  %v4418_v35 = vpop.f32.mrb[26].mxu0 }
 0x3b3   : > { %v4419_v36 = vpop.f32.mrb[27].mxu0 }
 0x3b4   : > { %v4665_v38 = vadd.f32 %v4417_v34, %v4365_v19  ;;  %v4420_v25 = vadd.f32 %v4419_v36, %v4418_v35  ;;  %v6270_v19 = vld [vmem:[#allocation15] ss:$0 sm:$0xff] }
 0x3b6   : > { %v4671_v40 = vadd.f32 %v4420_v25, %v4368_v23 }
 0x3c1   : > { %v4421_v0 = vpop.f32.mrb[28].mxu0 }
 0x3c2   : > { %v4422_v43 = vpop.f32.mrb[29].mxu0 }
 0x3c3   : > { %v4423_v44 = vadd.f32 %v4422_v43, %v4421_v0  ;;  %v4424_v57 = vpop.f32.mrb[30].mxu0 }
 0x3c4   : > { %v4425_v45 = vpop.f32.mrb[31].mxu0 }
 0x3c5   : > { %v4680_v48 = vadd.f32 %v4423_v44, %v4371_v26  ;;  %v4426_v14 = vadd.f32 %v4425_v45, %v4424_v57 }
 0x3c7   : > { %v6262_v50 = vadd.f32 %v4426_v14, %v4374_v15 }
 0x3c9   : > { %v4427_v4 = vpop.f32.mrb[32].mxu0 }
 0x3ca   : > { %v4428_v51 = vpop.f32.mrb[33].mxu0 }
 0x3cb   : > { %v4429_v30 = vadd.f32 %v4428_v51, %v4427_v4  ;;  %v4430_v11 = vpop.f32.mrb[34].mxu0 }
 0x3cc   : > { %v4431_v55 = vpop.f32.mrb[35].mxu0 }
 0x3cd   : > { %v6264_v53 = vadd.f32 %v4429_v30, %v4377_v60  ;;  %v4432_v49 = vadd.f32 %v4431_v55, %v4430_v11 }
 0x3cf   : > { %v6266_v63 = vadd.f32 %v4432_v49, %v4380_v5 }
 0x3d1   : > { %v4461_v59 = vpop.f32.mrb[36].mxu0 }
 0x3d2   : > { %v4462_v47 = vpop.f32.mrb[37].mxu0 }
 0x3d3   : > { %v4463_v58 = vadd.f32 %v4462_v47, %v4461_v59  ;;  %v4464_v46 = vpop.f32.mrb[38].mxu0  ;;  %v4619_v1 = vpop.f32.mrb[8].mxu1 }
 0x3d4   : > { %v4465_v2 = vpop.f32.mrb[39].mxu0  ;;  %v3339_v6 = vpop.f32.mrb[9].mxu1 }
 0x3d5   : > { %v4669_v7 = vadd.f32 %v4668_v29, %v4463_v58  ;;  %v4466_v42 = vadd.f32 %v4465_v2, %v4464_v46  ;;  %v4620_v9 = vpop.f32.mrb[10].mxu1 }
 0x3d6   : > { %v3342_v10 = vpop.f32.mrb[11].mxu1 }
 0x3d7   : > { %v4670_v20 = vadd.f32 %v4669_v7, %v3339_v6  ;;  %v4675_v17 = vadd.f32 %v4674_v41, %v4466_v42 }
 0x3d9   : > { %v3385_v21 = vmul.f32 %v4670_v20, %v6268_v56  ;;  %v4676_v22 = vadd.f32 %v4675_v17, %v3342_v10 }
 0x3db   : > { %v3386_v52 = vmul.f32 %v4676_v22, %v6268_v56  ;;  %v3400_v23 = vadd.f32 %v6270_v19, %v3385_v21 }
 0x3dd   : > { %v3401_v39 = vadd.f32 %v6270_v19, %v3386_v52  ;;  %v3408_v12 = vmax.f32 %v3400_v23, 0.0  ;;  %v4252_v52 = vld [vmem:[#allocation18] ss:$0 sm:$0xff]  ;;  %v4279_v23 = vld [vmem:[%s5897_s14] sm:$0xff]  }
 0x3df   : > { %v3409_v24 = vmax.f32 %v3401_v39, 0.0 }
 0x3e1   : > { %v3416_v26 = vpack.c.bf16 %v3409_v24, %v3408_v12  ;;  %v4253_v12 = vld [vmem:[#allocation20] ss:$0 sm:$0xff] }
 0x3e3   : > { %4641 = vmatprep.mubr.bf16.mxu0 %v3416_v26 }
 0x3e4   : > { %v4467_v54 = vpop.f32.mrb[40].mxu0 }
 0x3e5   : > { %v4468_v15 = vpop.f32.mrb[41].mxu0 }
 0x3e6   : > { %v4623_v18 = vpop.f32.mrb[12].mxu1  ;;  %v4469_v28 = vadd.f32 %v4468_v15, %v4467_v54  ;;  %v4470_v60 = vpop.f32.mrb[42].mxu0  ;;  %v4280_v15 = vunpack.c.l.bf16 %v4279_v23 }
 0x3e7   : > { %v3355_v27 = vpop.f32.mrb[13].mxu1  ;;  %v4471_v3 = vpop.f32.mrb[43].mxu0 }
 0x3e8   : > { %v4624_v62 = vpop.f32.mrb[14].mxu1  ;;  %v4666_v16 = vadd.f32 %v4665_v38, %v4469_v28  ;;  %v4472_v61 = vadd.f32 %v4471_v3, %v4470_v60 }
 0x3e9   : > { %v3358_v5 = vpop.f32.mrb[15].mxu1 }
 0x3ea   : > { %v4667_v32 = vadd.f32 %v4666_v16, %v4619_v1  ;;  %v4672_v13 = vadd.f32 %v4671_v40, %v4472_v61 }
 0x3ec   : > { %v3387_v8 = vmul.f32 %v4667_v32, %v6268_v56  ;;  %v4673_v29 = vadd.f32 %v4672_v13, %v4620_v9 }
 0x3ee   : > { %v3402_v31 = vadd.f32 %v6270_v19, %v3387_v8  ;;  %v3388_v41 = vmul.f32 %v4673_v29, %v6268_v56 }
 0x3f0   : > { %v3403_v33 = vadd.f32 %v6270_v19, %v3388_v41  ;;  %v3410_v34 = vmax.f32 %v3402_v31, 0.0 }
 0x3f2   : > { %v4473_v37 = vpop.f32.mrb[44].mxu0  ;;  %v3411_v35 = vmax.f32 %v3403_v33, 0.0 }
 0x3f3   : > { %v4474_v36 = vpop.f32.mrb[45].mxu0 }
 0x3f4   : > { %v4475_v25 = vadd.f32 %v4474_v36, %v4473_v37  ;;  %v4476_v0 = vpop.f32.mrb[46].mxu0  ;;  %v3417_v43 = vpack.c.bf16 %v3411_v35, %v3410_v34  ;;  %v4316_v36 = vld [vmem:[%s5897_s14 + $0x18] sm:$0xff]  }
 0x3f5   : > { %v4477_v38 = vpop.f32.mrb[47].mxu0 }
 0x3f6   : > { %v4681_v44 = vadd.f32 %v4680_v48, %v4475_v25  ;;  %v4478_v57 = vadd.f32 %v4477_v38, %v4476_v0  ;;  %4642 = vmatmul.mubr.bf16.vlgmr.msra.gmra.mrb[52].mxu0 %v3417_v43  ;;  %v4315_v25 = vld [vmem:[%s5897_s14 + $0x10] sm:$0xff]   ;;  %v4292_v38 = vunpack.c.l.bf16 %v4316_v36 }
 0x3f8   : > { %v4682_v40 = vadd.f32 %v4681_v44, %v3355_v27  ;;  %v4687_v45 = vadd.f32 %v6262_v50, %v4478_v57 }
 0x3fa   : > { %v3389_v14 = vmul.f32 %v4682_v40, %v6268_v56  ;;  %v4688_v4 = vadd.f32 %v4687_v45, %v3358_v5  ;;  %v4479_v51 = vpop.f32.mrb[48].mxu0  ;;  %v4281_v5 = vunpack.c.h.bf16 %v4279_v23  ;;  %v4288_v40 = vunpack.c.l.bf16 %v4315_v25 }
 0x3fb   : > { %v4480_v30 = vpop.f32.mrb[49].mxu0 }
 0x3fc   : > { %v3390_v11 = vmul.f32 %v4688_v4, %v6268_v56  ;;  %v4481_v55 = vadd.f32 %v4480_v30, %v4479_v51  ;;  %v4482_v49 = vpop.f32.mrb[50].mxu0  ;;  %v3404_v59 = vadd.f32 %v6270_v19, %v3389_v14  ;;  %v4293_v51 = vunpack.c.h.bf16 %v4316_v36 }
 0x3fd   : > { %v4483_v47 = vpop.f32.mrb[51].mxu0 }
 0x3fe   : > { %v4678_v58 = vadd.f32 %v6264_v53, %v4481_v55  ;;  %v4484_v48 = vadd.f32 %v4483_v47, %v4482_v49  ;;  %v3405_v46 = vadd.f32 %v6270_v19, %v3390_v11  ;;  %v3412_v2 = vmax.f32 %v3404_v59, 0.0 }
 0x3ff   : > { %v4289_v49 = vunpack.c.h.bf16 %v4315_v25 }
 0x400   : > { %v4679_v1 = vadd.f32 %v4678_v58, %v4623_v18  ;;  %v4684_v50 = vadd.f32 %v6266_v63, %v4484_v48  ;;  %v3413_v6 = vmax.f32 %v3405_v46, 0.0  ;;  %v4314_v63 = vld [vmem:[%s5897_s14 + $0x8] sm:$0xff]  }
 0x401   : > { %v4284_v26 = vunpack.c.l.bf16 %v4314_v63  ;;  %v4285_v60 = vunpack.c.h.bf16 %v4314_v63 }
 0x402   : > { %v3391_v7 = vmul.f32 %v4679_v1, %v6268_v56  ;;  %v4685_v42 = vadd.f32 %v4684_v50, %v4624_v62  ;;  %v3418_v9 = vpack.c.bf16 %v3413_v6, %v3412_v2 }
 0x404   : > { %v3406_v10 = vadd.f32 %v6270_v19, %v3391_v7  ;;  %v3392_v20 = vmul.f32 %v4685_v42, %v6268_v56  ;;  %4645 = vmatprep.mubr.bf16.mxu1 %v3418_v9 }
 0x406   : > { %v3407_v53 = vadd.f32 %v6270_v19, %v3392_v20  ;;  %v3414_v17 = vmax.f32 %v3406_v10, 0.0 }
 0x408   : > { %v3415_v21 = vmax.f32 %v3407_v53, 0.0 }
 0x40a   : > { %v3419_v22 = vpack.c.bf16 %v3415_v21, %v3414_v17 }
 0x40c   : > { %4646 = vmatmul.mubr.bf16.vlgmr.msra.gmra.mrb[16].mxu1 %v3419_v22 }
 0x4c9   : > { %v4643_v39 = vpop.f32.mrb[52].mxu0 }
 0x4ca   : > { %v3558_v24 = vmul.f32 %v4643_v39, %v4252_v52  ;;  %v3518_v54 = vpop.f32.mrb[53].mxu0 }
 0x4cb   : > { %v3556_v18 = vmul.f32 %v4252_v52, %v3518_v54  ;;  %v4644_v27 = vpop.f32.mrb[54].mxu0 }
 0x4cc   : > { %v3573_v28 = vadd.f32 %v4253_v12, %v3558_v24  ;;  %v3559_v56 = vmul.f32 %v4644_v27, %v4252_v52  ;;  %v3521_v62 = vpop.f32.mrb[55].mxu0 }
 0x4cd   : > { %v3571_v19 = vadd.f32 %v4253_v12, %v3556_v18  ;;  %v3557_v3 = vmul.f32 %v4252_v52, %v3521_v62 }
 0x4ce   : > { %v3597_v16 = vadd.f32 %v4284_v26, %v3573_v28  ;;  %v3574_v61 = vadd.f32 %v4253_v12, %v3559_v56 }
 0x4cf   : > { %v3595_v32 = vadd.f32 %v4280_v15, %v3571_v19  ;;  %v3572_v13 = vadd.f32 %v4253_v12, %v3557_v3 }
 0x4d0   : > { %v3598_v8 = vadd.f32 %v4285_v60, %v3574_v61  ;;  %v3605_v31 = vmax.f32 %v3597_v16, 0.0 }
 0x4d1   : > { %v3596_v29 = vadd.f32 %v4281_v5, %v3572_v13  ;;  %v3603_v33 = vmax.f32 %v3595_v32, 0.0 }
 0x4d2   : > { %v3606_v41 = vmax.f32 %v3598_v8, 0.0 }
 0x4d3   : > { %v3604_v37 = vmax.f32 %v3596_v29, 0.0 }
 0x4d4   : > { %v4302_v34 = vpack.c.bf16 %v3606_v41, %v3605_v31 }
 0x4d5   : > { %v4297_v35 = vpack.c.bf16 %v3604_v37, %v3603_v33 }
 0x4d6   : > { %4317 = vst [vmem:[%s6295_s23 + $0x8] sm:$0xff] %v4302_v34  }
 0x4d7   : > { %4298 = vst [vmem:[%s6295_s23] sm:$0xff] %v4297_v35  }
 0x4df   : > { %v4647_v0 = vpop.f32.mrb[16].mxu1 }
 0x4e0   : > { %v3562_v43 = vmul.f32 %v4647_v0, %v4252_v52  ;;  %v3534_v44 = vpop.f32.mrb[17].mxu1 }
 0x4e1   : > { %v3560_v57 = vmul.f32 %v4252_v52, %v3534_v44  ;;  %v4648_v45 = vpop.f32.mrb[18].mxu1 }
 0x4e2   : > { %v3577_v14 = vadd.f32 %v4253_v12, %v3562_v43  ;;  %v3563_v4 = vmul.f32 %v4648_v45, %v4252_v52  ;;  %v3537_v30 = vpop.f32.mrb[19].mxu1 }
 0x4e3   : > { %v3575_v11 = vadd.f32 %v4253_v12, %v3560_v57  ;;  %v3561_v55 = vmul.f32 %v4252_v52, %v3537_v30 }
 0x4e4   : > { %v3601_v59 = vadd.f32 %v4292_v38, %v3577_v14  ;;  %v3578_v47 = vadd.f32 %v4253_v12, %v3563_v4 }
 0x4e5   : > { %v3599_v58 = vadd.f32 %v4288_v40, %v3575_v11  ;;  %v3576_v48 = vadd.f32 %v4253_v12, %v3561_v55 }
 0x4e6   : > { %v3602_v46 = vadd.f32 %v4293_v51, %v3578_v47  ;;  %v3609_v50 = vmax.f32 %v3601_v59, 0.0 }
 0x4e7   : > { %v3600_v1 = vadd.f32 %v4289_v49, %v3576_v48  ;;  %v3607_v6 = vmax.f32 %v3599_v58, 0.0 }
 0x4e8   : > { %v3610_v2 = vmax.f32 %v3602_v46, 0.0 }
 0x4e9   : > { %v3608_v7 = vmax.f32 %v3600_v1, 0.0 }
 0x4ea   : > { %v4312_v42 = vpack.c.bf16 %v3610_v2, %v3609_v50 }
 0x4eb   : > { %v4307_v9 = vpack.c.bf16 %v3608_v7, %v3607_v6 }
 0x4ec   : > { %4319 = vst [vmem:[%s6295_s23 + $0x18] sm:$0xff] %v4312_v42  }
 0x4ed   : > { %4318 = vst [vmem:[%s6295_s23 + $0x10] sm:$0xff] %v4307_v9  }
 0x4ee   : > { %5343 = shalt.err (!%p5340_p3)
}
 0x4ef   : > { %s5344_s14 = scalar_lea.hbm %s6308_s5, 512  ;;  %s5348_s1 = scalar_lea.hbm %s6432_s3, 1024 }
 0x4f0   : > { %p5345_p12 = scmp.ne.s32.totalorder %s6308_s5, %s5344_s14  ;;  %p5349_p0 = scmp.lt.u32.totalorder %s6308_s5, %s6432_s3 }
 0x4f1   : > { %p5350_p7 = scmp.lt.u32.totalorder %s5348_s1, %s5344_s14  ;;  %p5352_p2 = scmp.lt.u32.totalorder %s5344_s14, %s6308_s5 }
 0x4f2   : > { %p5346_p13 = pnand %p5345_p12, %p6433_p4 }
 0x4f3   : > { %p5351_p5 = por %p5350_p7, %p5349_p0 }
 0x4f4   : > { %p5347_p6 = pneg %p5346_p13 }
 0x4f5   : > { %p5353_p9 = por %p5352_p2, %p5351_p5 }
 0x4f7   : > { %p5354_p1 = pnand %p5353_p9, %p5347_p6 }
 0x4f9   : > { %5357 = shalt.err (!%p5354_p1)
}
 0x4fa   : > { %s5455_s20 = smov 64   ;;  %s5456_s25 = smov 4  }
 0x4fb   : > { %4745 = dma.vmem_to_hbm [thread:$0]  (%p6433_p4), %s6303_s4, 512, %s6308_s5, %s3652_s7, %s5455_s20, %s5455_s20, %s5456_s25  }
 0x4fc PF: > { %s3682_s13 = sand.u32 1, %s5416_s17   ;;  %p6434_p10 = scmp.ne.s32.totalorder %s6410_s0, 0 }
 0x4fd   : > { %p6435_p11 = scmp.ge.s32.totalorder %s5436_s22, 2  ;;  %s3683_s27 = scalar_lea.sflag [#allocation5], %s3682_s13 }
 0x4ff   : > { %p4783_p8 = pnand %p6435_p11, %p6434_p10 }
 0x501   : > { %5411 = dma.done.wait (!%p4783_p8), %s3683_s27, 512  }
 0x502   : > { %5413 = vsyncadd (!%p4783_p8), %s3683_s27, 4294966784  ;;  %s34_s22 = sadd.s32 1, %s5436_s22   ;;  %s6436_s17 = smov %s5420_s18 }
 0x503   : > { %p31_p3 = scmp.ge.s32.totalorder %s34_s22, 4   ;;  %s6437_s18 = smov %s5424_s19 }
 0x504   : > { %s6438_s19 = smov %s5790_s24  ;;  %s6439_s20 = smov %s5432_s21 }
 0x505   : > { %s6440_s21 = smov %s6442_s28  ;;  %33 = sbr.rel (!%p31_p3) target bundleno = 24 (0x18), region = 171 }
 0x50c   :  { %3688 = vsyncpa [#allocation4], 1 }
 0x50d   :  { %3690 = vsyncpa [#allocation4 + $0x1], 1 }
 0x50e   :  { %3691 = vsyncpa [#allocation7], 1 }
 0x50f   :  { %3693 = vsyncpa [#allocation7 + $0x1], 1 }
 0x510   :  { %3694 = vsyncpa [#allocation10], 1 }
 0x511   :  { %3695 = vsyncpa [#allocation13], 1 }
 0x512   :  { %3696 = vsyncpa [#allocation16], 1 }
 0x513   :  { %3697 = vsyncpa [#allocation19], 1 }
 0x514   :  { %3698 = vsyncpa [#allocation5], 1 }
 0x515   :  { %3700 = vsyncpa [#allocation5 + $0x1], 1 }

</bundles_post_ra>
